<compile_context>
chip_gen: v7x
topology: tpu7x:2x2x1
jax: 0.10.0
libtpu: 0.0.40
codegen_flags: <defaults>
</compile_context>

<pallas_src>
import functools

import numpy as np
import jax
import jax.numpy as jnp
from jax.experimental import pallas as pl
from jax.experimental.pallas import tpu as pltpu


# -----------------------------------------------------------------------------
# Pallas kernels
# -----------------------------------------------------------------------------
def _upconv_kernel(x_ref, w_ref, b_ref, o_ref):
    # x: (1, Cin, H*W) bf16, w: (4*Cout, Cin) bf16, b: (4*Cout, 1) f32
    # o: (1, 4*Cout, H*W) bf16   (lane axis = pixels -> lane-dense store)
    y = jnp.dot(w_ref[...], x_ref[0], preferred_element_type=jnp.float32)
    o_ref[0] = (y + b_ref[...]).astype(o_ref.dtype)


def _conv3x3_kernel(*refs, n_src, w_store, h_out, w_valid_out, relu, stats,
                    compact):
    """3x3 VALID conv on channels-on-sublanes flattened images.

    refs = (src_0..src_{n_src-1}, w, bias[, mask], y[, ssum, ssq])
      src_s : (1, Cin_s, Hin*w_store) bf16   flattened input (stored width w_store)
      w     : (Cout, sum_s 9*Cin_s)   bf16   K order = (source, tap, cin)
      bias  : (Cout, 1)               f32
      mask  : (1, rows)               f32    1.0 on valid (non-phantom) columns
      y     : (1, Cout, h_out*w_store) bf16, or (1, Cout, h_out*w_valid_out) if compact
      ssum/ssq : (1, Cout, 1)         f32    BN batch stats of ReLU'd valid pixels
    """
    srcs = refs[:n_src]
    w_ref = refs[n_src]
    b_ref = refs[n_src + 1]
    idx = n_src + 2
    if stats:
        mask_ref = refs[idx]
        idx += 1
    y_ref = refs[idx]
    idx += 1

    rows = h_out * w_store - 2      # last 2 flattened positions are phantom-only
    # bf16 packs 16 rows per sublane tile: concatenate bf16 chunks directly only
    # when every chunk is 16-row aligned, otherwise build the slab in f32 and
    # cast once (keeps the MXU in bf16 either way).
    bf16_ok = all(int(s.shape[1]) % 16 == 0 for s in srcs)

    # In-kernel im2col: 9 shifted CONTIGUOUS lane-slices per source, stacked on
    # sublanes -> one (sum_s 9*Cin_s, rows) slab; a single big-K MXU matmul.
    chunks = []
    for s in range(n_src):
        for t in range(9):
            off = (t // 3) * w_store + (t % 3)
            sl = srcs[s][0, :, off:off + rows]
            chunks.append(sl if bf16_ok else sl.astype(jnp.float32))
    slab = jnp.concatenate(chunks, axis=0)
    if not bf16_ok:
        slab = slab.astype(jnp.bfloat16)

    acc = jnp.dot(w_ref[...], slab, preferred_element_type=jnp.float32)
    acc = acc + b_ref[...]
    if relu:
        acc = jnp.maximum(acc, 0.0)

    if stats:
        # BN batch stats over valid pixels only; phantom columns are zeroed by a
        # precomputed (1, rows) 0/1 mask input (no per-step iota/mod filler).
        masked = acc * mask_ref[...]
        ssum_ref, ssq_ref = refs[idx], refs[idx + 1]
        ssum_ref[0] = jnp.sum(masked, axis=-1, keepdims=True)
        ssq_ref[0] = jnp.sum(masked * acc, axis=-1, keepdims=True)

    if compact:
        # Fused tail compaction: drop each row's phantom columns on store so the
        # next block never re-reads/rewrites the activation in XLA.
        for r in range(h_out):
            y_ref[0, :, r * w_valid_out:(r + 1) * w_valid_out] = (
                acc[:, r * w_store:r * w_store + w_valid_out].astype(y_ref.dtype))
    else:
        y_ref[0, :, :rows] = acc.astype(y_ref.dtype)
        y_ref[0, :, rows:] = jnp.zeros((y_ref.shape[1], 2), y_ref.dtype)


# -----------------------------------------------------------------------------
# Pallas wrappers
# -----------------------------------------------------------------------------
def _upconv(x_t, w4, b4):
    n, cin, hw = x_t.shape
    c4 = w4.shape[0]
    return pl.pallas_call(
        _upconv_kernel,
        out_shape=jax.ShapeDtypeStruct((n, c4, hw), jnp.bfloat16),
        grid=(n,),
        in_specs=[pl.BlockSpec((1, cin, hw), lambda i: (i, 0, 0)),
                  pl.BlockSpec((c4, cin), lambda i: (0, 0)),
                  pl.BlockSpec((c4, 1), lambda i: (0, 0))],
        out_specs=pl.BlockSpec((1, c4, hw), lambda i: (i, 0, 0)),
        compiler_params=pltpu.CompilerParams(dimension_semantics=("parallel",)),
    )(x_t, w4, b4)


def _conv3x3(srcs, w_mat, bias, h_in, w_store, w_valid_in, *, relu, stats,
             compact):
    """Fused 3x3 conv over channels-on-sublanes flattened images."""
    n = srcs[0].shape[0]
    c_out = w_mat.shape[0]
    h_out = h_in - 2
    w_valid_out = w_valid_in - 2
    rows = h_out * w_store - 2
    lanes_out = h_out * (w_valid_out if compact else w_store)

    kernel = functools.partial(
        _conv3x3_kernel, n_src=len(srcs), w_store=w_store, h_out=h_out,
        w_valid_out=w_valid_out, relu=relu, stats=stats, compact=compact)

    inputs = list(srcs) + [w_mat, bias]
    in_specs = (
        [pl.BlockSpec((1,) + s.shape[1:], lambda i: (i, 0, 0)) for s in srcs]
        + [pl.BlockSpec(w_mat.shape, lambda i: (0, 0)),
           pl.BlockSpec(bias.shape, lambda i: (0, 0))])
    if stats:
        col = np.arange(rows, dtype=np.int64) % w_store
        mask = jnp.asarray((col < w_valid_out).astype(np.float32)[None, :])
        inputs.append(mask)
        in_specs.append(pl.BlockSpec((1, rows), lambda i: (0, 0)))

    out_shape = [jax.ShapeDtypeStruct((n, c_out, lanes_out), jnp.bfloat16)]
    out_specs = [pl.BlockSpec((1, c_out, lanes_out), lambda i: (i, 0, 0))]
    if stats:
        out_shape += [jax.ShapeDtypeStruct((n, c_out, 1), jnp.float32)] * 2
        out_specs += [pl.BlockSpec((1, c_out, 1), lambda i: (i, 0, 0))] * 2

    res = pl.pallas_call(
        kernel,
        out_shape=tuple(out_shape),
        grid=(n,),
        in_specs=in_specs,
        out_specs=tuple(out_specs),
        compiler_params=pltpu.CompilerParams(dimension_semantics=("parallel",)),
    )(*inputs)
    return res if stats else res[0]


# -----------------------------------------------------------------------------
# Decoder forward (Pallas)
# -----------------------------------------------------------------------------
def decoder_forward(x_nchw, encoder_features_nchw, params, eps=1e-5):
    n, c, h, w = x_nchw.shape
    # channels-on-sublanes flattened layout == NCHW flattened: free reshape.
    x_t = x_nchw.reshape(n, c, h * w).astype(jnp.bfloat16)

    for p, enc_nchw in zip(params, encoder_features_nchw):
        c_in = x_t.shape[1]
        c1 = p["up_b"].shape[0]

        # --- ConvTranspose2d(c_in, c1, 2, 2): one (4c1,cin)@(cin,hw) matmul ---
        w4 = (jnp.transpose(p["up_w"], (2, 3, 1, 0))
              .reshape(4 * c1, c_in).astype(jnp.bfloat16))
        b4 = jnp.tile(p["up_b"], 4).reshape(4 * c1, 1)
        y4 = _upconv(x_t, w4, b4)                          # (n, 4*c1, h*w) bf16
        h_up, w_up = 2 * h, 2 * w
        # 2x2 pixel-shuffle (single XLA transpose pass, bf16).
        up_t = (y4.reshape(n, 2, 2, c1, h, w)
                .transpose(0, 3, 4, 1, 5, 2)
                .reshape(n, c1, h_up * w_up))

        # --- crop encoder features (NCHW slice + reshape, no transpose) ------
        h2, w2 = enc_nchw.shape[2], enc_nchw.shape[3]
        assert (h2 - h_up) % 2 == 0 and (w2 - w_up) % 2 == 0  # torch.cat req.
        dh0, dw0 = (h2 - h_up) // 2, (w2 - w_up) // 2
        enc_t = (enc_nchw[:, :, dh0:dh0 + h_up, dw0:dw0 + w_up]
                 .reshape(n, c1, h_up * w_up).astype(jnp.bfloat16))

        # --- conv1 + bias + ReLU + BN batch stats; concat folded into one K --
        w1 = (p["conv1_w"].reshape(c1, 2, c1, 3, 3)
              .transpose(0, 1, 3, 4, 2)                    # (co, src, dh, dw, ci)
              .reshape(c1, 2 * 9 * c1).astype(jnp.bfloat16))
        b1 = p["conv1_b"].reshape(c1, 1)
        y1, ssum, ssq = _conv3x3([up_t, enc_t], w1, b1, h_up, w_up, w_up,
                                 relu=True, stats=True, compact=False)
        h_c1, w_c1 = h_up - 2, w_up - 2                    # conv1 valid image size

        # --- BatchNorm (training-mode batch stats) folded into conv2 ---------
        # NOTE: single-pass E[x^2]-mean^2 in f32; fine at these scales.
        count = n * h_c1 * w_c1
        mean = jnp.sum(ssum, axis=(0, 2)) / count
        var = jnp.sum(ssq, axis=(0, 2)) / count - mean * mean
        scale = p["bn_gamma"] * jax.lax.rsqrt(var + eps)
        shift = p["bn_beta"] - mean * scale
        w2_mat = p["conv2_w"].transpose(0, 2, 3, 1).reshape(c1, 9 * c1)
        w2f = (w2_mat * jnp.tile(scale, 9)[None, :]).astype(jnp.bfloat16)
        b2f = (p["conv2_b"]
               + w2_mat.reshape(c1, 9, c1).sum(axis=1) @ shift).reshape(c1, 1)

        # --- conv2 (BN-folded weights), phantom-column compaction fused ------
        x_t = _conv3x3([y1], w2f, b2f, h_c1, w_up, w_c1,
                       relu=False, stats=False, compact=True)
        h, w = h_c1 - 2, w_c1 - 2

    return x_t.reshape(n, x_t.shape[1], h, w).astype(jnp.float32)   # -> NCHW


# -----------------------------------------------------------------------------
# Pure-JAX reference (mirrors the PyTorch module op-for-op, f32)
# -----------------------------------------------------------------------------
def _ref_conv3x3(x, w, b):
    y = jax.lax.conv_general_dilated(x, w, (1, 1), 'VALID',
                                     dimension_numbers=('NCHW', 'OIHW', 'NCHW'))
    return y + b[None, :, None, None]


def _ref_decoder(x, encs, params, eps=1e-5):
    for p, enc in zip(params, encs):
        y = jnp.einsum('nchw,cdab->ndhawb', x, p["up_w"])
        n, co, hh, _, ww, _ = y.shape
        x = y.reshape(n, co, 2 * hh, 2 * ww) + p["up_b"][None, :, None, None]
        h2, w2 = enc.shape[2], enc.shape[3]
        dh, dw = (h2 - x.shape[2]) // 2, (w2 - x.shape[3]) // 2
        enc_c = enc[:, :, dh:h2 - dh, dw:w2 - dw]
        x = jnp.concatenate([x, enc_c], axis=1)
        x = _ref_conv3x3(x, p["conv1_w"], p["conv1_b"])
        x = jnp.maximum(x, 0.0)
        mean = jnp.mean(x, axis=(0, 2, 3), keepdims=True)
        var = jnp.mean((x - mean) ** 2, axis=(0, 2, 3), keepdims=True)
        x = ((x - mean) * jax.lax.rsqrt(var + eps)
             * p["bn_gamma"][None, :, None, None] + p["bn_beta"][None, :, None, None])
        x = _ref_conv3x3(x, p["conv2_w"], p["conv2_b"])
    return x


# -----------------------------------------------------------------------------
# Parameters
# -----------------------------------------------------------------------------
def init_params(key, chs):
    params = []
    for i in range(len(chs) - 1):
        cin, cout = chs[i], chs[i + 1]
        keys = jax.random.split(key, 8)
        key = keys[-1]
        params.append({
            "up_w": 0.1 * jax.random.normal(keys[0], (cin, cout, 2, 2), jnp.float32),
            "up_b": 0.1 * jax.random.normal(keys[1], (cout,), jnp.float32),
            "conv1_w": 0.1 * jax.random.normal(keys[2], (cout, cin, 3, 3), jnp.float32),
            "conv1_b": 0.1 * jax.random.normal(keys[3], (cout,), jnp.float32),
            "bn_gamma": 1.0 + 0.1 * jax.random.normal(keys[4], (cout,), jnp.float32),
            "bn_beta": 0.1 * jax.random.normal(keys[5], (cout,), jnp.float32),
            "conv2_w": 0.1 * jax.random.normal(keys[6], (cout, cout, 3, 3), jnp.float32),
            "conv2_b": 0.1 * jax.random.normal(keys[7], (cout,), jnp.float32),
        })
    return params


if __name__ == "__main__":
    # Small config consistent with the module: channels halve at every stage.
    chs = (32, 16, 8)
    N, H0, W0 = 2, 8, 8

    key = jax.random.PRNGKey(0)
    k_x, k_e0, k_e1, k_p = jax.random.split(key, 4)

    x = jax.random.normal(k_x, (N, chs[0], H0, W0), jnp.float32)
    encoder_features = [
        jax.random.normal(k_e0, (N, chs[1], 2 * H0 + 2, 2 * W0 + 2), jnp.float32),
        jax.random.normal(k_e1, (N, chs[2], 4 * H0 - 6, 4 * W0 - 6), jnp.float32),
    ]
    params = init_params(k_p, chs)

    fwd = jax.jit(decoder_forward)
    out = jax.block_until_ready(fwd(x, encoder_features, params))
    ref = jax.block_until_ready(_ref_decoder(x, encoder_features, params))

    assert out.shape == (N, chs[-1], 4 * H0 - 12, 4 * W0 - 12), out.shape
    assert bool(jnp.all(jnp.isfinite(out)))
    # bf16 operands / intermediates -> looser tolerance vs. the f32 reference.
    assert jnp.allclose(out, ref, atol=5e-2, rtol=5e-2), float(
        jnp.max(jnp.abs(out - ref)))

    print("KERNEL_OK")
</pallas_src>

<mosaic_0001>
module attributes {stable_mosaic.version = 11 : i64} {
  func.func @_upconv_kernel(%arg0: i32, %arg1: memref<1x32x64xbf16, #tpu.memory_space<vmem>>, %arg2: memref<64x32xbf16, #tpu.memory_space<vmem>>, %arg3: memref<64x1xf32, #tpu.memory_space<vmem>>, %arg4: memref<1x64x64xbf16, #tpu.memory_space<vmem>>) attributes {dimension_semantics = [#tpu.dimension_semantics<parallel>], iteration_bounds = array<i64: 2>, scalar_prefetch = 0 : i64, scratch_operands = 0 : i64, tpu.core_type = #tpu.core_type<tc>, window_params = [{transform_indices = @transform_0, window_bounds = array<i64: 1, 32, 64>}, {pipeline_mode = #tpu.pipeline_mode<synchronous>, transform_indices = @transform_1, window_bounds = array<i64: 64, 32>}, {pipeline_mode = #tpu.pipeline_mode<synchronous>, transform_indices = @transform_2, window_bounds = array<i64: 64, 1>}, {transform_indices = @transform_3, window_bounds = array<i64: 1, 64, 64>}]} {
    %c0 = arith.constant 0 : index
    %c0_0 = arith.constant 0 : index
    %0 = vector.load %arg2[%c0, %c0_0] : memref<64x32xbf16, #tpu.memory_space<vmem>>, vector<64x32xbf16>
    %c0_1 = arith.constant 0 : index
    %c0_2 = arith.constant 0 : index
    %c0_3 = arith.constant 0 : index
    %1 = vector.load %arg1[%c0_1, %c0_2, %c0_3] : memref<1x32x64xbf16, #tpu.memory_space<vmem>>, vector<1x32x64xbf16>
    %2 = vector.shape_cast %1 : vector<1x32x64xbf16> to vector<32x64xbf16>
    %cst = arith.constant dense<0.000000e+00> : vector<64x64xf32>
    %3 = tpu.matmul %0, %2, %cst {dimension_numbers = #tpu.dot_dimension_numbers<[1], [0], [0], [1], [0, 0, 1, 1], [], []>} : vector<64x32xbf16>, vector<32x64xbf16>, vector<64x64xf32> -> vector<64x64xf32>
    %c0_4 = arith.constant 0 : index
    %c0_5 = arith.constant 0 : index
    %4 = vector.load %arg3[%c0_4, %c0_5] : memref<64x1xf32, #tpu.memory_space<vmem>>, vector<64x1xf32>
    %5 = vector.broadcast %4 : vector<64x1xf32> to vector<64x64xf32>
    %6 = arith.addf %3, %5 : vector<64x64xf32>
    %7 = arith.truncf %6 : vector<64x64xf32> to vector<64x64xbf16>
    %c0_6 = arith.constant 0 : index
    %c0_7 = arith.constant 0 : index
    %c0_8 = arith.constant 0 : index
    %8 = vector.load %arg4[%c0_6, %c0_7, %c0_8] : memref<1x64x64xbf16, #tpu.memory_space<vmem>>, vector<1x64x64xbf16>
    %9 = vector.shape_cast %8 : vector<1x64x64xbf16> to vector<64x64xbf16>
    %10 = vector.shape_cast %7 : vector<64x64xbf16> to vector<1x64x64xbf16>
    tpu.vector_store %arg4[%c0_6, %c0_7, %c0_8], %10 {strides = array<i32>} : memref<1x64x64xbf16, #tpu.memory_space<vmem>>, vector<1x64x64xbf16>,
    return
  }
  func.func @transform_0(%arg0: i32) -> (i32, i32, i32) {
    %c0_i32 = arith.constant 0 : i32
    %c0_i32_0 = arith.constant 0 : i32
    %c0_i32_1 = arith.constant 0 : i32
    return %arg0, %c0_i32, %c0_i32_0 : i32, i32, i32
  }
  func.func @transform_1(%arg0: i32) -> (i32, i32) {
    %c0_i32 = arith.constant 0 : i32
    %c0_i32_0 = arith.constant 0 : i32
    %c0_i32_1 = arith.constant 0 : i32
    return %c0_i32, %c0_i32_0 : i32, i32
  }
  func.func @transform_2(%arg0: i32) -> (i32, i32) {
    %c0_i32 = arith.constant 0 : i32
    %c0_i32_0 = arith.constant 0 : i32
    %c0_i32_1 = arith.constant 0 : i32
    return %c0_i32, %c0_i32_0 : i32, i32
  }
  func.func @transform_3(%arg0: i32) -> (i32, i32, i32) {
    %c0_i32 = arith.constant 0 : i32
    %c0_i32_0 = arith.constant 0 : i32
    %c0_i32_1 = arith.constant 0 : i32
    return %arg0, %c0_i32, %c0_i32_0 : i32, i32, i32
  }
}

module attributes {stable_mosaic.version = 11 : i64} {
  func.func @_conv3x3_kernel(%arg0: i32, %arg1: memref<1x16x256xbf16, #tpu.memory_space<vmem>>, %arg2: memref<1x16x256xbf16, #tpu.memory_space<vmem>>, %arg3: memref<16x288xbf16, #tpu.memory_space<vmem>>, %arg4: memref<16x1xf32, #tpu.memory_space<vmem>>, %arg5: memref<1x222xf32, #tpu.memory_space<vmem>>, %arg6: memref<1x16x224xbf16, #tpu.memory_space<vmem>>, %arg7: memref<1x16x1xf32, #tpu.memory_space<vmem>>, %arg8: memref<1x16x1xf32, #tpu.memory_space<vmem>>) attributes {dimension_semantics = [#tpu.dimension_semantics<parallel>], iteration_bounds = array<i64: 2>, scalar_prefetch = 0 : i64, scratch_operands = 0 : i64, tpu.core_type = #tpu.core_type<tc>, window_params = [{transform_indices = @transform_0, window_bounds = array<i64: 1, 16, 256>}, {transform_indices = @transform_1, window_bounds = array<i64: 1, 16, 256>}, {pipeline_mode = #tpu.pipeline_mode<synchronous>, transform_indices = @transform_2, window_bounds = array<i64: 16, 288>}, {pipeline_mode = #tpu.pipeline_mode<synchronous>, transform_indices = @transform_3, window_bounds = array<i64: 16, 1>}, {pipeline_mode = #tpu.pipeline_mode<synchronous>, transform_indices = @transform_4, window_bounds = array<i64: 1, 222>}, {transform_indices = @transform_5, window_bounds = array<i64: 1, 16, 224>}, {transform_indices = @transform_6, window_bounds = array<i64: 1, 16, 1>}, {transform_indices = @transform_7, window_bounds = array<i64: 1, 16, 1>}]} {
    %c0 = arith.constant 0 : index
    %c0_0 = arith.constant 0 : index
    %c0_1 = arith.constant 0 : index
    %0 = vector.load %arg1[%c0, %c0_0, %c0_1] : memref<1x16x256xbf16, #tpu.memory_space<vmem>>, vector<1x16x222xbf16>
    %1 = vector.shape_cast %0 : vector<1x16x222xbf16> to vector<16x222xbf16>
    %c0_2 = arith.constant 0 : index
    %c0_3 = arith.constant 0 : index
    %c1 = arith.constant 1 : index
    %2 = vector.load %arg1[%c0_2, %c0_3, %c1] : memref<1x16x256xbf16, #tpu.memory_space<vmem>>, vector<1x16x222xbf16>
    %3 = vector.shape_cast %2 : vector<1x16x222xbf16> to vector<16x222xbf16>
    %c0_4 = arith.constant 0 : index
    %c0_5 = arith.constant 0 : index
    %c2 = arith.constant 2 : index
    %4 = vector.load %arg1[%c0_4, %c0_5, %c2] : memref<1x16x256xbf16, #tpu.memory_space<vmem>>, vector<1x16x222xbf16>
    %5 = vector.shape_cast %4 : vector<1x16x222xbf16> to vector<16x222xbf16>
    %c0_6 = arith.constant 0 : index
    %c0_7 = arith.constant 0 : index
    %c16 = arith.constant 16 : index
    %6 = vector.load %arg1[%c0_6, %c0_7, %c16] : memref<1x16x256xbf16, #tpu.memory_space<vmem>>, vector<1x16x222xbf16>
    %7 = vector.shape_cast %6 : vector<1x16x222xbf16> to vector<16x222xbf16>
    %c0_8 = arith.constant 0 : index
    %c0_9 = arith.constant 0 : index
    %c17 = arith.constant 17 : index
    %8 = vector.load %arg1[%c0_8, %c0_9, %c17] : memref<1x16x256xbf16, #tpu.memory_space<vmem>>, vector<1x16x222xbf16>
    %9 = vector.shape_cast %8 : vector<1x16x222xbf16> to vector<16x222xbf16>
    %c0_10 = arith.constant 0 : index
    %c0_11 = arith.constant 0 : index
    %c18 = arith.constant 18 : index
    %10 = vector.load %arg1[%c0_10, %c0_11, %c18] : memref<1x16x256xbf16, #tpu.memory_space<vmem>>, vector<1x16x222xbf16>
    %11 = vector.shape_cast %10 : vector<1x16x222xbf16> to vector<16x222xbf16>
    %c0_12 = arith.constant 0 : index
    %c0_13 = arith.constant 0 : index
    %c32 = arith.constant 32 : index
    %12 = vector.load %arg1[%c0_12, %c0_13, %c32] : memref<1x16x256xbf16, #tpu.memory_space<vmem>>, vector<1x16x222xbf16>
    %13 = vector.shape_cast %12 : vector<1x16x222xbf16> to vector<16x222xbf16>
    %c0_14 = arith.constant 0 : index
    %c0_15 = arith.constant 0 : index
    %c33 = arith.constant 33 : index
    %14 = vector.load %arg1[%c0_14, %c0_15, %c33] : memref<1x16x256xbf16, #tpu.memory_space<vmem>>, vector<1x16x222xbf16>
    %15 = vector.shape_cast %14 : vector<1x16x222xbf16> to vector<16x222xbf16>
    %c0_16 = arith.constant 0 : index
    %c0_17 = arith.constant 0 : index
    %c34 = arith.constant 34 : index
    %16 = vector.load %arg1[%c0_16, %c0_17, %c34] : memref<1x16x256xbf16, #tpu.memory_space<vmem>>, vector<1x16x222xbf16>
    %17 = vector.shape_cast %16 : vector<1x16x222xbf16> to vector<16x222xbf16>
    %c0_18 = arith.constant 0 : index
    %c0_19 = arith.constant 0 : index
    %c0_20 = arith.constant 0 : index
    %18 = vector.load %arg2[%c0_18, %c0_19, %c0_20] : memref<1x16x256xbf16, #tpu.memory_space<vmem>>, vector<1x16x222xbf16>
    %19 = vector.shape_cast %18 : vector<1x16x222xbf16> to vector<16x222xbf16>
    %c0_21 = arith.constant 0 : index
    %c0_22 = arith.constant 0 : index
    %c1_23 = arith.constant 1 : index
    %20 = vector.load %arg2[%c0_21, %c0_22, %c1_23] : memref<1x16x256xbf16, #tpu.memory_space<vmem>>, vector<1x16x222xbf16>
    %21 = vector.shape_cast %20 : vector<1x16x222xbf16> to vector<16x222xbf16>
    %c0_24 = arith.constant 0 : index
    %c0_25 = arith.constant 0 : index
    %c2_26 = arith.constant 2 : index
    %22 = vector.load %arg2[%c0_24, %c0_25, %c2_26] : memref<1x16x256xbf16, #tpu.memory_space<vmem>>, vector<1x16x222xbf16>
    %23 = vector.shape_cast %22 : vector<1x16x222xbf16> to vector<16x222xbf16>
    %c0_27 = arith.constant 0 : index
    %c0_28 = arith.constant 0 : index
    %c16_29 = arith.constant 16 : index
    %24 = vector.load %arg2[%c0_27, %c0_28, %c16_29] : memref<1x16x256xbf16, #tpu.memory_space<vmem>>, vector<1x16x222xbf16>
    %25 = vector.shape_cast %24 : vector<1x16x222xbf16> to vector<16x222xbf16>
    %c0_30 = arith.constant 0 : index
    %c0_31 = arith.constant 0 : index
    %c17_32 = arith.constant 17 : index
    %26 = vector.load %arg2[%c0_30, %c0_31, %c17_32] : memref<1x16x256xbf16, #tpu.memory_space<vmem>>, vector<1x16x222xbf16>
    %27 = vector.shape_cast %26 : vector<1x16x222xbf16> to vector<16x222xbf16>
    %c0_33 = arith.constant 0 : index
    %c0_34 = arith.constant 0 : index
    %c18_35 = arith.constant 18 : index
    %28 = vector.load %arg2[%c0_33, %c0_34, %c18_35] : memref<1x16x256xbf16, #tpu.memory_space<vmem>>, vector<1x16x222xbf16>
    %29 = vector.shape_cast %28 : vector<1x16x222xbf16> to vector<16x222xbf16>
    %c0_36 = arith.constant 0 : index
    %c0_37 = arith.constant 0 : index
    %c32_38 = arith.constant 32 : index
    %30 = vector.load %arg2[%c0_36, %c0_37, %c32_38] : memref<1x16x256xbf16, #tpu.memory_space<vmem>>, vector<1x16x222xbf16>
    %31 = vector.shape_cast %30 : vector<1x16x222xbf16> to vector<16x222xbf16>
    %c0_39 = arith.constant 0 : index
    %c0_40 = arith.constant 0 : index
    %c33_41 = arith.constant 33 : index
    %32 = vector.load %arg2[%c0_39, %c0_40, %c33_41] : memref<1x16x256xbf16, #tpu.memory_space<vmem>>, vector<1x16x222xbf16>
    %33 = vector.shape_cast %32 : vector<1x16x222xbf16> to vector<16x222xbf16>
    %c0_42 = arith.constant 0 : index
    %c0_43 = arith.constant 0 : index
    %c34_44 = arith.constant 34 : index
    %34 = vector.load %arg2[%c0_42, %c0_43, %c34_44] : memref<1x16x256xbf16, #tpu.memory_space<vmem>>, vector<1x16x222xbf16>
    %35 = vector.shape_cast %34 : vector<1x16x222xbf16> to vector<16x222xbf16>
    %36 = tpu.concatenate %1, %3, %5, %7, %9, %11, %13, %15, %17, %19, %21, %23, %25, %27, %29, %31 in 0 : vector<16x222xbf16>, vector<16x222xbf16>, vector<16x222xbf16>, vector<16x222xbf16>, vector<16x222xbf16>, vector<16x222xbf16>, vector<16x222xbf16>, vector<16x222xbf16>, vector<16x222xbf16>, vector<16x222xbf16>, vector<16x222xbf16>, vector<16x222xbf16>, vector<16x222xbf16>, vector<16x222xbf16>, vector<16x222xbf16>, vector<16x222xbf16> -> vector<256x222xbf16>
    %37 = tpu.concatenate %33, %35 in 0 : vector<16x222xbf16>, vector<16x222xbf16> -> vector<32x222xbf16>
    %38 = tpu.concatenate %36, %37 in 0 : vector<256x222xbf16>, vector<32x222xbf16> -> vector<288x222xbf16>
    %c0_45 = arith.constant 0 : index
    %c0_46 = arith.constant 0 : index
    %39 = vector.load %arg3[%c0_45, %c0_46] : memref<16x288xbf16, #tpu.memory_space<vmem>>, vector<16x288xbf16>
    %cst = arith.constant dense<0.000000e+00> : vector<16x222xf32>
    %40 = tpu.matmul %39, %38, %cst {dimension_numbers = #tpu.dot_dimension_numbers<[1], [0], [0], [1], [0, 0, 1, 1], [], []>} : vector<16x288xbf16>, vector<288x222xbf16>, vector<16x222xf32> -> vector<16x222xf32>
    %c0_47 = arith.constant 0 : index
    %c0_48 = arith.constant 0 : index
    %41 = vector.load %arg4[%c0_47, %c0_48] : memref<16x1xf32, #tpu.memory_space<vmem>>, vector<16x1xf32>
    %42 = vector.broadcast %41 : vector<16x1xf32> to vector<16x222xf32>
    %43 = arith.addf %40, %42 : vector<16x222xf32>
    %cst_49 = arith.constant 0.000000e+00 : f32
    %44 = vector.broadcast %cst_49 : f32 to vector<16x222xf32>
    %45 = arith.maximumf %43, %44 : vector<16x222xf32>
    %c0_50 = arith.constant 0 : index
    %c0_51 = arith.constant 0 : index
    %46 = vector.load %arg5[%c0_50, %c0_51] : memref<1x222xf32, #tpu.memory_space<vmem>>, vector<1x222xf32>
    %47 = vector.broadcast %46 : vector<1x222xf32> to vector<16x222xf32>
    %48 = arith.mulf %45, %47 : vector<16x222xf32>
    %cst_52 = arith.constant dense<0.000000e+00> : vector<16xf32>
    %49 = vector.multi_reduction <add>, %48, %cst_52 [1] : vector<16x222xf32> to vector<16xf32>
    %50 = vector.shape_cast %49 : vector<16xf32> to vector<16x1xf32>
    %c0_53 = arith.constant 0 : index
    %c0_54 = arith.constant 0 : index
    %c0_55 = arith.constant 0 : index
    %51 = vector.load %arg7[%c0_53, %c0_54, %c0_55] : memref<1x16x1xf32, #tpu.memory_space<vmem>>, vector<1x16x1xf32>
    %52 = vector.shape_cast %51 : vector<1x16x1xf32> to vector<16x1xf32>
    %53 = vector.shape_cast %50 : vector<16x1xf32> to vector<1x16x1xf32>
    tpu.vector_store %arg7[%c0_53, %c0_54, %c0_55], %53 {strides = array<i32>} : memref<1x16x1xf32, #tpu.memory_space<vmem>>, vector<1x16x1xf32>,
    %54 = arith.mulf %48, %45 : vector<16x222xf32>
    %cst_56 = arith.constant dense<0.000000e+00> : vector<16xf32>
    %55 = vector.multi_reduction <add>, %54, %cst_56 [1] : vector<16x222xf32> to vector<16xf32>
    %56 = vector.shape_cast %55 : vector<16xf32> to vector<16x1xf32>
    %c0_57 = arith.constant 0 : index
    %c0_58 = arith.constant 0 : index
    %c0_59 = arith.constant 0 : index
    %57 = vector.load %arg8[%c0_57, %c0_58, %c0_59] : memref<1x16x1xf32, #tpu.memory_space<vmem>>, vector<1x16x1xf32>
    %58 = vector.shape_cast %57 : vector<1x16x1xf32> to vector<16x1xf32>
    %59 = vector.shape_cast %56 : vector<16x1xf32> to vector<1x16x1xf32>
    tpu.vector_store %arg8[%c0_57, %c0_58, %c0_59], %59 {strides = array<i32>} : memref<1x16x1xf32, #tpu.memory_space<vmem>>, vector<1x16x1xf32>,
    %60 = arith.truncf %45 : vector<16x222xf32> to vector<16x222xbf16>
    %c0_60 = arith.constant 0 : index
    %c0_61 = arith.constant 0 : index
    %c0_62 = arith.constant 0 : index
    %61 = vector.load %arg6[%c0_60, %c0_61, %c0_62] : memref<1x16x224xbf16, #tpu.memory_space<vmem>>, vector<1x16x222xbf16>
    %62 = vector.shape_cast %61 : vector<1x16x222xbf16> to vector<16x222xbf16>
    %63 = vector.shape_cast %60 : vector<16x222xbf16> to vector<1x16x222xbf16>
    tpu.vector_store %arg6[%c0_60, %c0_61, %c0_62], %63 {strides = array<i32>} : memref<1x16x224xbf16, #tpu.memory_space<vmem>>, vector<1x16x222xbf16>,
    %cst_63 = arith.constant 0.000000e+00 : bf16
    %64 = vector.broadcast %cst_63 : bf16 to vector<16x2xbf16>
    %c0_64 = arith.constant 0 : index
    %c0_65 = arith.constant 0 : index
    %c222 = arith.constant 222 : index
    %65 = vector.load %arg6[%c0_64, %c0_65, %c222] : memref<1x16x224xbf16, #tpu.memory_space<vmem>>, vector<1x16x2xbf16>
    %66 = vector.shape_cast %65 : vector<1x16x2xbf16> to vector<16x2xbf16>
    %67 = vector.shape_cast %64 : vector<16x2xbf16> to vector<1x16x2xbf16>
    tpu.vector_store %arg6[%c0_64, %c0_65, %c222], %67 {strides = array<i32>} : memref<1x16x224xbf16, #tpu.memory_space<vmem>>, vector<1x16x2xbf16>,
    return
  }
  func.func @transform_0(%arg0: i32) -> (i32, i32, i32) {
    %c0_i32 = arith.constant 0 : i32
    %c0_i32_0 = arith.constant 0 : i32
    %c0_i32_1 = arith.constant 0 : i32
    return %arg0, %c0_i32, %c0_i32_0 : i32, i32, i32
  }
  func.func @transform_1(%arg0: i32) -> (i32, i32, i32) {
    %c0_i32 = arith.constant 0 : i32
    %c0_i32_0 = arith.constant 0 : i32
    %c0_i32_1 = arith.constant 0 : i32
    return %arg0, %c0_i32, %c0_i32_0 : i32, i32, i32
  }
  func.func @transform_2(%arg0: i32) -> (i32, i32) {
    %c0_i32 = arith.constant 0 : i32
    %c0_i32_0 = arith.constant 0 : i32
    %c0_i32_1 = arith.constant 0 : i32
    return %c0_i32, %c0_i32_0 : i32, i32
  }
  func.func @transform_3(%arg0: i32) -> (i32, i32) {
    %c0_i32 = arith.constant 0 : i32
    %c0_i32_0 = arith.constant 0 : i32
    %c0_i32_1 = arith.constant 0 : i32
    return %c0_i32, %c0_i32_0 : i32, i32
  }
  func.func @transform_4(%arg0: i32) -> (i32, i32) {
    %c0_i32 = arith.constant 0 : i32
    %c0_i32_0 = arith.constant 0 : i32
    %c0_i32_1 = arith.constant 0 : i32
    return %c0_i32, %c0_i32_0 : i32, i32
  }
  func.func @transform_5(%arg0: i32) -> (i32, i32, i32) {
    %c0_i32 = arith.constant 0 : i32
    %c0_i32_0 = arith.constant 0 : i32
    %c0_i32_1 = arith.constant 0 : i32
    return %arg0, %c0_i32, %c0_i32_0 : i32, i32, i32
  }
  func.func @transform_6(%arg0: i32) -> (i32, i32, i32) {
    %c0_i32 = arith.constant 0 : i32
    %c0_i32_0 = arith.constant 0 : i32
    %c0_i32_1 = arith.constant 0 : i32
    return %arg0, %c0_i32, %c0_i32_0 : i32, i32, i32
  }
  func.func @transform_7(%arg0: i32) -> (i32, i32, i32) {
    %c0_i32 = arith.constant 0 : i32
    %c0_i32_0 = arith.constant 0 : i32
    %c0_i32_1 = arith.constant 0 : i32
    return %arg0, %c0_i32, %c0_i32_0 : i32, i32, i32
  }
}

module attributes {stable_mosaic.version = 11 : i64} {
  func.func @_conv3x3_kernel(%arg0: i32, %arg1: memref<1x16x224xbf16, #tpu.memory_space<vmem>>, %arg2: memref<16x144xbf16, #tpu.memory_space<vmem>>, %arg3: memref<16x1xf32, #tpu.memory_space<vmem>>, %arg4: memref<1x16x144xbf16, #tpu.memory_space<vmem>>) attributes {dimension_semantics = [#tpu.dimension_semantics<parallel>], iteration_bounds = array<i64: 2>, scalar_prefetch = 0 : i64, scratch_operands = 0 : i64, tpu.core_type = #tpu.core_type<tc>, window_params = [{transform_indices = @transform_0, window_bounds = array<i64: 1, 16, 224>}, {pipeline_mode = #tpu.pipeline_mode<synchronous>, transform_indices = @transform_1, window_bounds = array<i64: 16, 144>}, {pipeline_mode = #tpu.pipeline_mode<synchronous>, transform_indices = @transform_2, window_bounds = array<i64: 16, 1>}, {transform_indices = @transform_3, window_bounds = array<i64: 1, 16, 144>}]} {
    %c0 = arith.constant 0 : index
    %c0_0 = arith.constant 0 : index
    %c0_1 = arith.constant 0 : index
    %0 = vector.load %arg1[%c0, %c0_0, %c0_1] : memref<1x16x224xbf16, #tpu.memory_space<vmem>>, vector<1x16x190xbf16>
    %1 = vector.shape_cast %0 : vector<1x16x190xbf16> to vector<16x190xbf16>
    %c0_2 = arith.constant 0 : index
    %c0_3 = arith.constant 0 : index
    %c1 = arith.constant 1 : index
    %2 = vector.load %arg1[%c0_2, %c0_3, %c1] : memref<1x16x224xbf16, #tpu.memory_space<vmem>>, vector<1x16x190xbf16>
    %3 = vector.shape_cast %2 : vector<1x16x190xbf16> to vector<16x190xbf16>
    %c0_4 = arith.constant 0 : index
    %c0_5 = arith.constant 0 : index
    %c2 = arith.constant 2 : index
    %4 = vector.load %arg1[%c0_4, %c0_5, %c2] : memref<1x16x224xbf16, #tpu.memory_space<vmem>>, vector<1x16x190xbf16>
    %5 = vector.shape_cast %4 : vector<1x16x190xbf16> to vector<16x190xbf16>
    %c0_6 = arith.constant 0 : index
    %c0_7 = arith.constant 0 : index
    %c16 = arith.constant 16 : index
    %6 = vector.load %arg1[%c0_6, %c0_7, %c16] : memref<1x16x224xbf16, #tpu.memory_space<vmem>>, vector<1x16x190xbf16>
    %7 = vector.shape_cast %6 : vector<1x16x190xbf16> to vector<16x190xbf16>
    %c0_8 = arith.constant 0 : index
    %c0_9 = arith.constant 0 : index
    %c17 = arith.constant 17 : index
    %8 = vector.load %arg1[%c0_8, %c0_9, %c17] : memref<1x16x224xbf16, #tpu.memory_space<vmem>>, vector<1x16x190xbf16>
    %9 = vector.shape_cast %8 : vector<1x16x190xbf16> to vector<16x190xbf16>
    %c0_10 = arith.constant 0 : index
    %c0_11 = arith.constant 0 : index
    %c18 = arith.constant 18 : index
    %10 = vector.load %arg1[%c0_10, %c0_11, %c18] : memref<1x16x224xbf16, #tpu.memory_space<vmem>>, vector<1x16x190xbf16>
    %11 = vector.shape_cast %10 : vector<1x16x190xbf16> to vector<16x190xbf16>
    %c0_12 = arith.constant 0 : index
    %c0_13 = arith.constant 0 : index
    %c32 = arith.constant 32 : index
    %12 = vector.load %arg1[%c0_12, %c0_13, %c32] : memref<1x16x224xbf16, #tpu.memory_space<vmem>>, vector<1x16x190xbf16>
    %13 = vector.shape_cast %12 : vector<1x16x190xbf16> to vector<16x190xbf16>
    %c0_14 = arith.constant 0 : index
    %c0_15 = arith.constant 0 : index
    %c33 = arith.constant 33 : index
    %14 = vector.load %arg1[%c0_14, %c0_15, %c33] : memref<1x16x224xbf16, #tpu.memory_space<vmem>>, vector<1x16x190xbf16>
    %15 = vector.shape_cast %14 : vector<1x16x190xbf16> to vector<16x190xbf16>
    %c0_16 = arith.constant 0 : index
    %c0_17 = arith.constant 0 : index
    %c34 = arith.constant 34 : index
    %16 = vector.load %arg1[%c0_16, %c0_17, %c34] : memref<1x16x224xbf16, #tpu.memory_space<vmem>>, vector<1x16x190xbf16>
    %17 = vector.shape_cast %16 : vector<1x16x190xbf16> to vector<16x190xbf16>
    %18 = tpu.concatenate %1, %3, %5, %7, %9, %11, %13, %15, %17 in 0 : vector<16x190xbf16>, vector<16x190xbf16>, vector<16x190xbf16>, vector<16x190xbf16>, vector<16x190xbf16>, vector<16x190xbf16>, vector<16x190xbf16>, vector<16x190xbf16>, vector<16x190xbf16> -> vector<144x190xbf16>
    %c0_18 = arith.constant 0 : index
    %c0_19 = arith.constant 0 : index
    %19 = vector.load %arg2[%c0_18, %c0_19] : memref<16x144xbf16, #tpu.memory_space<vmem>>, vector<16x144xbf16>
    %cst = arith.constant dense<0.000000e+00> : vector<16x190xf32>
    %20 = tpu.matmul %19, %18, %cst {dimension_numbers = #tpu.dot_dimension_numbers<[1], [0], [0], [1], [0, 0, 1, 1], [], []>} : vector<16x144xbf16>, vector<144x190xbf16>, vector<16x190xf32> -> vector<16x190xf32>
    %c0_20 = arith.constant 0 : index
    %c0_21 = arith.constant 0 : index
    %21 = vector.load %arg3[%c0_20, %c0_21] : memref<16x1xf32, #tpu.memory_space<vmem>>, vector<16x1xf32>
    %22 = vector.broadcast %21 : vector<16x1xf32> to vector<16x190xf32>
    %23 = arith.addf %20, %22 : vector<16x190xf32>
    %24 = vector.extract_strided_slice %23 {offsets = [0, 0], sizes = [16, 12], strides = [1, 1]} : vector<16x190xf32> to vector<16x12xf32>
    %25 = arith.truncf %24 : vector<16x12xf32> to vector<16x12xbf16>
    %c0_22 = arith.constant 0 : index
    %c0_23 = arith.constant 0 : index
    %c0_24 = arith.constant 0 : index
    %26 = vector.load %arg4[%c0_22, %c0_23, %c0_24] : memref<1x16x144xbf16, #tpu.memory_space<vmem>>, vector<1x16x12xbf16>
    %27 = vector.shape_cast %26 : vector<1x16x12xbf16> to vector<16x12xbf16>
    %28 = vector.shape_cast %25 : vector<16x12xbf16> to vector<1x16x12xbf16>
    tpu.vector_store %arg4[%c0_22, %c0_23, %c0_24], %28 {strides = array<i32>} : memref<1x16x144xbf16, #tpu.memory_space<vmem>>, vector<1x16x12xbf16>,
    %29 = vector.extract_strided_slice %23 {offsets = [0, 16], sizes = [16, 12], strides = [1, 1]} : vector<16x190xf32> to vector<16x12xf32>
    %30 = arith.truncf %29 : vector<16x12xf32> to vector<16x12xbf16>
    %c0_25 = arith.constant 0 : index
    %c0_26 = arith.constant 0 : index
    %c12 = arith.constant 12 : index
    %31 = vector.load %arg4[%c0_25, %c0_26, %c12] : memref<1x16x144xbf16, #tpu.memory_space<vmem>>, vector<1x16x12xbf16>
    %32 = vector.shape_cast %31 : vector<1x16x12xbf16> to vector<16x12xbf16>
    %33 = vector.shape_cast %30 : vector<16x12xbf16> to vector<1x16x12xbf16>
    tpu.vector_store %arg4[%c0_25, %c0_26, %c12], %33 {strides = array<i32>} : memref<1x16x144xbf16, #tpu.memory_space<vmem>>, vector<1x16x12xbf16>,
    %34 = vector.extract_strided_slice %23 {offsets = [0, 32], sizes = [16, 12], strides = [1, 1]} : vector<16x190xf32> to vector<16x12xf32>
    %35 = arith.truncf %34 : vector<16x12xf32> to vector<16x12xbf16>
    %c0_27 = arith.constant 0 : index
    %c0_28 = arith.constant 0 : index
    %c24 = arith.constant 24 : index
    %36 = vector.load %arg4[%c0_27, %c0_28, %c24] : memref<1x16x144xbf16, #tpu.memory_space<vmem>>, vector<1x16x12xbf16>
    %37 = vector.shape_cast %36 : vector<1x16x12xbf16> to vector<16x12xbf16>
    %38 = vector.shape_cast %35 : vector<16x12xbf16> to vector<1x16x12xbf16>
    tpu.vector_store %arg4[%c0_27, %c0_28, %c24], %38 {strides = array<i32>} : memref<1x16x144xbf16, #tpu.memory_space<vmem>>, vector<1x16x12xbf16>,
    %39 = vector.extract_strided_slice %23 {offsets = [0, 48], sizes = [16, 12], strides = [1, 1]} : vector<16x190xf32> to vector<16x12xf32>
    %40 = arith.truncf %39 : vector<16x12xf32> to vector<16x12xbf16>
    %c0_29 = arith.constant 0 : index
    %c0_30 = arith.constant 0 : index
    %c36 = arith.constant 36 : index
    %41 = vector.load %arg4[%c0_29, %c0_30, %c36] : memref<1x16x144xbf16, #tpu.memory_space<vmem>>, vector<1x16x12xbf16>
    %42 = vector.shape_cast %41 : vector<1x16x12xbf16> to vector<16x12xbf16>
    %43 = vector.shape_cast %40 : vector<16x12xbf16> to vector<1x16x12xbf16>
    tpu.vector_store %arg4[%c0_29, %c0_30, %c36], %43 {strides = array<i32>} : memref<1x16x144xbf16, #tpu.memory_space<vmem>>, vector<1x16x12xbf16>,
    %44 = vector.extract_strided_slice %23 {offsets = [0, 64], sizes = [16, 12], strides = [1, 1]} : vector<16x190xf32> to vector<16x12xf32>
    %45 = arith.truncf %44 : vector<16x12xf32> to vector<16x12xbf16>
    %c0_31 = arith.constant 0 : index
    %c0_32 = arith.constant 0 : index
    %c48 = arith.constant 48 : index
    %46 = vector.load %arg4[%c0_31, %c0_32, %c48] : memref<1x16x144xbf16, #tpu.memory_space<vmem>>, vector<1x16x12xbf16>
    %47 = vector.shape_cast %46 : vector<1x16x12xbf16> to vector<16x12xbf16>
    %48 = vector.shape_cast %45 : vector<16x12xbf16> to vector<1x16x12xbf16>
    tpu.vector_store %arg4[%c0_31, %c0_32, %c48], %48 {strides = array<i32>} : memref<1x16x144xbf16, #tpu.memory_space<vmem>>, vector<1x16x12xbf16>,
    %49 = vector.extract_strided_slice %23 {offsets = [0, 80], sizes = [16, 12], strides = [1, 1]} : vector<16x190xf32> to vector<16x12xf32>
    %50 = arith.truncf %49 : vector<16x12xf32> to vector<16x12xbf16>
    %c0_33 = arith.constant 0 : index
    %c0_34 = arith.constant 0 : index
    %c60 = arith.constant 60 : index
    %51 = vector.load %arg4[%c0_33, %c0_34, %c60] : memref<1x16x144xbf16, #tpu.memory_space<vmem>>, vector<1x16x12xbf16>
    %52 = vector.shape_cast %51 : vector<1x16x12xbf16> to vector<16x12xbf16>
    %53 = vector.shape_cast %50 : vector<16x12xbf16> to vector<1x16x12xbf16>
    tpu.vector_store %arg4[%c0_33, %c0_34, %c60], %53 {strides = array<i32>} : memref<1x16x144xbf16, #tpu.memory_space<vmem>>, vector<1x16x12xbf16>,
    %54 = vector.extract_strided_slice %23 {offsets = [0, 96], sizes = [16, 12], strides = [1, 1]} : vector<16x190xf32> to vector<16x12xf32>
    %55 = arith.truncf %54 : vector<16x12xf32> to vector<16x12xbf16>
    %c0_35 = arith.constant 0 : index
    %c0_36 = arith.constant 0 : index
    %c72 = arith.constant 72 : index
    %56 = vector.load %arg4[%c0_35, %c0_36, %c72] : memref<1x16x144xbf16, #tpu.memory_space<vmem>>, vector<1x16x12xbf16>
    %57 = vector.shape_cast %56 : vector<1x16x12xbf16> to vector<16x12xbf16>
    %58 = vector.shape_cast %55 : vector<16x12xbf16> to vector<1x16x12xbf16>
    tpu.vector_store %arg4[%c0_35, %c0_36, %c72], %58 {strides = array<i32>} : memref<1x16x144xbf16, #tpu.memory_space<vmem>>, vector<1x16x12xbf16>,
    %59 = vector.extract_strided_slice %23 {offsets = [0, 112], sizes = [16, 12], strides = [1, 1]} : vector<16x190xf32> to vector<16x12xf32>
    %60 = arith.truncf %59 : vector<16x12xf32> to vector<16x12xbf16>
    %c0_37 = arith.constant 0 : index
    %c0_38 = arith.constant 0 : index
    %c84 = arith.constant 84 : index
    %61 = vector.load %arg4[%c0_37, %c0_38, %c84] : memref<1x16x144xbf16, #tpu.memory_space<vmem>>, vector<1x16x12xbf16>
    %62 = vector.shape_cast %61 : vector<1x16x12xbf16> to vector<16x12xbf16>
    %63 = vector.shape_cast %60 : vector<16x12xbf16> to vector<1x16x12xbf16>
    tpu.vector_store %arg4[%c0_37, %c0_38, %c84], %63 {strides = array<i32>} : memref<1x16x144xbf16, #tpu.memory_space<vmem>>, vector<1x16x12xbf16>,
    %64 = vector.extract_strided_slice %23 {offsets = [0, 128], sizes = [16, 12], strides = [1, 1]} : vector<16x190xf32> to vector<16x12xf32>
    %65 = arith.truncf %64 : vector<16x12xf32> to vector<16x12xbf16>
    %c0_39 = arith.constant 0 : index
    %c0_40 = arith.constant 0 : index
    %c96 = arith.constant 96 : index
    %66 = vector.load %arg4[%c0_39, %c0_40, %c96] : memref<1x16x144xbf16, #tpu.memory_space<vmem>>, vector<1x16x12xbf16>
    %67 = vector.shape_cast %66 : vector<1x16x12xbf16> to vector<16x12xbf16>
    %68 = vector.shape_cast %65 : vector<16x12xbf16> to vector<1x16x12xbf16>
    tpu.vector_store %arg4[%c0_39, %c0_40, %c96], %68 {strides = array<i32>} : memref<1x16x144xbf16, #tpu.memory_space<vmem>>, vector<1x16x12xbf16>,
    %69 = vector.extract_strided_slice %23 {offsets = [0, 144], sizes = [16, 12], strides = [1, 1]} : vector<16x190xf32> to vector<16x12xf32>
    %70 = arith.truncf %69 : vector<16x12xf32> to vector<16x12xbf16>
    %c0_41 = arith.constant 0 : index
    %c0_42 = arith.constant 0 : index
    %c108 = arith.constant 108 : index
    %71 = vector.load %arg4[%c0_41, %c0_42, %c108] : memref<1x16x144xbf16, #tpu.memory_space<vmem>>, vector<1x16x12xbf16>
    %72 = vector.shape_cast %71 : vector<1x16x12xbf16> to vector<16x12xbf16>
    %73 = vector.shape_cast %70 : vector<16x12xbf16> to vector<1x16x12xbf16>
    tpu.vector_store %arg4[%c0_41, %c0_42, %c108], %73 {strides = array<i32>} : memref<1x16x144xbf16, #tpu.memory_space<vmem>>, vector<1x16x12xbf16>,
    %74 = vector.extract_strided_slice %23 {offsets = [0, 160], sizes = [16, 12], strides = [1, 1]} : vector<16x190xf32> to vector<16x12xf32>
    %75 = arith.truncf %74 : vector<16x12xf32> to vector<16x12xbf16>
    %c0_43 = arith.constant 0 : index
    %c0_44 = arith.constant 0 : index
    %c120 = arith.constant 120 : index
    %76 = vector.load %arg4[%c0_43, %c0_44, %c120] : memref<1x16x144xbf16, #tpu.memory_space<vmem>>, vector<1x16x12xbf16>
    %77 = vector.shape_cast %76 : vector<1x16x12xbf16> to vector<16x12xbf16>
    %78 = vector.shape_cast %75 : vector<16x12xbf16> to vector<1x16x12xbf16>
    tpu.vector_store %arg4[%c0_43, %c0_44, %c120], %78 {strides = array<i32>} : memref<1x16x144xbf16, #tpu.memory_space<vmem>>, vector<1x16x12xbf16>,
    %79 = vector.extract_strided_slice %23 {offsets = [0, 176], sizes = [16, 12], strides = [1, 1]} : vector<16x190xf32> to vector<16x12xf32>
    %80 = arith.truncf %79 : vector<16x12xf32> to vector<16x12xbf16>
    %c0_45 = arith.constant 0 : index
    %c0_46 = arith.constant 0 : index
    %c132 = arith.constant 132 : index
    %81 = vector.load %arg4[%c0_45, %c0_46, %c132] : memref<1x16x144xbf16, #tpu.memory_space<vmem>>, vector<1x16x12xbf16>
    %82 = vector.shape_cast %81 : vector<1x16x12xbf16> to vector<16x12xbf16>
    %83 = vector.shape_cast %80 : vector<16x12xbf16> to vector<1x16x12xbf16>
    tpu.vector_store %arg4[%c0_45, %c0_46, %c132], %83 {strides = array<i32>} : memref<1x16x144xbf16, #tpu.memory_space<vmem>>, vector<1x16x12xbf16>,
    return
  }
  func.func @transform_0(%arg0: i32) -> (i32, i32, i32) {
    %c0_i32 = arith.constant 0 : i32
    %c0_i32_0 = arith.constant 0 : i32
    %c0_i32_1 = arith.constant 0 : i32
    return %arg0, %c0_i32, %c0_i32_0 : i32, i32, i32
  }
  func.func @transform_1(%arg0: i32) -> (i32, i32) {
    %c0_i32 = arith.constant 0 : i32
    %c0_i32_0 = arith.constant 0 : i32
    %c0_i32_1 = arith.constant 0 : i32
    return %c0_i32, %c0_i32_0 : i32, i32
  }
  func.func @transform_2(%arg0: i32) -> (i32, i32) {
    %c0_i32 = arith.constant 0 : i32
    %c0_i32_0 = arith.constant 0 : i32
    %c0_i32_1 = arith.constant 0 : i32
    return %c0_i32, %c0_i32_0 : i32, i32
  }
  func.func @transform_3(%arg0: i32) -> (i32, i32, i32) {
    %c0_i32 = arith.constant 0 : i32
    %c0_i32_0 = arith.constant 0 : i32
    %c0_i32_1 = arith.constant 0 : i32
    return %arg0, %c0_i32, %c0_i32_0 : i32, i32, i32
  }
}

module attributes {stable_mosaic.version = 11 : i64} {
  func.func @_upconv_kernel(%arg0: i32, %arg1: memref<1x16x144xbf16, #tpu.memory_space<vmem>>, %arg2: memref<32x16xbf16, #tpu.memory_space<vmem>>, %arg3: memref<32x1xf32, #tpu.memory_space<vmem>>, %arg4: memref<1x32x144xbf16, #tpu.memory_space<vmem>>) attributes {dimension_semantics = [#tpu.dimension_semantics<parallel>], iteration_bounds = array<i64: 2>, scalar_prefetch = 0 : i64, scratch_operands = 0 : i64, tpu.core_type = #tpu.core_type<tc>, window_params = [{transform_indices = @transform_0, window_bounds = array<i64: 1, 16, 144>}, {pipeline_mode = #tpu.pipeline_mode<synchronous>, transform_indices = @transform_1, window_bounds = array<i64: 32, 16>}, {pipeline_mode = #tpu.pipeline_mode<synchronous>, transform_indices = @transform_2, window_bounds = array<i64: 32, 1>}, {transform_indices = @transform_3, window_bounds = array<i64: 1, 32, 144>}]} {
    %c0 = arith.constant 0 : index
    %c0_0 = arith.constant 0 : index
    %0 = vector.load %arg2[%c0, %c0_0] : memref<32x16xbf16, #tpu.memory_space<vmem>>, vector<32x16xbf16>
    %c0_1 = arith.constant 0 : index
    %c0_2 = arith.constant 0 : index
    %c0_3 = arith.constant 0 : index
    %1 = vector.load %arg1[%c0_1, %c0_2, %c0_3] : memref<1x16x144xbf16, #tpu.memory_space<vmem>>, vector<1x16x144xbf16>
    %2 = vector.shape_cast %1 : vector<1x16x144xbf16> to vector<16x144xbf16>
    %cst = arith.constant dense<0.000000e+00> : vector<32x144xf32>
    %3 = tpu.matmul %0, %2, %cst {dimension_numbers = #tpu.dot_dimension_numbers<[1], [0], [0], [1], [0, 0, 1, 1], [], []>} : vector<32x16xbf16>, vector<16x144xbf16>, vector<32x144xf32> -> vector<32x144xf32>
    %c0_4 = arith.constant 0 : index
    %c0_5 = arith.constant 0 : index
    %4 = vector.load %arg3[%c0_4, %c0_5] : memref<32x1xf32, #tpu.memory_space<vmem>>, vector<32x1xf32>
    %5 = vector.broadcast %4 : vector<32x1xf32> to vector<32x144xf32>
    %6 = arith.addf %3, %5 : vector<32x144xf32>
    %7 = arith.truncf %6 : vector<32x144xf32> to vector<32x144xbf16>
    %c0_6 = arith.constant 0 : index
    %c0_7 = arith.constant 0 : index
    %c0_8 = arith.constant 0 : index
    %8 = vector.load %arg4[%c0_6, %c0_7, %c0_8] : memref<1x32x144xbf16, #tpu.memory_space<vmem>>, vector<1x32x144xbf16>
    %9 = vector.shape_cast %8 : vector<1x32x144xbf16> to vector<32x144xbf16>
    %10 = vector.shape_cast %7 : vector<32x144xbf16> to vector<1x32x144xbf16>
    tpu.vector_store %arg4[%c0_6, %c0_7, %c0_8], %10 {strides = array<i32>} : memref<1x32x144xbf16, #tpu.memory_space<vmem>>, vector<1x32x144xbf16>,
    return
  }
  func.func @transform_0(%arg0: i32) -> (i32, i32, i32) {
    %c0_i32 = arith.constant 0 : i32
    %c0_i32_0 = arith.constant 0 : i32
    %c0_i32_1 = arith.constant 0 : i32
    return %arg0, %c0_i32, %c0_i32_0 : i32, i32, i32
  }
  func.func @transform_1(%arg0: i32) -> (i32, i32) {
    %c0_i32 = arith.constant 0 : i32
    %c0_i32_0 = arith.constant 0 : i32
    %c0_i32_1 = arith.constant 0 : i32
    return %c0_i32, %c0_i32_0 : i32, i32
  }
  func.func @transform_2(%arg0: i32) -> (i32, i32) {
    %c0_i32 = arith.constant 0 : i32
    %c0_i32_0 = arith.constant 0 : i32
    %c0_i32_1 = arith.constant 0 : i32
    return %c0_i32, %c0_i32_0 : i32, i32
  }
  func.func @transform_3(%arg0: i32) -> (i32, i32, i32) {
    %c0_i32 = arith.constant 0 : i32
    %c0_i32_0 = arith.constant 0 : i32
    %c0_i32_1 = arith.constant 0 : i32
    return %arg0, %c0_i32, %c0_i32_0 : i32, i32, i32
  }
}

module attributes {stable_mosaic.version = 11 : i64} {
  func.func @_conv3x3_kernel(%arg0: i32, %arg1: memref<1x8x576xbf16, #tpu.memory_space<vmem>>, %arg2: memref<1x8x576xbf16, #tpu.memory_space<vmem>>, %arg3: memref<8x144xbf16, #tpu.memory_space<vmem>>, %arg4: memref<8x1xf32, #tpu.memory_space<vmem>>, %arg5: memref<1x526xf32, #tpu.memory_space<vmem>>, %arg6: memref<1x8x528xbf16, #tpu.memory_space<vmem>>, %arg7: memref<1x8x1xf32, #tpu.memory_space<vmem>>, %arg8: memref<1x8x1xf32, #tpu.memory_space<vmem>>) attributes {dimension_semantics = [#tpu.dimension_semantics<parallel>], iteration_bounds = array<i64: 2>, scalar_prefetch = 0 : i64, scratch_operands = 0 : i64, tpu.core_type = #tpu.core_type<tc>, window_params = [{transform_indices = @transform_0, window_bounds = array<i64: 1, 8, 576>}, {transform_indices = @transform_1, window_bounds = array<i64: 1, 8, 576>}, {pipeline_mode = #tpu.pipeline_mode<synchronous>, transform_indices = @transform_2, window_bounds = array<i64: 8, 144>}, {pipeline_mode = #tpu.pipeline_mode<synchronous>, transform_indices = @transform_3, window_bounds = array<i64: 8, 1>}, {pipeline_mode = #tpu.pipeline_mode<synchronous>, transform_indices = @transform_4, window_bounds = array<i64: 1, 526>}, {transform_indices = @transform_5, window_bounds = array<i64: 1, 8, 528>}, {transform_indices = @transform_6, window_bounds = array<i64: 1, 8, 1>}, {transform_indices = @transform_7, window_bounds = array<i64: 1, 8, 1>}]} {
    %c0 = arith.constant 0 : index
    %c0_0 = arith.constant 0 : index
    %c0_1 = arith.constant 0 : index
    %0 = vector.load %arg1[%c0, %c0_0, %c0_1] : memref<1x8x576xbf16, #tpu.memory_space<vmem>>, vector<1x8x526xbf16>
    %1 = vector.shape_cast %0 : vector<1x8x526xbf16> to vector<8x526xbf16>
    %2 = arith.extf %1 : vector<8x526xbf16> to vector<8x526xf32>
    %c0_2 = arith.constant 0 : index
    %c0_3 = arith.constant 0 : index
    %c1 = arith.constant 1 : index
    %3 = vector.load %arg1[%c0_2, %c0_3, %c1] : memref<1x8x576xbf16, #tpu.memory_space<vmem>>, vector<1x8x526xbf16>
    %4 = vector.shape_cast %3 : vector<1x8x526xbf16> to vector<8x526xbf16>
    %5 = arith.extf %4 : vector<8x526xbf16> to vector<8x526xf32>
    %c0_4 = arith.constant 0 : index
    %c0_5 = arith.constant 0 : index
    %c2 = arith.constant 2 : index
    %6 = vector.load %arg1[%c0_4, %c0_5, %c2] : memref<1x8x576xbf16, #tpu.memory_space<vmem>>, vector<1x8x526xbf16>
    %7 = vector.shape_cast %6 : vector<1x8x526xbf16> to vector<8x526xbf16>
    %8 = arith.extf %7 : vector<8x526xbf16> to vector<8x526xf32>
    %c0_6 = arith.constant 0 : index
    %c0_7 = arith.constant 0 : index
    %c24 = arith.constant 24 : index
    %9 = vector.load %arg1[%c0_6, %c0_7, %c24] : memref<1x8x576xbf16, #tpu.memory_space<vmem>>, vector<1x8x526xbf16>
    %10 = vector.shape_cast %9 : vector<1x8x526xbf16> to vector<8x526xbf16>
    %11 = arith.extf %10 : vector<8x526xbf16> to vector<8x526xf32>
    %c0_8 = arith.constant 0 : index
    %c0_9 = arith.constant 0 : index
    %c25 = arith.constant 25 : index
    %12 = vector.load %arg1[%c0_8, %c0_9, %c25] : memref<1x8x576xbf16, #tpu.memory_space<vmem>>, vector<1x8x526xbf16>
    %13 = vector.shape_cast %12 : vector<1x8x526xbf16> to vector<8x526xbf16>
    %14 = arith.extf %13 : vector<8x526xbf16> to vector<8x526xf32>
    %c0_10 = arith.constant 0 : index
    %c0_11 = arith.constant 0 : index
    %c26 = arith.constant 26 : index
    %15 = vector.load %arg1[%c0_10, %c0_11, %c26] : memref<1x8x576xbf16, #tpu.memory_space<vmem>>, vector<1x8x526xbf16>
    %16 = vector.shape_cast %15 : vector<1x8x526xbf16> to vector<8x526xbf16>
    %17 = arith.extf %16 : vector<8x526xbf16> to vector<8x526xf32>
    %c0_12 = arith.constant 0 : index
    %c0_13 = arith.constant 0 : index
    %c48 = arith.constant 48 : index
    %18 = vector.load %arg1[%c0_12, %c0_13, %c48] : memref<1x8x576xbf16, #tpu.memory_space<vmem>>, vector<1x8x526xbf16>
    %19 = vector.shape_cast %18 : vector<1x8x526xbf16> to vector<8x526xbf16>
    %20 = arith.extf %19 : vector<8x526xbf16> to vector<8x526xf32>
    %c0_14 = arith.constant 0 : index
    %c0_15 = arith.constant 0 : index
    %c49 = arith.constant 49 : index
    %21 = vector.load %arg1[%c0_14, %c0_15, %c49] : memref<1x8x576xbf16, #tpu.memory_space<vmem>>, vector<1x8x526xbf16>
    %22 = vector.shape_cast %21 : vector<1x8x526xbf16> to vector<8x526xbf16>
    %23 = arith.extf %22 : vector<8x526xbf16> to vector<8x526xf32>
    %c0_16 = arith.constant 0 : index
    %c0_17 = arith.constant 0 : index
    %c50 = arith.constant 50 : index
    %24 = vector.load %arg1[%c0_16, %c0_17, %c50] : memref<1x8x576xbf16, #tpu.memory_space<vmem>>, vector<1x8x526xbf16>
    %25 = vector.shape_cast %24 : vector<1x8x526xbf16> to vector<8x526xbf16>
    %26 = arith.extf %25 : vector<8x526xbf16> to vector<8x526xf32>
    %c0_18 = arith.constant 0 : index
    %c0_19 = arith.constant 0 : index
    %c0_20 = arith.constant 0 : index
    %27 = vector.load %arg2[%c0_18, %c0_19, %c0_20] : memref<1x8x576xbf16, #tpu.memory_space<vmem>>, vector<1x8x526xbf16>
    %28 = vector.shape_cast %27 : vector<1x8x526xbf16> to vector<8x526xbf16>
    %29 = arith.extf %28 : vector<8x526xbf16> to vector<8x526xf32>
    %c0_21 = arith.constant 0 : index
    %c0_22 = arith.constant 0 : index
    %c1_23 = arith.constant 1 : index
    %30 = vector.load %arg2[%c0_21, %c0_22, %c1_23] : memref<1x8x576xbf16, #tpu.memory_space<vmem>>, vector<1x8x526xbf16>
    %31 = vector.shape_cast %30 : vector<1x8x526xbf16> to vector<8x526xbf16>
    %32 = arith.extf %31 : vector<8x526xbf16> to vector<8x526xf32>
    %c0_24 = arith.constant 0 : index
    %c0_25 = arith.constant 0 : index
    %c2_26 = arith.constant 2 : index
    %33 = vector.load %arg2[%c0_24, %c0_25, %c2_26] : memref<1x8x576xbf16, #tpu.memory_space<vmem>>, vector<1x8x526xbf16>
    %34 = vector.shape_cast %33 : vector<1x8x526xbf16> to vector<8x526xbf16>
    %35 = arith.extf %34 : vector<8x526xbf16> to vector<8x526xf32>
    %c0_27 = arith.constant 0 : index
    %c0_28 = arith.constant 0 : index
    %c24_29 = arith.constant 24 : index
    %36 = vector.load %arg2[%c0_27, %c0_28, %c24_29] : memref<1x8x576xbf16, #tpu.memory_space<vmem>>, vector<1x8x526xbf16>
    %37 = vector.shape_cast %36 : vector<1x8x526xbf16> to vector<8x526xbf16>
    %38 = arith.extf %37 : vector<8x526xbf16> to vector<8x526xf32>
    %c0_30 = arith.constant 0 : index
    %c0_31 = arith.constant 0 : index
    %c25_32 = arith.constant 25 : index
    %39 = vector.load %arg2[%c0_30, %c0_31, %c25_32] : memref<1x8x576xbf16, #tpu.memory_space<vmem>>, vector<1x8x526xbf16>
    %40 = vector.shape_cast %39 : vector<1x8x526xbf16> to vector<8x526xbf16>
    %41 = arith.extf %40 : vector<8x526xbf16> to vector<8x526xf32>
    %c0_33 = arith.constant 0 : index
    %c0_34 = arith.constant 0 : index
    %c26_35 = arith.constant 26 : index
    %42 = vector.load %arg2[%c0_33, %c0_34, %c26_35] : memref<1x8x576xbf16, #tpu.memory_space<vmem>>, vector<1x8x526xbf16>
    %43 = vector.shape_cast %42 : vector<1x8x526xbf16> to vector<8x526xbf16>
    %44 = arith.extf %43 : vector<8x526xbf16> to vector<8x526xf32>
    %c0_36 = arith.constant 0 : index
    %c0_37 = arith.constant 0 : index
    %c48_38 = arith.constant 48 : index
    %45 = vector.load %arg2[%c0_36, %c0_37, %c48_38] : memref<1x8x576xbf16, #tpu.memory_space<vmem>>, vector<1x8x526xbf16>
    %46 = vector.shape_cast %45 : vector<1x8x526xbf16> to vector<8x526xbf16>
    %47 = arith.extf %46 : vector<8x526xbf16> to vector<8x526xf32>
    %c0_39 = arith.constant 0 : index
    %c0_40 = arith.constant 0 : index
    %c49_41 = arith.constant 49 : index
    %48 = vector.load %arg2[%c0_39, %c0_40, %c49_41] : memref<1x8x576xbf16, #tpu.memory_space<vmem>>, vector<1x8x526xbf16>
    %49 = vector.shape_cast %48 : vector<1x8x526xbf16> to vector<8x526xbf16>
    %50 = arith.extf %49 : vector<8x526xbf16> to vector<8x526xf32>
    %c0_42 = arith.constant 0 : index
    %c0_43 = arith.constant 0 : index
    %c50_44 = arith.constant 50 : index
    %51 = vector.load %arg2[%c0_42, %c0_43, %c50_44] : memref<1x8x576xbf16, #tpu.memory_space<vmem>>, vector<1x8x526xbf16>
    %52 = vector.shape_cast %51 : vector<1x8x526xbf16> to vector<8x526xbf16>
    %53 = arith.extf %52 : vector<8x526xbf16> to vector<8x526xf32>
    %54 = tpu.concatenate %2, %5, %8, %11, %14, %17, %20, %23, %26, %29, %32, %35, %38, %41, %44, %47 in 0 : vector<8x526xf32>, vector<8x526xf32>, vector<8x526xf32>, vector<8x526xf32>, vector<8x526xf32>, vector<8x526xf32>, vector<8x526xf32>, vector<8x526xf32>, vector<8x526xf32>, vector<8x526xf32>, vector<8x526xf32>, vector<8x526xf32>, vector<8x526xf32>, vector<8x526xf32>, vector<8x526xf32>, vector<8x526xf32> -> vector<128x526xf32>
    %55 = tpu.concatenate %50, %53 in 0 : vector<8x526xf32>, vector<8x526xf32> -> vector<16x526xf32>
    %56 = tpu.concatenate %54, %55 in 0 : vector<128x526xf32>, vector<16x526xf32> -> vector<144x526xf32>
    %57 = arith.truncf %56 : vector<144x526xf32> to vector<144x526xbf16>
    %c0_45 = arith.constant 0 : index
    %c0_46 = arith.constant 0 : index
    %58 = vector.load %arg3[%c0_45, %c0_46] : memref<8x144xbf16, #tpu.memory_space<vmem>>, vector<8x144xbf16>
    %cst = arith.constant dense<0.000000e+00> : vector<8x526xf32>
    %59 = tpu.matmul %58, %57, %cst {dimension_numbers = #tpu.dot_dimension_numbers<[1], [0], [0], [1], [0, 0, 1, 1], [], []>} : vector<8x144xbf16>, vector<144x526xbf16>, vector<8x526xf32> -> vector<8x526xf32>
    %c0_47 = arith.constant 0 : index
    %c0_48 = arith.constant 0 : index
    %60 = vector.load %arg4[%c0_47, %c0_48] : memref<8x1xf32, #tpu.memory_space<vmem>>, vector<8x1xf32>
    %61 = vector.broadcast %60 : vector<8x1xf32> to vector<8x526xf32>
    %62 = arith.addf %59, %61 : vector<8x526xf32>
    %cst_49 = arith.constant 0.000000e+00 : f32
    %63 = vector.broadcast %cst_49 : f32 to vector<8x526xf32>
    %64 = arith.maximumf %62, %63 : vector<8x526xf32>
    %c0_50 = arith.constant 0 : index
    %c0_51 = arith.constant 0 : index
    %65 = vector.load %arg5[%c0_50, %c0_51] : memref<1x526xf32, #tpu.memory_space<vmem>>, vector<1x526xf32>
    %66 = vector.broadcast %65 : vector<1x526xf32> to vector<8x526xf32>
    %67 = arith.mulf %64, %66 : vector<8x526xf32>
    %cst_52 = arith.constant dense<0.000000e+00> : vector<8xf32>
    %68 = vector.multi_reduction <add>, %67, %cst_52 [1] : vector<8x526xf32> to vector<8xf32>
    %69 = vector.shape_cast %68 : vector<8xf32> to vector<8x1xf32>
    %c0_53 = arith.constant 0 : index
    %c0_54 = arith.constant 0 : index
    %c0_55 = arith.constant 0 : index
    %70 = vector.load %arg7[%c0_53, %c0_54, %c0_55] : memref<1x8x1xf32, #tpu.memory_space<vmem>>, vector<1x8x1xf32>
    %71 = vector.shape_cast %70 : vector<1x8x1xf32> to vector<8x1xf32>
    %72 = vector.shape_cast %69 : vector<8x1xf32> to vector<1x8x1xf32>
    tpu.vector_store %arg7[%c0_53, %c0_54, %c0_55], %72 {strides = array<i32>} : memref<1x8x1xf32, #tpu.memory_space<vmem>>, vector<1x8x1xf32>,
    %73 = arith.mulf %67, %64 : vector<8x526xf32>
    %cst_56 = arith.constant dense<0.000000e+00> : vector<8xf32>
    %74 = vector.multi_reduction <add>, %73, %cst_56 [1] : vector<8x526xf32> to vector<8xf32>
    %75 = vector.shape_cast %74 : vector<8xf32> to vector<8x1xf32>
    %c0_57 = arith.constant 0 : index
    %c0_58 = arith.constant 0 : index
    %c0_59 = arith.constant 0 : index
    %76 = vector.load %arg8[%c0_57, %c0_58, %c0_59] : memref<1x8x1xf32, #tpu.memory_space<vmem>>, vector<1x8x1xf32>
    %77 = vector.shape_cast %76 : vector<1x8x1xf32> to vector<8x1xf32>
    %78 = vector.shape_cast %75 : vector<8x1xf32> to vector<1x8x1xf32>
    tpu.vector_store %arg8[%c0_57, %c0_58, %c0_59], %78 {strides = array<i32>} : memref<1x8x1xf32, #tpu.memory_space<vmem>>, vector<1x8x1xf32>,
    %79 = arith.truncf %64 : vector<8x526xf32> to vector<8x526xbf16>
    %c0_60 = arith.constant 0 : index
    %c0_61 = arith.constant 0 : index
    %c0_62 = arith.constant 0 : index
    %80 = vector.load %arg6[%c0_60, %c0_61, %c0_62] : memref<1x8x528xbf16, #tpu.memory_space<vmem>>, vector<1x8x526xbf16>
    %81 = vector.shape_cast %80 : vector<1x8x526xbf16> to vector<8x526xbf16>
    %82 = vector.shape_cast %79 : vector<8x526xbf16> to vector<1x8x526xbf16>
    tpu.vector_store %arg6[%c0_60, %c0_61, %c0_62], %82 {strides = array<i32>} : memref<1x8x528xbf16, #tpu.memory_space<vmem>>, vector<1x8x526xbf16>,
    %cst_63 = arith.constant 0.000000e+00 : bf16
    %83 = vector.broadcast %cst_63 : bf16 to vector<8x2xbf16>
    %c0_64 = arith.constant 0 : index
    %c0_65 = arith.constant 0 : index
    %c526 = arith.constant 526 : index
    %84 = vector.load %arg6[%c0_64, %c0_65, %c526] : memref<1x8x528xbf16, #tpu.memory_space<vmem>>, vector<1x8x2xbf16>
    %85 = vector.shape_cast %84 : vector<1x8x2xbf16> to vector<8x2xbf16>
    %86 = vector.shape_cast %83 : vector<8x2xbf16> to vector<1x8x2xbf16>
    tpu.vector_store %arg6[%c0_64, %c0_65, %c526], %86 {strides = array<i32>} : memref<1x8x528xbf16, #tpu.memory_space<vmem>>, vector<1x8x2xbf16>,
    return
  }
  func.func @transform_0(%arg0: i32) -> (i32, i32, i32) {
    %c0_i32 = arith.constant 0 : i32
    %c0_i32_0 = arith.constant 0 : i32
    %c0_i32_1 = arith.constant 0 : i32
    return %arg0, %c0_i32, %c0_i32_0 : i32, i32, i32
  }
  func.func @transform_1(%arg0: i32) -> (i32, i32, i32) {
    %c0_i32 = arith.constant 0 : i32
    %c0_i32_0 = arith.constant 0 : i32
    %c0_i32_1 = arith.constant 0 : i32
    return %arg0, %c0_i32, %c0_i32_0 : i32, i32, i32
  }
  func.func @transform_2(%arg0: i32) -> (i32, i32) {
    %c0_i32 = arith.constant 0 : i32
    %c0_i32_0 = arith.constant 0 : i32
    %c0_i32_1 = arith.constant 0 : i32
    return %c0_i32, %c0_i32_0 : i32, i32
  }
  func.func @transform_3(%arg0: i32) -> (i32, i32) {
    %c0_i32 = arith.constant 0 : i32
    %c0_i32_0 = arith.constant 0 : i32
    %c0_i32_1 = arith.constant 0 : i32
    return %c0_i32, %c0_i32_0 : i32, i32
  }
  func.func @transform_4(%arg0: i32) -> (i32, i32) {
    %c0_i32 = arith.constant 0 : i32
    %c0_i32_0 = arith.constant 0 : i32
    %c0_i32_1 = arith.constant 0 : i32
    return %c0_i32, %c0_i32_0 : i32, i32
  }
  func.func @transform_5(%arg0: i32) -> (i32, i32, i32) {
    %c0_i32 = arith.constant 0 : i32
    %c0_i32_0 = arith.constant 0 : i32
    %c0_i32_1 = arith.constant 0 : i32
    return %arg0, %c0_i32, %c0_i32_0 : i32, i32, i32
  }
  func.func @transform_6(%arg0: i32) -> (i32, i32, i32) {
    %c0_i32 = arith.constant 0 : i32
    %c0_i32_0 = arith.constant 0 : i32
    %c0_i32_1 = arith.constant 0 : i32
    return %arg0, %c0_i32, %c0_i32_0 : i32, i32, i32
  }
  func.func @transform_7(%arg0: i32) -> (i32, i32, i32) {
    %c0_i32 = arith.constant 0 : i32
    %c0_i32_0 = arith.constant 0 : i32
    %c0_i32_1 = arith.constant 0 : i32
    return %arg0, %c0_i32, %c0_i32_0 : i32, i32, i32
  }
}

module attributes {stable_mosaic.version = 11 : i64} {
  func.func @_conv3x3_kernel(%arg0: i32, %arg1: memref<1x8x528xbf16, #tpu.memory_space<vmem>>, %arg2: memref<8x72xbf16, #tpu.memory_space<vmem>>, %arg3: memref<8x1xf32, #tpu.memory_space<vmem>>, %arg4: memref<1x8x400xbf16, #tpu.memory_space<vmem>>) attributes {dimension_semantics = [#tpu.dimension_semantics<parallel>], iteration_bounds = array<i64: 2>, scalar_prefetch = 0 : i64, scratch_operands = 0 : i64, tpu.core_type = #tpu.core_type<tc>, window_params = [{transform_indices = @transform_0, window_bounds = array<i64: 1, 8, 528>}, {pipeline_mode = #tpu.pipeline_mode<synchronous>, transform_indices = @transform_1, window_bounds = array<i64: 8, 72>}, {pipeline_mode = #tpu.pipeline_mode<synchronous>, transform_indices = @transform_2, window_bounds = array<i64: 8, 1>}, {transform_indices = @transform_3, window_bounds = array<i64: 1, 8, 400>}]} {
    %c0 = arith.constant 0 : index
    %c0_0 = arith.constant 0 : index
    %c0_1 = arith.constant 0 : index
    %0 = vector.load %arg1[%c0, %c0_0, %c0_1] : memref<1x8x528xbf16, #tpu.memory_space<vmem>>, vector<1x8x478xbf16>
    %1 = vector.shape_cast %0 : vector<1x8x478xbf16> to vector<8x478xbf16>
    %2 = arith.extf %1 : vector<8x478xbf16> to vector<8x478xf32>
    %c0_2 = arith.constant 0 : index
    %c0_3 = arith.constant 0 : index
    %c1 = arith.constant 1 : index
    %3 = vector.load %arg1[%c0_2, %c0_3, %c1] : memref<1x8x528xbf16, #tpu.memory_space<vmem>>, vector<1x8x478xbf16>
    %4 = vector.shape_cast %3 : vector<1x8x478xbf16> to vector<8x478xbf16>
    %5 = arith.extf %4 : vector<8x478xbf16> to vector<8x478xf32>
    %c0_4 = arith.constant 0 : index
    %c0_5 = arith.constant 0 : index
    %c2 = arith.constant 2 : index
    %6 = vector.load %arg1[%c0_4, %c0_5, %c2] : memref<1x8x528xbf16, #tpu.memory_space<vmem>>, vector<1x8x478xbf16>
    %7 = vector.shape_cast %6 : vector<1x8x478xbf16> to vector<8x478xbf16>
    %8 = arith.extf %7 : vector<8x478xbf16> to vector<8x478xf32>
    %c0_6 = arith.constant 0 : index
    %c0_7 = arith.constant 0 : index
    %c24 = arith.constant 24 : index
    %9 = vector.load %arg1[%c0_6, %c0_7, %c24] : memref<1x8x528xbf16, #tpu.memory_space<vmem>>, vector<1x8x478xbf16>
    %10 = vector.shape_cast %9 : vector<1x8x478xbf16> to vector<8x478xbf16>
    %11 = arith.extf %10 : vector<8x478xbf16> to vector<8x478xf32>
    %c0_8 = arith.constant 0 : index
    %c0_9 = arith.constant 0 : index
    %c25 = arith.constant 25 : index
    %12 = vector.load %arg1[%c0_8, %c0_9, %c25] : memref<1x8x528xbf16, #tpu.memory_space<vmem>>, vector<1x8x478xbf16>
    %13 = vector.shape_cast %12 : vector<1x8x478xbf16> to vector<8x478xbf16>
    %14 = arith.extf %13 : vector<8x478xbf16> to vector<8x478xf32>
    %c0_10 = arith.constant 0 : index
    %c0_11 = arith.constant 0 : index
    %c26 = arith.constant 26 : index
    %15 = vector.load %arg1[%c0_10, %c0_11, %c26] : memref<1x8x528xbf16, #tpu.memory_space<vmem>>, vector<1x8x478xbf16>
    %16 = vector.shape_cast %15 : vector<1x8x478xbf16> to vector<8x478xbf16>
    %17 = arith.extf %16 : vector<8x478xbf16> to vector<8x478xf32>
    %c0_12 = arith.constant 0 : index
    %c0_13 = arith.constant 0 : index
    %c48 = arith.constant 48 : index
    %18 = vector.load %arg1[%c0_12, %c0_13, %c48] : memref<1x8x528xbf16, #tpu.memory_space<vmem>>, vector<1x8x478xbf16>
    %19 = vector.shape_cast %18 : vector<1x8x478xbf16> to vector<8x478xbf16>
    %20 = arith.extf %19 : vector<8x478xbf16> to vector<8x478xf32>
    %c0_14 = arith.constant 0 : index
    %c0_15 = arith.constant 0 : index
    %c49 = arith.constant 49 : index
    %21 = vector.load %arg1[%c0_14, %c0_15, %c49] : memref<1x8x528xbf16, #tpu.memory_space<vmem>>, vector<1x8x478xbf16>
    %22 = vector.shape_cast %21 : vector<1x8x478xbf16> to vector<8x478xbf16>
    %23 = arith.extf %22 : vector<8x478xbf16> to vector<8x478xf32>
    %c0_16 = arith.constant 0 : index
    %c0_17 = arith.constant 0 : index
    %c50 = arith.constant 50 : index
    %24 = vector.load %arg1[%c0_16, %c0_17, %c50] : memref<1x8x528xbf16, #tpu.memory_space<vmem>>, vector<1x8x478xbf16>
    %25 = vector.shape_cast %24 : vector<1x8x478xbf16> to vector<8x478xbf16>
    %26 = arith.extf %25 : vector<8x478xbf16> to vector<8x478xf32>
    %27 = tpu.concatenate %2, %5, %8, %11, %14, %17, %20, %23, %26 in 0 : vector<8x478xf32>, vector<8x478xf32>, vector<8x478xf32>, vector<8x478xf32>, vector<8x478xf32>, vector<8x478xf32>, vector<8x478xf32>, vector<8x478xf32>, vector<8x478xf32> -> vector<72x478xf32>
    %28 = arith.truncf %27 : vector<72x478xf32> to vector<72x478xbf16>
    %c0_18 = arith.constant 0 : index
    %c0_19 = arith.constant 0 : index
    %29 = vector.load %arg2[%c0_18, %c0_19] : memref<8x72xbf16, #tpu.memory_space<vmem>>, vector<8x72xbf16>
    %cst = arith.constant dense<0.000000e+00> : vector<8x478xf32>
    %30 = tpu.matmul %29, %28, %cst {dimension_numbers = #tpu.dot_dimension_numbers<[1], [0], [0], [1], [0, 0, 1, 1], [], []>} : vector<8x72xbf16>, vector<72x478xbf16>, vector<8x478xf32> -> vector<8x478xf32>
    %c0_20 = arith.constant 0 : index
    %c0_21 = arith.constant 0 : index
    %31 = vector.load %arg3[%c0_20, %c0_21] : memref<8x1xf32, #tpu.memory_space<vmem>>, vector<8x1xf32>
    %32 = vector.broadcast %31 : vector<8x1xf32> to vector<8x478xf32>
    %33 = arith.addf %30, %32 : vector<8x478xf32>
    %34 = vector.extract_strided_slice %33 {offsets = [0, 0], sizes = [8, 20], strides = [1, 1]} : vector<8x478xf32> to vector<8x20xf32>
    %35 = arith.truncf %34 : vector<8x20xf32> to vector<8x20xbf16>
    %c0_22 = arith.constant 0 : index
    %c0_23 = arith.constant 0 : index
    %c0_24 = arith.constant 0 : index
    %36 = vector.load %arg4[%c0_22, %c0_23, %c0_24] : memref<1x8x400xbf16, #tpu.memory_space<vmem>>, vector<1x8x20xbf16>
    %37 = vector.shape_cast %36 : vector<1x8x20xbf16> to vector<8x20xbf16>
    %38 = vector.shape_cast %35 : vector<8x20xbf16> to vector<1x8x20xbf16>
    tpu.vector_store %arg4[%c0_22, %c0_23, %c0_24], %38 {strides = array<i32>} : memref<1x8x400xbf16, #tpu.memory_space<vmem>>, vector<1x8x20xbf16>,
    %39 = vector.extract_strided_slice %33 {offsets = [0, 24], sizes = [8, 20], strides = [1, 1]} : vector<8x478xf32> to vector<8x20xf32>
    %40 = arith.truncf %39 : vector<8x20xf32> to vector<8x20xbf16>
    %c0_25 = arith.constant 0 : index
    %c0_26 = arith.constant 0 : index
    %c20 = arith.constant 20 : index
    %41 = vector.load %arg4[%c0_25, %c0_26, %c20] : memref<1x8x400xbf16, #tpu.memory_space<vmem>>, vector<1x8x20xbf16>
    %42 = vector.shape_cast %41 : vector<1x8x20xbf16> to vector<8x20xbf16>
    %43 = vector.shape_cast %40 : vector<8x20xbf16> to vector<1x8x20xbf16>
    tpu.vector_store %arg4[%c0_25, %c0_26, %c20], %43 {strides = array<i32>} : memref<1x8x400xbf16, #tpu.memory_space<vmem>>, vector<1x8x20xbf16>,
    %44 = vector.extract_strided_slice %33 {offsets = [0, 48], sizes = [8, 20], strides = [1, 1]} : vector<8x478xf32> to vector<8x20xf32>
    %45 = arith.truncf %44 : vector<8x20xf32> to vector<8x20xbf16>
    %c0_27 = arith.constant 0 : index
    %c0_28 = arith.constant 0 : index
    %c40 = arith.constant 40 : index
    %46 = vector.load %arg4[%c0_27, %c0_28, %c40] : memref<1x8x400xbf16, #tpu.memory_space<vmem>>, vector<1x8x20xbf16>
    %47 = vector.shape_cast %46 : vector<1x8x20xbf16> to vector<8x20xbf16>
    %48 = vector.shape_cast %45 : vector<8x20xbf16> to vector<1x8x20xbf16>
    tpu.vector_store %arg4[%c0_27, %c0_28, %c40], %48 {strides = array<i32>} : memref<1x8x400xbf16, #tpu.memory_space<vmem>>, vector<1x8x20xbf16>,
    %49 = vector.extract_strided_slice %33 {offsets = [0, 72], sizes = [8, 20], strides = [1, 1]} : vector<8x478xf32> to vector<8x20xf32>
    %50 = arith.truncf %49 : vector<8x20xf32> to vector<8x20xbf16>
    %c0_29 = arith.constant 0 : index
    %c0_30 = arith.constant 0 : index
    %c60 = arith.constant 60 : index
    %51 = vector.load %arg4[%c0_29, %c0_30, %c60] : memref<1x8x400xbf16, #tpu.memory_space<vmem>>, vector<1x8x20xbf16>
    %52 = vector.shape_cast %51 : vector<1x8x20xbf16> to vector<8x20xbf16>
    %53 = vector.shape_cast %50 : vector<8x20xbf16> to vector<1x8x20xbf16>
    tpu.vector_store %arg4[%c0_29, %c0_30, %c60], %53 {strides = array<i32>} : memref<1x8x400xbf16, #tpu.memory_space<vmem>>, vector<1x8x20xbf16>,
    %54 = vector.extract_strided_slice %33 {offsets = [0, 96], sizes = [8, 20], strides = [1, 1]} : vector<8x478xf32> to vector<8x20xf32>
    %55 = arith.truncf %54 : vector<8x20xf32> to vector<8x20xbf16>
    %c0_31 = arith.constant 0 : index
    %c0_32 = arith.constant 0 : index
    %c80 = arith.constant 80 : index
    %56 = vector.load %arg4[%c0_31, %c0_32, %c80] : memref<1x8x400xbf16, #tpu.memory_space<vmem>>, vector<1x8x20xbf16>
    %57 = vector.shape_cast %56 : vector<1x8x20xbf16> to vector<8x20xbf16>
    %58 = vector.shape_cast %55 : vector<8x20xbf16> to vector<1x8x20xbf16>
    tpu.vector_store %arg4[%c0_31, %c0_32, %c80], %58 {strides = array<i32>} : memref<1x8x400xbf16, #tpu.memory_space<vmem>>, vector<1x8x20xbf16>,
    %59 = vector.extract_strided_slice %33 {offsets = [0, 120], sizes = [8, 20], strides = [1, 1]} : vector<8x478xf32> to vector<8x20xf32>
    %60 = arith.truncf %59 : vector<8x20xf32> to vector<8x20xbf16>
    %c0_33 = arith.constant 0 : index
    %c0_34 = arith.constant 0 : index
    %c100 = arith.constant 100 : index
    %61 = vector.load %arg4[%c0_33, %c0_34, %c100] : memref<1x8x400xbf16, #tpu.memory_space<vmem>>, vector<1x8x20xbf16>
    %62 = vector.shape_cast %61 : vector<1x8x20xbf16> to vector<8x20xbf16>
    %63 = vector.shape_cast %60 : vector<8x20xbf16> to vector<1x8x20xbf16>
    tpu.vector_store %arg4[%c0_33, %c0_34, %c100], %63 {strides = array<i32>} : memref<1x8x400xbf16, #tpu.memory_space<vmem>>, vector<1x8x20xbf16>,
    %64 = vector.extract_strided_slice %33 {offsets = [0, 144], sizes = [8, 20], strides = [1, 1]} : vector<8x478xf32> to vector<8x20xf32>
    %65 = arith.truncf %64 : vector<8x20xf32> to vector<8x20xbf16>
    %c0_35 = arith.constant 0 : index
    %c0_36 = arith.constant 0 : index
    %c120 = arith.constant 120 : index
    %66 = vector.load %arg4[%c0_35, %c0_36, %c120] : memref<1x8x400xbf16, #tpu.memory_space<vmem>>, vector<1x8x20xbf16>
    %67 = vector.shape_cast %66 : vector<1x8x20xbf16> to vector<8x20xbf16>
    %68 = vector.shape_cast %65 : vector<8x20xbf16> to vector<1x8x20xbf16>
    tpu.vector_store %arg4[%c0_35, %c0_36, %c120], %68 {strides = array<i32>} : memref<1x8x400xbf16, #tpu.memory_space<vmem>>, vector<1x8x20xbf16>,
    %69 = vector.extract_strided_slice %33 {offsets = [0, 168], sizes = [8, 20], strides = [1, 1]} : vector<8x478xf32> to vector<8x20xf32>
    %70 = arith.truncf %69 : vector<8x20xf32> to vector<8x20xbf16>
    %c0_37 = arith.constant 0 : index
    %c0_38 = arith.constant 0 : index
    %c140 = arith.constant 140 : index
    %71 = vector.load %arg4[%c0_37, %c0_38, %c140] : memref<1x8x400xbf16, #tpu.memory_space<vmem>>, vector<1x8x20xbf16>
    %72 = vector.shape_cast %71 : vector<1x8x20xbf16> to vector<8x20xbf16>
    %73 = vector.shape_cast %70 : vector<8x20xbf16> to vector<1x8x20xbf16>
    tpu.vector_store %arg4[%c0_37, %c0_38, %c140], %73 {strides = array<i32>} : memref<1x8x400xbf16, #tpu.memory_space<vmem>>, vector<1x8x20xbf16>,
    %74 = vector.extract_strided_slice %33 {offsets = [0, 192], sizes = [8, 20], strides = [1, 1]} : vector<8x478xf32> to vector<8x20xf32>
    %75 = arith.truncf %74 : vector<8x20xf32> to vector<8x20xbf16>
    %c0_39 = arith.constant 0 : index
    %c0_40 = arith.constant 0 : index
    %c160 = arith.constant 160 : index
    %76 = vector.load %arg4[%c0_39, %c0_40, %c160] : memref<1x8x400xbf16, #tpu.memory_space<vmem>>, vector<1x8x20xbf16>
    %77 = vector.shape_cast %76 : vector<1x8x20xbf16> to vector<8x20xbf16>
    %78 = vector.shape_cast %75 : vector<8x20xbf16> to vector<1x8x20xbf16>
    tpu.vector_store %arg4[%c0_39, %c0_40, %c160], %78 {strides = array<i32>} : memref<1x8x400xbf16, #tpu.memory_space<vmem>>, vector<1x8x20xbf16>,
    %79 = vector.extract_strided_slice %33 {offsets = [0, 216], sizes = [8, 20], strides = [1, 1]} : vector<8x478xf32> to vector<8x20xf32>
    %80 = arith.truncf %79 : vector<8x20xf32> to vector<8x20xbf16>
    %c0_41 = arith.constant 0 : index
    %c0_42 = arith.constant 0 : index
    %c180 = arith.constant 180 : index
    %81 = vector.load %arg4[%c0_41, %c0_42, %c180] : memref<1x8x400xbf16, #tpu.memory_space<vmem>>, vector<1x8x20xbf16>
    %82 = vector.shape_cast %81 : vector<1x8x20xbf16> to vector<8x20xbf16>
    %83 = vector.shape_cast %80 : vector<8x20xbf16> to vector<1x8x20xbf16>
    tpu.vector_store %arg4[%c0_41, %c0_42, %c180], %83 {strides = array<i32>} : memref<1x8x400xbf16, #tpu.memory_space<vmem>>, vector<1x8x20xbf16>,
    %84 = vector.extract_strided_slice %33 {offsets = [0, 240], sizes = [8, 20], strides = [1, 1]} : vector<8x478xf32> to vector<8x20xf32>
    %85 = arith.truncf %84 : vector<8x20xf32> to vector<8x20xbf16>
    %c0_43 = arith.constant 0 : index
    %c0_44 = arith.constant 0 : index
    %c200 = arith.constant 200 : index
    %86 = vector.load %arg4[%c0_43, %c0_44, %c200] : memref<1x8x400xbf16, #tpu.memory_space<vmem>>, vector<1x8x20xbf16>
    %87 = vector.shape_cast %86 : vector<1x8x20xbf16> to vector<8x20xbf16>
    %88 = vector.shape_cast %85 : vector<8x20xbf16> to vector<1x8x20xbf16>
    tpu.vector_store %arg4[%c0_43, %c0_44, %c200], %88 {strides = array<i32>} : memref<1x8x400xbf16, #tpu.memory_space<vmem>>, vector<1x8x20xbf16>,
    %89 = vector.extract_strided_slice %33 {offsets = [0, 264], sizes = [8, 20], strides = [1, 1]} : vector<8x478xf32> to vector<8x20xf32>
    %90 = arith.truncf %89 : vector<8x20xf32> to vector<8x20xbf16>
    %c0_45 = arith.constant 0 : index
    %c0_46 = arith.constant 0 : index
    %c220 = arith.constant 220 : index
    %91 = vector.load %arg4[%c0_45, %c0_46, %c220] : memref<1x8x400xbf16, #tpu.memory_space<vmem>>, vector<1x8x20xbf16>
    %92 = vector.shape_cast %91 : vector<1x8x20xbf16> to vector<8x20xbf16>
    %93 = vector.shape_cast %90 : vector<8x20xbf16> to vector<1x8x20xbf16>
    tpu.vector_store %arg4[%c0_45, %c0_46, %c220], %93 {strides = array<i32>} : memref<1x8x400xbf16, #tpu.memory_space<vmem>>, vector<1x8x20xbf16>,
    %94 = vector.extract_strided_slice %33 {offsets = [0, 288], sizes = [8, 20], strides = [1, 1]} : vector<8x478xf32> to vector<8x20xf32>
    %95 = arith.truncf %94 : vector<8x20xf32> to vector<8x20xbf16>
    %c0_47 = arith.constant 0 : index
    %c0_48 = arith.constant 0 : index
    %c240 = arith.constant 240 : index
    %96 = vector.load %arg4[%c0_47, %c0_48, %c240] : memref<1x8x400xbf16, #tpu.memory_space<vmem>>, vector<1x8x20xbf16>
    %97 = vector.shape_cast %96 : vector<1x8x20xbf16> to vector<8x20xbf16>
    %98 = vector.shape_cast %95 : vector<8x20xbf16> to vector<1x8x20xbf16>
    tpu.vector_store %arg4[%c0_47, %c0_48, %c240], %98 {strides = array<i32>} : memref<1x8x400xbf16, #tpu.memory_space<vmem>>, vector<1x8x20xbf16>,
    %99 = vector.extract_strided_slice %33 {offsets = [0, 312], sizes = [8, 20], strides = [1, 1]} : vector<8x478xf32> to vector<8x20xf32>
    %100 = arith.truncf %99 : vector<8x20xf32> to vector<8x20xbf16>
    %c0_49 = arith.constant 0 : index
    %c0_50 = arith.constant 0 : index
    %c260 = arith.constant 260 : index
    %101 = vector.load %arg4[%c0_49, %c0_50, %c260] : memref<1x8x400xbf16, #tpu.memory_space<vmem>>, vector<1x8x20xbf16>
    %102 = vector.shape_cast %101 : vector<1x8x20xbf16> to vector<8x20xbf16>
    %103 = vector.shape_cast %100 : vector<8x20xbf16> to vector<1x8x20xbf16>
    tpu.vector_store %arg4[%c0_49, %c0_50, %c260], %103 {strides = array<i32>} : memref<1x8x400xbf16, #tpu.memory_space<vmem>>, vector<1x8x20xbf16>,
    %104 = vector.extract_strided_slice %33 {offsets = [0, 336], sizes = [8, 20], strides = [1, 1]} : vector<8x478xf32> to vector<8x20xf32>
    %105 = arith.truncf %104 : vector<8x20xf32> to vector<8x20xbf16>
    %c0_51 = arith.constant 0 : index
    %c0_52 = arith.constant 0 : index
    %c280 = arith.constant 280 : index
    %106 = vector.load %arg4[%c0_51, %c0_52, %c280] : memref<1x8x400xbf16, #tpu.memory_space<vmem>>, vector<1x8x20xbf16>
    %107 = vector.shape_cast %106 : vector<1x8x20xbf16> to vector<8x20xbf16>
    %108 = vector.shape_cast %105 : vector<8x20xbf16> to vector<1x8x20xbf16>
    tpu.vector_store %arg4[%c0_51, %c0_52, %c280], %108 {strides = array<i32>} : memref<1x8x400xbf16, #tpu.memory_space<vmem>>, vector<1x8x20xbf16>,
    %109 = vector.extract_strided_slice %33 {offsets = [0, 360], sizes = [8, 20], strides = [1, 1]} : vector<8x478xf32> to vector<8x20xf32>
    %110 = arith.truncf %109 : vector<8x20xf32> to vector<8x20xbf16>
    %c0_53 = arith.constant 0 : index
    %c0_54 = arith.constant 0 : index
    %c300 = arith.constant 300 : index
    %111 = vector.load %arg4[%c0_53, %c0_54, %c300] : memref<1x8x400xbf16, #tpu.memory_space<vmem>>, vector<1x8x20xbf16>
    %112 = vector.shape_cast %111 : vector<1x8x20xbf16> to vector<8x20xbf16>
    %113 = vector.shape_cast %110 : vector<8x20xbf16> to vector<1x8x20xbf16>
    tpu.vector_store %arg4[%c0_53, %c0_54, %c300], %113 {strides = array<i32>} : memref<1x8x400xbf16, #tpu.memory_space<vmem>>, vector<1x8x20xbf16>,
    %114 = vector.extract_strided_slice %33 {offsets = [0, 384], sizes = [8, 20], strides = [1, 1]} : vector<8x478xf32> to vector<8x20xf32>
    %115 = arith.truncf %114 : vector<8x20xf32> to vector<8x20xbf16>
    %c0_55 = arith.constant 0 : index
    %c0_56 = arith.constant 0 : index
    %c320 = arith.constant 320 : index
    %116 = vector.load %arg4[%c0_55, %c0_56, %c320] : memref<1x8x400xbf16, #tpu.memory_space<vmem>>, vector<1x8x20xbf16>
    %117 = vector.shape_cast %116 : vector<1x8x20xbf16> to vector<8x20xbf16>
    %118 = vector.shape_cast %115 : vector<8x20xbf16> to vector<1x8x20xbf16>
    tpu.vector_store %arg4[%c0_55, %c0_56, %c320], %118 {strides = array<i32>} : memref<1x8x400xbf16, #tpu.memory_space<vmem>>, vector<1x8x20xbf16>,
    %119 = vector.extract_strided_slice %33 {offsets = [0, 408], sizes = [8, 20], strides = [1, 1]} : vector<8x478xf32> to vector<8x20xf32>
    %120 = arith.truncf %119 : vector<8x20xf32> to vector<8x20xbf16>
    %c0_57 = arith.constant 0 : index
    %c0_58 = arith.constant 0 : index
    %c340 = arith.constant 340 : index
    %121 = vector.load %arg4[%c0_57, %c0_58, %c340] : memref<1x8x400xbf16, #tpu.memory_space<vmem>>, vector<1x8x20xbf16>
    %122 = vector.shape_cast %121 : vector<1x8x20xbf16> to vector<8x20xbf16>
    %123 = vector.shape_cast %120 : vector<8x20xbf16> to vector<1x8x20xbf16>
    tpu.vector_store %arg4[%c0_57, %c0_58, %c340], %123 {strides = array<i32>} : memref<1x8x400xbf16, #tpu.memory_space<vmem>>, vector<1x8x20xbf16>,
    %124 = vector.extract_strided_slice %33 {offsets = [0, 432], sizes = [8, 20], strides = [1, 1]} : vector<8x478xf32> to vector<8x20xf32>
    %125 = arith.truncf %124 : vector<8x20xf32> to vector<8x20xbf16>
    %c0_59 = arith.constant 0 : index
    %c0_60 = arith.constant 0 : index
    %c360 = arith.constant 360 : index
    %126 = vector.load %arg4[%c0_59, %c0_60, %c360] : memref<1x8x400xbf16, #tpu.memory_space<vmem>>, vector<1x8x20xbf16>
    %127 = vector.shape_cast %126 : vector<1x8x20xbf16> to vector<8x20xbf16>
    %128 = vector.shape_cast %125 : vector<8x20xbf16> to vector<1x8x20xbf16>
    tpu.vector_store %arg4[%c0_59, %c0_60, %c360], %128 {strides = array<i32>} : memref<1x8x400xbf16, #tpu.memory_space<vmem>>, vector<1x8x20xbf16>,
    %129 = vector.extract_strided_slice %33 {offsets = [0, 456], sizes = [8, 20], strides = [1, 1]} : vector<8x478xf32> to vector<8x20xf32>
    %130 = arith.truncf %129 : vector<8x20xf32> to vector<8x20xbf16>
    %c0_61 = arith.constant 0 : index
    %c0_62 = arith.constant 0 : index
    %c380 = arith.constant 380 : index
    %131 = vector.load %arg4[%c0_61, %c0_62, %c380] : memref<1x8x400xbf16, #tpu.memory_space<vmem>>, vector<1x8x20xbf16>
    %132 = vector.shape_cast %131 : vector<1x8x20xbf16> to vector<8x20xbf16>
    %133 = vector.shape_cast %130 : vector<8x20xbf16> to vector<1x8x20xbf16>
    tpu.vector_store %arg4[%c0_61, %c0_62, %c380], %133 {strides = array<i32>} : memref<1x8x400xbf16, #tpu.memory_space<vmem>>, vector<1x8x20xbf16>,
    return
  }
  func.func @transform_0(%arg0: i32) -> (i32, i32, i32) {
    %c0_i32 = arith.constant 0 : i32
    %c0_i32_0 = arith.constant 0 : i32
    %c0_i32_1 = arith.constant 0 : i32
    return %arg0, %c0_i32, %c0_i32_0 : i32, i32, i32
  }
  func.func @transform_1(%arg0: i32) -> (i32, i32) {
    %c0_i32 = arith.constant 0 : i32
    %c0_i32_0 = arith.constant 0 : i32
    %c0_i32_1 = arith.constant 0 : i32
    return %c0_i32, %c0_i32_0 : i32, i32
  }
  func.func @transform_2(%arg0: i32) -> (i32, i32) {
    %c0_i32 = arith.constant 0 : i32
    %c0_i32_0 = arith.constant 0 : i32
    %c0_i32_1 = arith.constant 0 : i32
    return %c0_i32, %c0_i32_0 : i32, i32
  }
  func.func @transform_3(%arg0: i32) -> (i32, i32, i32) {
    %c0_i32 = arith.constant 0 : i32
    %c0_i32_0 = arith.constant 0 : i32
    %c0_i32_1 = arith.constant 0 : i32
    return %arg0, %c0_i32, %c0_i32_0 : i32, i32, i32
  }
}

</mosaic_0001>

<bundles_post_ra>
// kernel: tile.23
= control target key start
LH: loop header
LB: loop body
LE: loop exit
PB: predicated region body
PF: predicated region fallthrough
CT: control target
= control target key end

     0   :  { %s22_s0 = inlined_call_operand.vmem [shape: f32[16], index: 0, kind: input, shape index: {}]   ;;  %s23_s1 = inlined_call_operand.vmem [shape: f32[4,16], index: 1, kind: output, shape index: {}]  }
   0x1   :  { %v4_v0 = vld [vmem:[%s22_s0] ss:$0 sm:$0xff] }
   0x2   :  { %5 = vst [vmem:[%s23_s1] sm:$0xf] %v4_v0 }

// kernel: tile.0
= control target key start
LH: loop header
LB: loop body
LE: loop exit
PB: predicated region body
PF: predicated region fallthrough
CT: control target
= control target key end

     0   :  { %s176_s8 = smov 125   ;;  %s177_s9 = smov 126   ;;  %vm7_vm0 = vcmask 7168   ;;  %s331_s0 = inlined_call_operand.vmem [shape: f32[4,16], index: 0, kind: input, shape index: {}]   ;;  %s332_s1 = inlined_call_operand.vmem [shape: f32[64,1], index: 1, kind: output, shape index: {}]  }
   0x1   :  { %v4_v0 = vld [vmem:[%s331_s0] sm:$0xf]  ;;  %s175_s0 = smov 127   ;;  %s178_s10 = smov 124  }
   0x2   :  { %5 = vst [vmem:[#allocation0] sm:$0xf] %v4_v0  ;;  %s179_s11 = smov 123   ;;  %s180_s12 = smov 122  }
   0x3   :  { %s181_s13 = smov 121   ;;  %s182_s14 = smov 120  }
   0x4   :  { %s183_s19 = smov 119   ;;  %s184_s20 = smov 118  }
   0x5   :  { %s185_s21 = smov 117   ;;  %s186_s22 = smov 116  }
   0x6   :  { %s187_s23 = smov 115   ;;  %s188_s24 = smov 114  }
   0x7   :  { %s189_s25 = smov 113  }
   0x9   :  { %v10_v1 = vld [vmem:[#allocation0] sm:$0xf]  }
   0xa   :  { %v26_v2 = vld [vmem:[#allocation0] sm:$0xf]   ;;  %11 = vrot.lane.b32.xlu0 %v10_v1, %s175_s0 }
   0xb   :  { %27 = vrot.lane.b32.xlu1 %v26_v2, %s176_s8  ;;  %v18_v3 = vld [vmem:[#allocation0] sm:$0xf]  }
   0xc   :  { %v34_v4 = vld [vmem:[#allocation0] sm:$0xf]  }
   0xd   :  { %v42_v5 = vld [vmem:[#allocation0] sm:$0xf]  }
   0xe   :  { %19 = vrot.lane.b32.xlu0 %v18_v3, %s177_s9  ;;  %v50_v6 = vld [vmem:[#allocation0] sm:$0xf]  }
   0xf   :  { %35 = vrot.lane.b32.xlu1 %v34_v4, %s178_s10  ;;  %v58_v7 = vld [vmem:[#allocation0] sm:$0xf]  }
  0x10   :  { %v66_v8 = vld [vmem:[#allocation0] sm:$0xf]  }
  0x11   :  { %v74_v9 = vld [vmem:[#allocation0] sm:$0xf]  }
  0x12   :  { %43 = vrot.lane.b32.xlu0 %v42_v5, %s179_s11  ;;  %v82_v10 = vld [vmem:[#allocation0] sm:$0xf]  }
  0x13   :  { %51 = vrot.lane.b32.xlu1 %v50_v6, %s180_s12  ;;  %v6_v11 = vld [vmem:[#allocation0] sm:$0xf]  }
  0x14   :  { %8 = vst.msk [vmem:[%s332_s1] ss:$16 sm:$0x3] %vm7_vm0, %v6_v11   ;;  %9 = vst.msk [vmem:[%s332_s1] ss:$16 sm:$0xc] %vm7_vm0, %v6_v11  }
  0x15   :  { %v90_v12 = vld [vmem:[#allocation0] sm:$0xf]  }
  0x16   :  { %59 = vrot.lane.b32.xlu0 %v58_v7, %s181_s13  ;;  %v98_v13 = vld [vmem:[#allocation0] sm:$0xf]  }
  0x17   :  { %67 = vrot.lane.b32.xlu1 %v66_v8, %s182_s14  ;;  %v106_v14 = vld [vmem:[#allocation0] sm:$0xf]  }
  0x18   :  { %v114_v15 = vld [vmem:[#allocation0] sm:$0xf]  }
  0x19   :  { %v122_v16 = vld [vmem:[#allocation0] sm:$0xf]  }
  0x1a   :  { %75 = vrot.lane.b32.xlu0 %v74_v9, %s183_s19 }
  0x1b   :  { %83 = vrot.lane.b32.xlu1 %v82_v10, %s184_s20 }
  0x1e   :  { %91 = vrot.lane.b32.xlu0 %v90_v12, %s185_s21 }
  0x1f   :  { %99 = vrot.lane.b32.xlu1 %v98_v13, %s186_s22 }
  0x22   :  { %107 = vrot.lane.b32.xlu0 %v106_v14, %s187_s23 }
  0x23   :  { %115 = vrot.lane.b32.xlu1 %v114_v15, %s188_s24 }
  0x26   :  { %123 = vrot.lane.b32.xlu0 %v122_v16, %s189_s25 }
  0x7c   :  { %v12_v17 = vpop.permute.xlu0 %11  }
  0x7d   :  { %v28_v18 = vpop.permute.xlu1 %27   ;;  %130 = vst.msk [vmem:[%s332_s1 + $0x1] ss:$16 sm:$0x3] %vm7_vm0, %v12_v17   ;;  %131 = vst.msk [vmem:[%s332_s1 + $0x1] ss:$16 sm:$0xc] %vm7_vm0, %v12_v17  }
  0x7e   :  { %134 = vst.msk [vmem:[%s332_s1 + $0x3] ss:$16 sm:$0x3] %vm7_vm0, %v28_v18   ;;  %135 = vst.msk [vmem:[%s332_s1 + $0x3] ss:$16 sm:$0xc] %vm7_vm0, %v28_v18  }
  0x80   :  { %v20_v19 = vpop.permute.xlu0 %19  }
  0x81   :  { %v36_v20 = vpop.permute.xlu1 %35   ;;  %132 = vst.msk [vmem:[%s332_s1 + $0x2] ss:$16 sm:$0x3] %vm7_vm0, %v20_v19   ;;  %133 = vst.msk [vmem:[%s332_s1 + $0x2] ss:$16 sm:$0xc] %vm7_vm0, %v20_v19  }
  0x82   :  { %136 = vst.msk [vmem:[%s332_s1 + $0x4] ss:$16 sm:$0x3] %vm7_vm0, %v36_v20   ;;  %137 = vst.msk [vmem:[%s332_s1 + $0x4] ss:$16 sm:$0xc] %vm7_vm0, %v36_v20  }
  0x84   :  { %v44_v21 = vpop.permute.xlu0 %43  }
  0x85   :  { %v52_v22 = vpop.permute.xlu1 %51   ;;  %138 = vst.msk [vmem:[%s332_s1 + $0x5] ss:$16 sm:$0x3] %vm7_vm0, %v44_v21   ;;  %139 = vst.msk [vmem:[%s332_s1 + $0x5] ss:$16 sm:$0xc] %vm7_vm0, %v44_v21  }
  0x86   :  { %140 = vst.msk [vmem:[%s332_s1 + $0x6] ss:$16 sm:$0x3] %vm7_vm0, %v52_v22   ;;  %141 = vst.msk [vmem:[%s332_s1 + $0x6] ss:$16 sm:$0xc] %vm7_vm0, %v52_v22  }
  0x88   :  { %v60_v23 = vpop.permute.xlu0 %59  }
  0x89   :  { %v68_v24 = vpop.permute.xlu1 %67   ;;  %142 = vst.msk [vmem:[%s332_s1 + $0x7] ss:$16 sm:$0x3] %vm7_vm0, %v60_v23   ;;  %143 = vst.msk [vmem:[%s332_s1 + $0x7] ss:$16 sm:$0xc] %vm7_vm0, %v60_v23  }
  0x8a   :  { %144 = vst.msk [vmem:[%s332_s1 + $0x8] ss:$16 sm:$0x3] %vm7_vm0, %v68_v24   ;;  %145 = vst.msk [vmem:[%s332_s1 + $0x8] ss:$16 sm:$0xc] %vm7_vm0, %v68_v24  }
  0x8c   :  { %v76_v25 = vpop.permute.xlu0 %75  }
  0x8d   :  { %v84_v26 = vpop.permute.xlu1 %83   ;;  %146 = vst.msk [vmem:[%s332_s1 + $0x9] ss:$16 sm:$0x3] %vm7_vm0, %v76_v25   ;;  %147 = vst.msk [vmem:[%s332_s1 + $0x9] ss:$16 sm:$0xc] %vm7_vm0, %v76_v25  }
  0x8e   :  { %148 = vst.msk [vmem:[%s332_s1 + $0xa] ss:$16 sm:$0x3] %vm7_vm0, %v84_v26   ;;  %149 = vst.msk [vmem:[%s332_s1 + $0xa] ss:$16 sm:$0xc] %vm7_vm0, %v84_v26  }
  0x90   :  { %v92_v27 = vpop.permute.xlu0 %91  }
  0x91   :  { %v100_v28 = vpop.permute.xlu1 %99   ;;  %150 = vst.msk [vmem:[%s332_s1 + $0xb] ss:$16 sm:$0x3] %vm7_vm0, %v92_v27   ;;  %151 = vst.msk [vmem:[%s332_s1 + $0xb] ss:$16 sm:$0xc] %vm7_vm0, %v92_v27  }
  0x92   :  { %152 = vst.msk [vmem:[%s332_s1 + $0xc] ss:$16 sm:$0x3] %vm7_vm0, %v100_v28   ;;  %153 = vst.msk [vmem:[%s332_s1 + $0xc] ss:$16 sm:$0xc] %vm7_vm0, %v100_v28  }
  0x94   :  { %v108_v29 = vpop.permute.xlu0 %107  }
  0x95   :  { %v116_v30 = vpop.permute.xlu1 %115   ;;  %154 = vst.msk [vmem:[%s332_s1 + $0xd] ss:$16 sm:$0x3] %vm7_vm0, %v108_v29   ;;  %155 = vst.msk [vmem:[%s332_s1 + $0xd] ss:$16 sm:$0xc] %vm7_vm0, %v108_v29  }
  0x96   :  { %156 = vst.msk [vmem:[%s332_s1 + $0xe] ss:$16 sm:$0x3] %vm7_vm0, %v116_v30   ;;  %157 = vst.msk [vmem:[%s332_s1 + $0xe] ss:$16 sm:$0xc] %vm7_vm0, %v116_v30  }
  0x98   :  { %v124_v31 = vpop.permute.xlu0 %123  }
  0x99   :  { %158 = vst.msk [vmem:[%s332_s1 + $0xf] ss:$16 sm:$0x3] %vm7_vm0, %v124_v31   ;;  %159 = vst.msk [vmem:[%s332_s1 + $0xf] ss:$16 sm:$0xc] %vm7_vm0, %v124_v31  }

// kernel: decoder_forward.6
= control target key start
LH: loop header
LB: loop body
LE: loop exit
PB: predicated region body
PF: predicated region fallthrough
CT: control target
= control target key end

     0   :  { %s545_s12 = smov 0   ;;  %s614_s0 = inlined_call_operand.vmem [shape: bf16[2,32,64], index: 0, kind: input, shape index: {}]   ;;  %s615_s1 = inlined_call_operand.vmem [shape: bf16[64,32], index: 1, kind: input, shape index: {}]   ;;  %s616_s2 = inlined_call_operand.vmem [shape: f32[64,1], index: 2, kind: input, shape index: {}]   ;;  %s617_s3 = inlined_call_operand.vmem [shape: bf16[2,64,64], index: 3, kind: output, shape index: {}]  }
   0x1 LB: > { %s438_s13 = sadd.s32 4294967295, %s522_s12   ;;  %p442_p0 = scmp.ge.s32.totalorder %s522_s12, 1  ;;  %s522_s12 = sphi %s545_s12, %s13_s12  }
   0x2   : > { %p137_p1 = scmp.lt.s32.totalorder %s522_s12, 3 }
   0x4   : > { %p138_p2 = pnand %p442_p0, %p137_p1 }
   0x5   : > { %p161_p3 = scmp.lt.s32.totalorder (!%p138_p2), %s438_s13, 1  ;;  %v512_v0 = vld [vmem:[%s615_s1] sm:$0xff] (!%p138_p2)   ;;  %vm264_vm0 = vcmask (!%p138_p2), 261120   ;;  %v513_v1 = vld [vmem:[%s615_s1 + $0x10] sm:$0xff] (!%p138_p2)   ;;  %v524_v2 = vmov (!%p138_p2), 0   ;;  %v187_v7 = vld [vmem:[%s616_s2 + $0x18] sm:$0xff] (!%p138_p2) }
   0x6   : > { %141 = sbr.rel (%p138_p2) target bundleno = 245 (0xf5), region = 32  ;;  %487 = vmatprep.mubr.msk.bf16.mxu0 (!%p138_p2), %vm264_vm0, %v512_v0  ;;  %491 = vmatprep.mubr.msk.bf16.mxu1 (!%p138_p2), %vm264_vm0, %v513_v1  ;;  %v186_v3 = vld [vmem:[%s616_s2 + $0x10] sm:$0xff] (!%p138_p2)  ;;  %v184_v4 = vld [vmem:[%s616_s2] sm:$0xff] (!%p138_p2)  ;;  %v185_v8 = vld [vmem:[%s616_s2 + $0x8] sm:$0xff] (!%p138_p2)  ;;  %vm374_vm1 = vcmask (!%p138_p2), 519168  }
   0x7   : > { %509 = vset.pattern.permute.xlu1 (!%p138_p2), %v524_v2  ;;  %508 = vset.pattern.permute.xlu0 (!%p138_p2), %v524_v2  ;;  %v514_v9 = vld [vmem:[%s615_s1 + $0x8] sm:$0xff] (!%p138_p2)   ;;  %v515_v10 = vld [vmem:[%s615_s1 + $0x18] sm:$0xff] (!%p138_p2)   ;;  %v188_v12 = vld [vmem:[%s616_s2 + $0x20] sm:$0xff] (!%p138_p2) }
   0x8   : > { %204 = vperm.xlu1 (!%p138_p2), %509, %v186_v3   ;;  %194 = vperm.xlu0 (!%p138_p2), %508, %v184_v4   ;;  %v189_v11 = vld [vmem:[%s616_s2 + $0x28] sm:$0xff] (!%p138_p2)  ;;  %v191_v13 = vld [vmem:[%s616_s2 + $0x38] sm:$0xff] (!%p138_p2)  ;;  %v190_v14 = vld [vmem:[%s616_s2 + $0x30] sm:$0xff] (!%p138_p2) }
   0xc   : > { %209 = vperm.xlu1 (!%p138_p2), %509, %v187_v7   ;;  %199 = vperm.xlu0 (!%p138_p2), %508, %v185_v8  }
   0xd   : > { %s619_s13 = smov (!%p161_p3, %s438_s13), 1 }
   0xe   : > { %s467_s18 = sshll.u32 %s619_s13, 4  ;;  %s468_s17 = sshll.u32 %s619_s13, 5 }
   0xf   : > { %s165_s25 = scalar_lea.vmem %s614_s0, %s467_s18  ;;  %s170_s20 = scalar_lea.vmem %s617_s3, %s468_s17 }
  0x10   : > { %v510_v5 = vld [vmem:[%s165_s25] sm:$0xff]   ;;  %v511_v6 = vld [vmem:[%s165_s25 + $0x8] sm:$0xff]   ;;  %219 = vperm.xlu1 %509, %v189_v11   ;;  %214 = vperm.xlu0 %508, %v188_v12  }
  0x11   : > { %483 = vmatprep.subr.bf16.mxu0 %v510_v5  ;;  %495 = vmatprep.subr.bf16.mxu1 %v510_v5 }
  0x12   : > { %484 = vmatpush3.bf16.msra.mxu0 %v510_v5  ;;  %497 = vmatpush3.bf16.msra.mxu1 %v510_v5 }
  0x13   : > { %485 = vmatprep.subr.bf16.mxu0 %v511_v6  ;;  %496 = vmatprep.subr.bf16.mxu1 %v511_v6 }
  0x14   : > { %229 = vperm.xlu1 %509, %v191_v13   ;;  %224 = vperm.xlu0 %508, %v190_v14  }
  0x16   : > { %486 = vmatpush3.bf16.msra.mxu0 %v511_v6  ;;  %498 = vmatpush3.bf16.msra.mxu1 %v511_v6 }
  0x19   : > { %488 = vmatmul.mubr.msk.bf16.vlgmr.msra.gmra.mrb[0].mxu0 %vm264_vm0, %v514_v9  ;;  %492 = vmatmul.mubr.msk.bf16.vlgmr.msra.gmra.mrb[0].mxu1 %vm264_vm0, %v515_v10 }
  0x87   : > { %v205_v15 = vpop.permute.xlu1 %204  ;;  %v195_v16 = vpop.permute.xlu0 %194 }
  0x8b   : > { %v210_v17 = vpop.permute.xlu1 %209  ;;  %v200_v18 = vpop.permute.xlu0 %199 }
  0x8f   : > { %v220_v19 = vpop.permute.xlu1 %219  ;;  %v215_v20 = vpop.permute.xlu0 %214 }
  0x93   : > { %v230_v21 = vpop.permute.xlu1 %229  ;;  %v225_v22 = vpop.permute.xlu0 %224 }
  0xec   : > { %v489_v23 = vpop.f32.mrb[0].mxu0  ;;  %v493_v24 = vpop.f32.mrb[0].mxu1 }
  0xed   : > { %v320_v25 = vadd.f32 %v489_v23, %v205_v15  ;;  %v336_v26 = vadd.f32 %v493_v24, %v225_v22  ;;  %v311_v27 = vpop.f32.mrb[1].mxu0  ;;  %v327_v28 = vpop.f32.mrb[1].mxu1 }
  0xee   : > { %v312_v29 = vadd.f32 %v311_v27, %v195_v16  ;;  %v328_v30 = vadd.f32 %v327_v28, %v215_v20  ;;  %v490_v31 = vpop.f32.mrb[2].mxu0  ;;  %v494_v32 = vpop.f32.mrb[2].mxu1 }
  0xef   : > { %v471_v33 = vpack.c.bf16 %v320_v25, %v320_v25  ;;  %v475_v34 = vpack.c.bf16 %v336_v26, %v336_v26  ;;  %v323_v35 = vadd.f32 %v490_v31, %v210_v17  ;;  %v339_v36 = vadd.f32 %v494_v32, %v230_v21  ;;  %v314_v37 = vpop.f32.mrb[3].mxu0  ;;  %v330_v38 = vpop.f32.mrb[3].mxu1 }
  0xf0   : > { %v469_v39 = vpack.c.bf16 %v312_v29, %v312_v29  ;;  %v473_v40 = vpack.c.bf16 %v328_v30, %v328_v30  ;;  %v315_v41 = vadd.f32 %v314_v37, %v200_v18  ;;  %v331_v42 = vadd.f32 %v330_v38, %v220_v19 }
  0xf1   : > { %377 = vst.msk [vmem:[%s170_s20 + $0x8] sm:$0xf] %vm374_vm1, %v471_v33  ;;  %381 = vst.msk [vmem:[%s170_s20 + $0x18] sm:$0xf] %vm374_vm1, %v475_v34  ;;  %v472_v43 = vpack.c.bf16 %v323_v35, %v323_v35  ;;  %v476_v44 = vpack.c.bf16 %v339_v36, %v339_v36 }
  0xf2   : > { %375 = vst.msk [vmem:[%s170_s20] sm:$0xf] %vm374_vm1, %v469_v39  ;;  %379 = vst.msk [vmem:[%s170_s20 + $0x10] sm:$0xf] %vm374_vm1, %v473_v40  ;;  %v470_v45 = vpack.c.bf16 %v315_v41, %v315_v41  ;;  %v474_v46 = vpack.c.bf16 %v331_v42, %v331_v42 }
  0xf3   : > { %378 = vst.msk [vmem:[%s170_s20 + $0xc] sm:$0xf] %vm374_vm1, %v472_v43  ;;  %382 = vst.msk [vmem:[%s170_s20 + $0x1c] sm:$0xf] %vm374_vm1, %v476_v44 }
  0xf4   : > { %376 = vst.msk [vmem:[%s170_s20 + $0x4] sm:$0xf] %vm374_vm1, %v470_v45  ;;  %380 = vst.msk [vmem:[%s170_s20 + $0x14] sm:$0xf] %vm374_vm1, %v474_v46 }
  0xf5 PF: > { %s13_s12 = sadd.s32 1, %s522_s12  }
  0xf6   : > { %p10_p4 = scmp.ge.s32.totalorder %s13_s12, 4  }
  0xf8   :  { %12 = sbr.rel (!%p10_p4) target bundleno = 1 (0x1), region = 62 }

// kernel: tile.28
= control target key start
LH: loop header
LB: loop body
LE: loop exit
PB: predicated region body
PF: predicated region fallthrough
CT: control target
= control target key end

     0   :  { %s28_s0 = inlined_call_operand.vmem [shape: f32[16], index: 0, kind: input, shape index: {}]   ;;  %s29_s1 = inlined_call_operand.vmem [shape: f32[9,16], index: 1, kind: output, shape index: {}]  }
   0x1   :  { %v4_v0 = vld [vmem:[%s28_s0] ss:$0 sm:$0xff] }
   0x2   :  { %5 = vst [vmem:[%s29_s1] sm:$0xff] %v4_v0  ;;  %8 = vst [vmem:[%s29_s1 + $0x8] sm:$0xff] %v4_v0 }

// kernel: mul.18
= control target key start
LH: loop header
LB: loop body
LE: loop exit
PB: predicated region body
PF: predicated region fallthrough
CT: control target
= control target key end

     0   :  { %s68_s10 = smov 112   ;;  %s69_s11 = smov 80   ;;  %vm4_vm0 = vcmask 130048   ;;  %vm10_vm1 = vcmask 1048448   ;;  %vm16_vm2 = vcmask 917248   ;;  %vm22_vm3 = vcmask 786048   ;;  %s112_s0 = inlined_call_operand.vmem [shape: f32[9,16], index: 0, kind: input, shape index: {}]   ;;  %s113_s1 = inlined_call_operand.vmem [shape: f32[144], index: 1, kind: output, shape index: {}]  }
   0x1   :  { %v54_v0 = vld [vmem:[%s112_s0 + $0x7] sm:$0x1]   ;;  %v56_v1 = vld [vmem:[%s112_s0 + $0x5] sm:$0x1]   ;;  %v55_v2 = vld [vmem:[%s112_s0 + $0x6] sm:$0x1]  }
   0x2   :  { %8 = vrot.lane.b32.xlu0 %v54_v0, %s68_s10  ;;  %20 = vrot.lane.b32.xlu1 %v56_v1, %s69_s11  ;;  %v57_v3 = vld [vmem:[%s112_s0 + $0x4] sm:$0x1]   ;;  %s2_s16 = smov 3  ;;  %s70_s19 = smov 96   ;;  %v58_v5 = vld [vmem:[%s112_s0 + $0x3] sm:$0x1]  }
   0x3   :  { %v3_v4 = vld [vmem:[%s112_s0] ss:$8 sm:%s2_s16]   ;;  %s71_s20 = smov 64   ;;  %v59_v6 = vld [vmem:[%s112_s0 + $0x2] sm:$0x1]   ;;  %s72_s25 = smov 48  }
   0x4   :  { %5 = vst.msk [vmem:[#allocation0] sm:$0x3] %vm4_vm0, %v3_v4   ;;  %s73_s26 = smov 32   ;;  %v60_v7 = vld [vmem:[%s112_s0 + $0x1] sm:$0x1]   ;;  %s74_s0 = smov 16  }
   0x5   :  { %vm28_vm4 = vcmask 654848   ;;  %vm34_vm5 = vcmask 523648   ;;  %vm40_vm6 = vcmask 392448   ;;  %vm46_vm7 = vcmask 261248  }
   0x6   :  { %14 = vrot.lane.b32.xlu0 %v55_v2, %s70_s19  ;;  %26 = vrot.lane.b32.xlu1 %v57_v3, %s71_s20 }
   0xa   :  { %32 = vrot.lane.b32.xlu0 %v58_v5, %s72_s25  ;;  %38 = vrot.lane.b32.xlu1 %v59_v6, %s73_s26 }
   0xe   :  { %44 = vrot.lane.b32.xlu0 %v60_v7, %s74_s0 }
  0x74   :  { %v9_v8 = vpop.permute.xlu0 %8   ;;  %v21_v9 = vpop.permute.xlu1 %20  }
  0x75   :  { %11 = vst.msk [vmem:[#allocation0] sm:$0x1] %vm10_vm1, %v9_v8  }
  0x78   :  { %v15_v10 = vpop.permute.xlu0 %14   ;;  %v27_v11 = vpop.permute.xlu1 %26  }
  0x79   :  { %17 = vst.msk [vmem:[#allocation0] sm:$0x1] %vm16_vm2, %v15_v10  }
  0x7a   :  { %23 = vst.msk [vmem:[#allocation0] sm:$0x1] %vm22_vm3, %v21_v9  }
  0x7b   :  { %29 = vst.msk [vmem:[#allocation0] sm:$0x1] %vm28_vm4, %v27_v11  }
  0x7c   :  { %v33_v12 = vpop.permute.xlu0 %32   ;;  %v39_v13 = vpop.permute.xlu1 %38  }
  0x7d   :  { %35 = vst.msk [vmem:[#allocation0] sm:$0x1] %vm34_vm5, %v33_v12  }
  0x7e   :  { %41 = vst.msk [vmem:[#allocation0] sm:$0x1] %vm40_vm6, %v39_v13  }
  0x80   :  { %v45_v14 = vpop.permute.xlu0 %44  }
  0x81   :  { %47 = vst.msk [vmem:[#allocation0] sm:$0x1] %vm46_vm7, %v45_v14  }
  0x88   :  { %v51_v15 = vld [vmem:[#allocation0] sm:$0x3] }
  0x89   :  { %53 = vst [vmem:[%s113_s1] sm:$0x3] %v51_v15 }

// kernel: tile.33
= control target key start
LH: loop header
LB: loop body
LE: loop exit
PB: predicated region body
PF: predicated region fallthrough
CT: control target
= control target key end

     0   :  { %s22_s0 = inlined_call_operand.vmem [shape: f32[8], index: 0, kind: input, shape index: {}]   ;;  %s23_s1 = inlined_call_operand.vmem [shape: f32[4,8], index: 1, kind: output, shape index: {}]  }
   0x1   :  { %v4_v0 = vld [vmem:[%s22_s0] ss:$0 sm:$0xff] }
   0x2   :  { %5 = vst [vmem:[%s23_s1] sm:$0xf] %v4_v0 }

// kernel: tile.1
= control target key start
LH: loop header
LB: loop body
LE: loop exit
PB: predicated region body
PF: predicated region fallthrough
CT: control target
= control target key end

     0   :  { %s66_s8 = smov 125   ;;  %vm7_vm0 = vcmask 7168   ;;  %s67_s11 = smov 126   ;;  %s117_s0 = inlined_call_operand.vmem [shape: f32[4,8], index: 0, kind: input, shape index: {}]   ;;  %s118_s1 = inlined_call_operand.vmem [shape: f32[32,1], index: 1, kind: output, shape index: {}]  }
   0x1   :  { %v4_v0 = vld [vmem:[%s117_s0] sm:$0xf]  ;;  %s65_s0 = smov 127   ;;  %s68_s12 = smov 124  }
   0x2   :  { %5 = vst [vmem:[#allocation0] sm:$0xf] %v4_v0  ;;  %s69_s13 = smov 123   ;;  %s70_s14 = smov 122  }
   0x3   :  { %s71_s15 = smov 121  }
   0x9   :  { %v9_v1 = vld [vmem:[#allocation0] sm:$0xf]  }
   0xa   :  { %v21_v2 = vld [vmem:[#allocation0] sm:$0xf]   ;;  %10 = vrot.lane.b32.xlu0 %v9_v1, %s65_s0 }
   0xb   :  { %22 = vrot.lane.b32.xlu1 %v21_v2, %s66_s8  ;;  %v15_v3 = vld [vmem:[#allocation0] sm:$0xf]  }
   0xc   :  { %v27_v4 = vld [vmem:[#allocation0] sm:$0xf]  }
   0xd   :  { %v6_v5 = vld [vmem:[#allocation0] sm:$0xf]  }
   0xe   :  { %8 = vst.msk [vmem:[%s118_s1] ss:$8 sm:$0xf] %vm7_vm0, %v6_v5   ;;  %16 = vrot.lane.b32.xlu0 %v15_v3, %s67_s11  ;;  %v33_v6 = vld [vmem:[#allocation0] sm:$0xf]  }
   0xf   :  { %28 = vrot.lane.b32.xlu1 %v27_v4, %s68_s12  ;;  %v39_v7 = vld [vmem:[#allocation0] sm:$0xf]  }
  0x10   :  { %v45_v8 = vld [vmem:[#allocation0] sm:$0xf]  }
  0x12   :  { %34 = vrot.lane.b32.xlu0 %v33_v6, %s69_s13 }
  0x13   :  { %40 = vrot.lane.b32.xlu1 %v39_v7, %s70_s14 }
  0x16   :  { %46 = vrot.lane.b32.xlu0 %v45_v8, %s71_s15 }
  0x7c   :  { %v11_v9 = vpop.permute.xlu0 %10  }
  0x7d   :  { %v23_v10 = vpop.permute.xlu1 %22   ;;  %51 = vst.msk [vmem:[%s118_s1 + $0x1] ss:$8 sm:$0xf] %vm7_vm0, %v11_v9  }
  0x7e   :  { %53 = vst.msk [vmem:[%s118_s1 + $0x3] ss:$8 sm:$0xf] %vm7_vm0, %v23_v10  }
  0x80   :  { %v17_v11 = vpop.permute.xlu0 %16  }
  0x81   :  { %v29_v12 = vpop.permute.xlu1 %28   ;;  %52 = vst.msk [vmem:[%s118_s1 + $0x2] ss:$8 sm:$0xf] %vm7_vm0, %v17_v11  }
  0x82   :  { %54 = vst.msk [vmem:[%s118_s1 + $0x4] ss:$8 sm:$0xf] %vm7_vm0, %v29_v12  }
  0x84   :  { %v35_v13 = vpop.permute.xlu0 %34  }
  0x85   :  { %v41_v14 = vpop.permute.xlu1 %40   ;;  %55 = vst.msk [vmem:[%s118_s1 + $0x5] ss:$8 sm:$0xf] %vm7_vm0, %v35_v13  }
  0x86   :  { %56 = vst.msk [vmem:[%s118_s1 + $0x6] ss:$8 sm:$0xf] %vm7_vm0, %v41_v14  }
  0x88   :  { %v47_v15 = vpop.permute.xlu0 %46  }
  0x89   :  { %57 = vst.msk [vmem:[%s118_s1 + $0x7] ss:$8 sm:$0xf] %vm7_vm0, %v47_v15  }

// kernel: decoder_forward.7
= control target key start
LH: loop header
LB: loop body
LE: loop exit
PB: predicated region body
PF: predicated region fallthrough
CT: control target
= control target key end

     0   :  { %s917_s24 = smov 0   ;;  %s1027_s0 = inlined_call_operand.vmem [shape: bf16[2,16,256], index: 0, kind: input, shape index: {}]   ;;  %s1028_s1 = inlined_call_operand.vmem [shape: bf16[2,16,256], index: 1, kind: input, shape index: {}]   ;;  %s1029_s2 = inlined_call_operand.vmem [shape: bf16[16,288], index: 2, kind: input, shape index: {}]   ;;  %s1030_s3 = inlined_call_operand.vmem [shape: f32[16,1], index: 3, kind: input, shape index: {}]   ;;  %s1031_s4 = inlined_call_operand.vmem [shape: f32[1,222], index: 4, kind: input, shape index: {}]   ;;  %s1032_s5 = inlined_call_operand.vmem [shape: bf16[2,16,224], index: 5, kind: output, shape index: {0}]   ;;  %s1033_s6 = inlined_call_operand.vmem [shape: f32[2,16,1], index: 6, kind: output, shape index: {1}]   ;;  %s1034_s7 = inlined_call_operand.vmem [shape: f32[2,16,1], index: 7, kind: output, shape index: {2}]  }
   0x1 LB: > { %s789_s25 = sadd.s32 4294967295, %s866_s24   ;;  %p793_p0 = scmp.ge.s32.totalorder %s866_s24, 1  ;;  %s866_s24 = sphi %s917_s24, %s18_s24  }
   0x2   : > { %p252_p1 = scmp.lt.s32.totalorder %s866_s24, 3 }
   0x4   : > { %p253_p2 = pnand %p793_p0, %p252_p1 }
   0x5   : > { %p299_p3 = scmp.lt.s32.totalorder (!%p253_p2), %s789_s25, 1  ;;  %s868_s10 = smov (!%p253_p2), 127   ;;  %v858_v4 = vld [vmem:[%s1029_s2 + $0x4] ss:$12 sps:$4 sm:$0xff] (!%p253_p2)   ;;  %v876_v5 = vmov (!%p253_p2), 0   ;;  %vm343_vm0 = vcmask (!%p253_p2), 1039360   ;;  %v596_v62 = vlaneseq (!%p253_p2) }
   0x6   : > { %256 = sbr.rel (%p253_p2) target bundleno = 627 (0x273), region = 40  ;;  %s869_s11 = smov (!%p253_p2), 126   ;;  %536 = vmatprep.mubr.bf16.mxu1 (!%p253_p2), %v858_v4  ;;  %579 = vmatprep.mubr.bf16.mxu0 (!%p253_p2), %v876_v5  ;;  %v474_v12 = vld [vmem:[%s1030_s3 + $0x8] sm:$0xff] (!%p253_p2)  ;;  %vm351_vm1 = vcmask (!%p253_p2), 1031168   ;;  %v473_v13 = vld [vmem:[%s1030_s3] sm:$0xff] (!%p253_p2)  ;;  %vm359_vm2 = vcmask (!%p253_p2), 916480  }
   0x7   : > { %s870_s12 = smov (!%p253_p2), 112   ;;  %s871_s13 = smov (!%p253_p2), 111   ;;  %849 = vset.pattern.permute.xlu1 (!%p253_p2), %v876_v5  ;;  %848 = vset.pattern.permute.xlu0 (!%p253_p2), %v876_v5  ;;  %vm367_vm3 = vcmask (!%p253_p2), 908288   ;;  %vm375_vm4 = vcmask (!%p253_p2), 900096   ;;  %vm383_vm5 = vcmask (!%p253_p2), 785408   ;;  %vm391_vm6 = vcmask (!%p253_p2), 777216  }
   0x8   : > { %s872_s14 = smov (!%p253_p2), 110   ;;  %s873_s15 = smov (!%p253_p2), 96   ;;  %vm399_vm7 = vcmask (!%p253_p2), 769024   ;;  %v856_v53 = vld [vmem:[%s1029_s2] ss:$12 sps:$4 sm:$0xff] (!%p253_p2)   ;;  %vm500_vm8 = vcmask (!%p253_p2), 261120  }
   0x9   : > { %s874_s16 = smov (!%p253_p2), 95   ;;  %s875_s17 = smov (!%p253_p2), 94   ;;  %v859_v57 = vld [vmem:[%s1029_s2 + $0x8] ss:$12 sps:$4 sm:$0xff] (!%p253_p2)   ;;  %v597_v63 = vshrl.u32 (!%p253_p2), %v596_v62, 7  ;;  %vm648_vm9 = vcmask (!%p253_p2), 1043456  }
   0xa   : > { %vm649_vm10 = vcmask (!%p253_p2), 769028   ;;  %vm653_vm12 = vcmask (!%p253_p2), 782064   ;;  %vm619_vm13 = vcmask (!%p253_p2), 7168  }
   0xb   : > { %vm1000_vm11 = vmor (!%p253_p2), %vm649_vm10, %vm648_vm9 }
   0xd   : > { %s1038_s25 = smov (!%p299_p3, %s789_s25), 1 }
   0xe   : > { %s925_s26 = sshll.u32 %s1038_s25, 4 }
   0xf   : > { %s308_s29 = scalar_lea.vmem %s1028_s1, %s925_s26  ;;  %s303_s9 = scalar_lea.vmem %s1027_s0, %s925_s26 }
  0x10   : > { %v935_v0 = vld [vmem:[%s308_s29] ss:$8 sps:$4 sm:$0xff]   ;;  %v938_v2 = vld [vmem:[%s308_s29 + $0x4] ss:$8 sps:$4 sm:$0xff]  }
  0x11   : > { %v852_v1 = vld [vmem:[%s303_s9] ss:$8 sps:$4 sm:$0xff]   ;;  %413 = vrot.lane.b32.xlu0 %v935_v0, %s868_s10  ;;  %v855_v3 = vld [vmem:[%s303_s9 + $0x4] ss:$8 sps:$4 sm:$0xff]  }
  0x12   : > { %339 = vrot.lane.b32.xlu1 %v852_v1, %s868_s10  ;;  %504 = vmatprep.subr.bf16.mxu1 %v855_v3 }
  0x13   : > { %505 = vmatpush1.bf16.msra.mxu1 %v852_v1 }
  0x15   : > { %415 = vrot.lane.b32.xlu0 %v938_v2, %s868_s10 }
  0x16   : > { %341 = vrot.lane.b32.xlu1 %v855_v3, %s868_s10 }
  0x19   : > { %347 = vrot.lane.b32.xlu0 %v852_v1, %s869_s11 }
  0x1a   : > { %349 = vrot.lane.b32.xlu1 %v855_v3, %s869_s11 }
  0x1d   : > { %355 = vrot.lane.b32.xlu0 %v852_v1, %s870_s12 }
  0x1e   : > { %357 = vrot.lane.b32.xlu1 %v855_v3, %s870_s12 }
  0x21   : > { %363 = vrot.lane.b32.xlu0 %v852_v1, %s871_s13 }
  0x22   : > { %365 = vrot.lane.b32.xlu1 %v855_v3, %s871_s13 }
  0x25   : > { %371 = vrot.lane.b32.xlu0 %v852_v1, %s872_s14 }
  0x26   : > { %373 = vrot.lane.b32.xlu1 %v855_v3, %s872_s14 }
  0x29   : > { %379 = vrot.lane.b32.xlu0 %v852_v1, %s873_s15 }
  0x2a   : > { %381 = vrot.lane.b32.xlu1 %v855_v3, %s873_s15 }
  0x2d   : > { %387 = vrot.lane.b32.xlu0 %v852_v1, %s874_s16 }
  0x2e   : > { %389 = vrot.lane.b32.xlu1 %v855_v3, %s874_s16 }
  0x31   : > { %395 = vrot.lane.b32.xlu0 %v852_v1, %s875_s17 }
  0x32   : > { %397 = vrot.lane.b32.xlu1 %v855_v3, %s875_s17  ;;  %v602_v3 = vsub.s32 1, %v597_v63  ;;  %s323_s17 = scalar_lea.vmem %s1034_s7, %s925_s26 }
  0x35   : > { %420 = vrot.lane.b32.xlu0 %v935_v0, %s869_s11 }
  0x36   : > { %422 = vrot.lane.b32.xlu1 %v938_v2, %s869_s11  ;;  %s313_s11 = scalar_lea.vmem %s1032_s5, %s925_s26 }
  0x39   : > { %427 = vrot.lane.b32.xlu0 %v935_v0, %s870_s12 }
  0x3a   : > { %429 = vrot.lane.b32.xlu1 %v938_v2, %s870_s12 }
  0x3d   : > { %434 = vrot.lane.b32.xlu0 %v935_v0, %s871_s13 }
  0x3e   : > { %436 = vrot.lane.b32.xlu1 %v938_v2, %s871_s13 }
  0x41   : > { %441 = vrot.lane.b32.xlu0 %v935_v0, %s872_s14 }
  0x42   : > { %443 = vrot.lane.b32.xlu1 %v938_v2, %s872_s14  ;;  %s318_s14 = scalar_lea.vmem %s1033_s6, %s925_s26 }
  0x45   : > { %455 = vrot.lane.b32.xlu0 %v935_v0, %s874_s16 }
  0x46   : > { %457 = vrot.lane.b32.xlu1 %v938_v2, %s874_s16 }
  0x49   : > { %448 = vrot.lane.b32.xlu0 %v935_v0, %s873_s15 }
  0x4a   : > { %450 = vrot.lane.b32.xlu1 %v938_v2, %s873_s15 }
  0x83   : > { %v414_v6 = vpop.permute.xlu0 %413 }
  0x84   : > { %v340_v7 = vpop.permute.xlu1 %339 }
  0x87   : > { %v416_v8 = vpop.permute.xlu0 %415 }
  0x88   : > { %v342_v9 = vpop.permute.xlu1 %341  ;;  %461 = vrot.lane.b32.xlu1 %v416_v8, %s874_s16  ;;  %v417_v10 = vsel %vm343_vm0, %v414_v6, %v416_v8 }
  0x89   : > { %506 = vmatprep.subr.bf16.mxu1 %v342_v9  ;;  %459 = vrot.lane.b32.xlu0 %v417_v10, %s874_s16  ;;  %v344_v11 = vsel %vm343_vm0, %v340_v7, %v342_v9  ;;  %v594_v7 = vld [vmem:[%s1031_s4] sm:$0x3] }
  0x8a   : > { %507 = vmatpush1.bf16.msra.mxu1 %v344_v11 }
  0x8b   : > { %v348_v14 = vpop.permute.xlu0 %347 }
  0x8c   : > { %v350_v15 = vpop.permute.xlu1 %349  ;;  %482 = vperm.xlu1 %849, %v474_v12  }
  0x8d   : > { %508 = vmatprep.subr.bf16.mxu1 %v350_v15  ;;  %v352_v16 = vsel %vm351_vm1, %v348_v14, %v350_v15  ;;  %477 = vperm.xlu0 %848, %v473_v13   ;;  %v603_v13 = vrot.slane %v594_v7, %v602_v3 }
  0x8e   : > { %509 = vmatpush1.bf16.msra.mxu1 %v352_v16 }
  0x8f   : > { %v356_v17 = vpop.permute.xlu0 %355 }
  0x90   : > { %v358_v18 = vpop.permute.xlu1 %357 }
  0x91   : > { %510 = vmatprep.subr.bf16.mxu1 %v358_v18  ;;  %v360_v19 = vsel %vm359_vm2, %v356_v17, %v358_v18 }
  0x92   : > { %511 = vmatpush1.bf16.msra.mxu1 %v360_v19 }
  0x93   : > { %v364_v20 = vpop.permute.xlu0 %363 }
  0x94   : > { %v366_v21 = vpop.permute.xlu1 %365 }
  0x95   : > { %512 = vmatprep.subr.bf16.mxu1 %v366_v21  ;;  %v368_v22 = vsel %vm367_vm3, %v364_v20, %v366_v21 }
  0x96   : > { %513 = vmatpush1.bf16.msra.mxu1 %v368_v22 }
  0x97   : > { %v372_v23 = vpop.permute.xlu0 %371 }
  0x98   : > { %v374_v24 = vpop.permute.xlu1 %373 }
  0x99   : > { %514 = vmatprep.subr.bf16.mxu1 %v374_v24  ;;  %v376_v25 = vsel %vm375_vm4, %v372_v23, %v374_v24 }
  0x9a   : > { %515 = vmatpush1.bf16.msra.mxu1 %v376_v25 }
  0x9b   : > { %v380_v26 = vpop.permute.xlu0 %379 }
  0x9c   : > { %v382_v27 = vpop.permute.xlu1 %381 }
  0x9d   : > { %516 = vmatprep.subr.bf16.mxu1 %v382_v27  ;;  %v384_v28 = vsel %vm383_vm5, %v380_v26, %v382_v27 }
  0x9e   : > { %517 = vmatpush1.bf16.msra.mxu1 %v384_v28 }
  0x9f   : > { %v388_v29 = vpop.permute.xlu0 %387 }
  0xa0   : > { %v390_v30 = vpop.permute.xlu1 %389 }
  0xa1   : > { %518 = vmatprep.subr.bf16.mxu1 %v390_v30  ;;  %v392_v31 = vsel %vm391_vm6, %v388_v29, %v390_v30 }
  0xa2   : > { %519 = vmatpush1.bf16.msra.mxu1 %v392_v31 }
  0xa3   : > { %v396_v32 = vpop.permute.xlu0 %395 }
  0xa4   : > { %v398_v33 = vpop.permute.xlu1 %397 }
  0xa5   : > { %520 = vmatprep.subr.bf16.mxu1 %v398_v33  ;;  %v400_v34 = vsel %vm399_vm7, %v396_v32, %v398_v33 }
  0xa6   : > { %521 = vmatpush1.bf16.msra.mxu1 %v400_v34 }
  0xa7   : > { %522 = vmatprep.subr.bf16.mxu1 %v938_v2  ;;  %v421_v35 = vpop.permute.xlu0 %420  ;;  %v598_v2 = vsub.s32 0, %v597_v63 }
  0xa8   : > { %v423_v36 = vpop.permute.xlu1 %422 }
  0xa9   : > { %v424_v39 = vsel %vm351_vm1, %v421_v35, %v423_v36  ;;  %v599_v12 = vrot.slane %v594_v7, %v598_v2 }
  0xaa   : > { %523 = vmatpush1.bf16.msra.mxu1 %v935_v0 }
  0xab   : > { %524 = vmatprep.subr.bf16.mxu1 %v416_v8  ;;  %v428_v37 = vpop.permute.xlu0 %427 }
  0xac   : > { %v430_v38 = vpop.permute.xlu1 %429 }
  0xad   : > { %v431_v42 = vsel %vm359_vm2, %v428_v37, %v430_v38 }
  0xae   : > { %525 = vmatpush1.bf16.msra.mxu1 %v417_v10 }
  0xaf   : > { %526 = vmatprep.subr.bf16.mxu1 %v423_v36  ;;  %v435_v40 = vpop.permute.xlu0 %434 }
  0xb0   : > { %v437_v41 = vpop.permute.xlu1 %436 }
  0xb1   : > { %v438_v45 = vsel %vm367_vm3, %v435_v40, %v437_v41 }
  0xb2   : > { %527 = vmatpush1.bf16.msra.mxu1 %v424_v39 }
  0xb3   : > { %528 = vmatprep.subr.bf16.mxu1 %v430_v38  ;;  %v442_v43 = vpop.permute.xlu0 %441 }
  0xb4   : > { %v444_v44 = vpop.permute.xlu1 %443 }
  0xb5   : > { %v445_v49 = vsel %vm375_vm4, %v442_v43, %v444_v44 }
  0xb6   : > { %529 = vmatpush1.bf16.msra.mxu1 %v431_v42 }
  0xb7   : > { %530 = vmatprep.subr.bf16.mxu1 %v437_v41  ;;  %v456_v46 = vpop.permute.xlu0 %455 }
  0xb8   : > { %v458_v47 = vpop.permute.xlu1 %457 }
  0xb9   : > { %547 = vmatprep.subr.bf16.mxu0 %v458_v47  ;;  %v463_v48 = vsel %vm391_vm6, %v456_v46, %v458_v47 }
  0xba   : > { %531 = vmatpush1.bf16.msra.mxu1 %v438_v45  ;;  %548 = vmatpush1.bf16.msra.mxu0 %v463_v48 }
  0xbb   : > { %532 = vmatprep.subr.bf16.mxu1 %v444_v44  ;;  %v449_v50 = vpop.permute.xlu0 %448 }
  0xbc   : > { %v451_v51 = vpop.permute.xlu1 %450 }
  0xbd   : > { %v452_v52 = vsel %vm383_vm5, %v449_v50, %v451_v51 }
  0xbe   : > { %533 = vmatpush1.bf16.msra.mxu1 %v445_v49 }
  0xbf   : > { %534 = vmatprep.subr.bf16.mxu1 %v451_v51 }
  0xc2   : > { %535 = vmatpush1.bf16.msra.mxu1 %v452_v52 }
  0xc5   : > { %537 = vmatmul.mubr.bf16.vlgmr.msra.gmra.mrb[0].mxu1 %v856_v53 }
  0xfa   : > { %v462_v54 = vpop.permute.xlu1 %461 }
  0xfb   : > { %v460_v55 = vpop.permute.xlu0 %459  ;;  %549 = vmatprep.subr.bf16.mxu0 %v462_v54 }
  0xfc   : > { %v464_v56 = vsel %vm391_vm6, %v460_v55, %v462_v54 }
  0xfd   : > { %550 = vmatpush1.bf16.msra.mxu0 %v464_v56 }
 0x100   : > { %811 = vmatmul.mubr.msk.bf16.vlgmr.msra.gmra.mrb[0].mxu0 %vm500_vm8, %v859_v57 }
 0x10b   : > { %v483_v6 = vpop.permute.xlu1 %482 }
 0x10c   : > { %v478_v0 = vpop.permute.xlu0 %477 }
 0x198   : > { %v538_v58 = vpop.f32.mrb[0].mxu1 }
 0x199   : > { %v540_v59 = vpop.f32.mrb[1].mxu1  ;;  %v539_v1 = vadd.f32 %v538_v58, %v478_v0 }
 0x19a   : > { %v542_v60 = vpop.f32.mrb[2].mxu1  ;;  %v541_v4 = vadd.f32 %v540_v59, %v478_v0 }
 0x19b   : > { %v544_v61 = vpop.f32.mrb[3].mxu1  ;;  %v543_v9 = vadd.f32 %v542_v60, %v483_v6 }
 0x19c   : > { %v545_v14 = vadd.f32 %v544_v61, %v483_v6 }
 0x1d3   : > { %v581_v8 = vpop.f32.mrb[0].mxu0 }
 0x1d4   : > { %v582_v10 = vadd.f32 %v581_v8, %v539_v1  ;;  %v583_v11 = vpop.f32.mrb[1].mxu0 }
 0x1d5   : > { %v584_v15 = vadd.f32 %v583_v11, %v541_v4  ;;  %v585_v16 = vpop.f32.mrb[2].mxu0 }
 0x1d6   : > { %v590_v17 = vmax.f32 %v582_v10, 0.0  ;;  %v586_v18 = vadd.f32 %v585_v16, %v543_v9  ;;  %v587_v19 = vpop.f32.mrb[3].mxu0 }
 0x1d7   : > { %v591_v20 = vmax.f32 %v584_v15, 0.0  ;;  %v588_v21 = vadd.f32 %v587_v19, %v545_v14 }
 0x1d8   : > { %v592_v23 = vmax.f32 %v586_v18, 0.0  ;;  %v606_v24 = vmul.f32 %v599_v12, %v590_v17 }
 0x1d9   : > { %v821_v25 = vpack.c.bf16 %v591_v20, %v590_v17  ;;  %v593_v26 = vmax.f32 %v588_v21, 0.0  ;;  %v607_v27 = vmul.f32 %v603_v13, %v591_v20 }
 0x1da   : > { %v608_v28 = vmul.f32 %v599_v12, %v592_v23  ;;  %v622_v34 = vmul.f32 %v606_v24, %v590_v17 }
 0x1db   : > { %651 = vst.msk [vmem:[%s313_s11] sm:$0xff] %vm1000_vm11, %v821_v25  ;;  %v822_v29 = vpack.c.bf16 %v593_v26, %v592_v23  ;;  %v611_v30 = vsel %vm399_vm7, %v607_v27, 0.0  ;;  %v609_v31 = vmul.f32 %v603_v13, %v593_v26  ;;  %v623_v32 = vmul.f32 %v607_v27, %v591_v20 }
 0x1dc   : > { %654 = vst.msk [vmem:[%s313_s11 + $0x4] sm:$0xf] %vm653_vm12, %v876_v5  ;;  %v612_v33 = vadd.f32 %v611_v30, %v606_v24  ;;  %v624_v39 = vmul.f32 %v608_v28, %v592_v23 }
 0x1dd   : > { %652 = vst.msk [vmem:[%s313_s11 + $0x8] sm:$0xff] %vm1000_vm11, %v822_v29  ;;  %v615_v35 = vsel %vm399_vm7, %v609_v31, 0.0  ;;  %v625_v36 = vmul.f32 %v609_v31, %v593_v26  ;;  %v626_v37 = vsel %vm399_vm7, %v623_v32, 0.0 }
 0x1de   : > { %655 = vst.msk [vmem:[%s313_s11 + $0xc] sm:$0xf] %vm653_vm12, %v876_v5  ;;  %613 = vadd.xlane.f32.xlu1 %v612_v33  ;;  %v616_v38 = vadd.f32 %v615_v35, %v608_v28  ;;  %v627_v40 = vadd.f32 %v626_v37, %v622_v34 }
 0x1df   : > { %v630_v41 = vsel %vm399_vm7, %v625_v36, 0.0 }
 0x1e0   : > { %617 = vadd.xlane.f32.xlu0 %v616_v38  ;;  %v631_v42 = vadd.f32 %v630_v41, %v624_v39 }
 0x1e2   : > { %632 = vadd.xlane.f32.xlu1 %v631_v42 }
 0x1e4   : > { %628 = vadd.xlane.f32.xlu0 %v627_v40 }
 0x26b   : > { %v614_v43 = vpop.xlane.xlu1 %613 }
 0x26c   : > { %620 = vst.msk [vmem:[%s318_s14] sm:$0xff] %vm619_vm13, %v614_v43 }
 0x26d   : > { %v618_v44 = vpop.xlane.xlu0 %617 }
 0x26e   : > { %621 = vst.msk [vmem:[%s318_s14 + $0x8] sm:$0xff] %vm619_vm13, %v618_v44 }
 0x26f   : > { %v633_v5 = vpop.xlane.xlu1 %632 }
 0x270   : > { %635 = vst.msk [vmem:[%s323_s17 + $0x8] sm:$0xff] %vm619_vm13, %v633_v5 }
 0x271   : > { %v629_v45 = vpop.xlane.xlu0 %628 }
 0x272   : > { %634 = vst.msk [vmem:[%s323_s17] sm:$0xff] %vm619_vm13, %v629_v45 }
 0x273 PF: > { %s18_s24 = sadd.s32 1, %s866_s24  }
 0x274   : > { %p15_p4 = scmp.ge.s32.totalorder %s18_s24, 4  }
 0x276   :  { %17 = sbr.rel (!%p15_p4) target bundleno = 1 (0x1), region = 97 }

// kernel: decoder_forward.9
= control target key start
LH: loop header
LB: loop body
LE: loop exit
PB: predicated region body
PF: predicated region fallthrough
CT: control target
= control target key end

     0   :  { %s442_s12 = smov 0   ;;  %s481_s0 = inlined_call_operand.vmem [shape: bf16[2,16,144], index: 0, kind: input, shape index: {}]   ;;  %s482_s1 = inlined_call_operand.vmem [shape: bf16[32,16], index: 1, kind: input, shape index: {}]   ;;  %s483_s2 = inlined_call_operand.vmem [shape: f32[32,1], index: 2, kind: input, shape index: {}]   ;;  %s484_s3 = inlined_call_operand.vmem [shape: bf16[2,32,144], index: 3, kind: output, shape index: {}]  }
   0x1 LB: > { %s368_s13 = sadd.s32 4294967295, %s419_s12   ;;  %p372_p0 = scmp.ge.s32.totalorder %s419_s12, 1  ;;  %s419_s12 = sphi %s442_s12, %s13_s12  }
   0x2   : > { %p137_p1 = scmp.lt.s32.totalorder %s419_s12, 3 }
   0x4   : > { %p138_p2 = pnand %p372_p0, %p137_p1 }
   0x5   : > { %p161_p3 = scmp.lt.s32.totalorder (!%p138_p2), %s368_s13, 1  ;;  %v421_v0 = vmov (!%p138_p2), 0   ;;  %v180_v1 = vld [vmem:[%s483_s2 + $0x10] sm:$0xff] (!%p138_p2)  ;;  %v178_v2 = vld [vmem:[%s483_s2] sm:$0xff] (!%p138_p2)  ;;  %v181_v3 = vld [vmem:[%s483_s2 + $0x18] sm:$0xff] (!%p138_p2)  ;;  %vm222_vm0 = vcmask (!%p138_p2), 130048  }
   0x6   : > { %141 = sbr.rel (%p138_p2) target bundleno = 241 (0xf1), region = 32  ;;  %261 = vmatprep.mubr.bf16.mxu0 (!%p138_p2), %v421_v0  ;;  %271 = vmatprep.mubr.bf16.mxu1 (!%p138_p2), %v421_v0  ;;  %v179_v4 = vld [vmem:[%s483_s2 + $0x8] sm:$0xff] (!%p138_p2)  ;;  %v411_v7 = vld [vmem:[%s482_s1] sm:$0xff] (!%p138_p2)   ;;  %vm306_vm1 = vcmask (!%p138_p2), 1043456   ;;  %vm307_vm2 = vcmask (!%p138_p2), 130052  }
   0x7   : > { %407 = vset.pattern.permute.xlu1 (!%p138_p2), %v421_v0  ;;  %406 = vset.pattern.permute.xlu0 (!%p138_p2), %v421_v0  ;;  %v412_v8 = vld [vmem:[%s482_s1 + $0x8] sm:$0xff] (!%p138_p2)   ;;  %vm308_vm3 = vmor (!%p138_p2), %vm307_vm2, %vm306_vm1 }
   0x8   : > { %194 = vperm.xlu1 (!%p138_p2), %407, %v180_v1   ;;  %184 = vperm.xlu0 (!%p138_p2), %406, %v178_v2  }
   0xc   : > { %199 = vperm.xlu1 (!%p138_p2), %407, %v181_v3   ;;  %189 = vperm.xlu0 (!%p138_p2), %406, %v179_v4  }
   0xd   : > { %s486_s13 = smov (!%p161_p3, %s368_s13), 1 }
   0xe   : > { %s389_s18 = sshll.u32 %s486_s13, 4  ;;  %s390_s30 = sshll.u32 %s486_s13, 5 }
   0xf   : > { %s165_s25 = scalar_lea.vmem %s481_s0, %s389_s18  ;;  %s170_s6 = scalar_lea.vmem %s484_s3, %s390_s30 }
  0x10   : > { %v408_v5 = vld [vmem:[%s165_s25 + $0x4] ss:$8 sps:$4 sm:$0xff]   ;;  %v410_v6 = vld [vmem:[%s165_s25] ss:$8 sps:$4 sm:$0xff]  }
  0x11   : > { %229 = vmatprep.subr.bf16.mxu0 %v408_v5  ;;  %395 = vmatprep.subr.bf16.mxu1 %v408_v5 }
  0x12   : > { %230 = vmatpush1.bf16.msra.mxu0 %v410_v6  ;;  %396 = vmatpush1.bf16.msra.mxu1 %v410_v6 }
  0x15   : > { %381 = vmatmul.mubr.msk.bf16.vlgmr.msra.gmra.mrb[0].mxu0 %vm222_vm0, %v411_v7  ;;  %382 = vmatmul.mubr.msk.bf16.vlgmr.msra.gmra.mrb[0].mxu1 %vm222_vm0, %v412_v8 }
  0x87   : > { %v195_v9 = vpop.permute.xlu1 %194  ;;  %v185_v10 = vpop.permute.xlu0 %184 }
  0x8b   : > { %v200_v11 = vpop.permute.xlu1 %199  ;;  %v190_v12 = vpop.permute.xlu0 %189 }
  0xe8   : > { %v263_v13 = vpop.f32.mrb[0].mxu0  ;;  %v273_v14 = vpop.f32.mrb[0].mxu1 }
  0xe9   : > { %v264_v15 = vadd.f32 %v263_v13, %v185_v10  ;;  %v274_v16 = vadd.f32 %v273_v14, %v195_v9  ;;  %v265_v17 = vpop.f32.mrb[1].mxu0  ;;  %v275_v18 = vpop.f32.mrb[1].mxu1 }
  0xea   : > { %v266_v19 = vadd.f32 %v265_v17, %v185_v10  ;;  %v276_v20 = vadd.f32 %v275_v18, %v195_v9  ;;  %v267_v21 = vpop.f32.mrb[2].mxu0  ;;  %v277_v22 = vpop.f32.mrb[2].mxu1 }
  0xeb   : > { %v268_v23 = vadd.f32 %v267_v21, %v190_v12  ;;  %v278_v24 = vadd.f32 %v277_v22, %v200_v11  ;;  %v269_v25 = vpop.f32.mrb[3].mxu0  ;;  %v279_v26 = vpop.f32.mrb[3].mxu1 }
  0xec   : > { %v391_v27 = vpack.c.bf16 %v266_v19, %v264_v15  ;;  %v393_v28 = vpack.c.bf16 %v276_v20, %v274_v16  ;;  %v270_v29 = vadd.f32 %v269_v25, %v190_v12  ;;  %v280_v30 = vadd.f32 %v279_v26, %v200_v11 }
  0xee   : > { %309 = vst.msk [vmem:[%s170_s6] sm:$0xff] %vm308_vm3, %v391_v27  ;;  %311 = vst.msk [vmem:[%s170_s6 + $0x10] sm:$0xff] %vm308_vm3, %v393_v28  ;;  %v392_v31 = vpack.c.bf16 %v270_v29, %v268_v23  ;;  %v394_v32 = vpack.c.bf16 %v280_v30, %v278_v24 }
  0xf0   : > { %310 = vst.msk [vmem:[%s170_s6 + $0x8] sm:$0xff] %vm308_vm3, %v392_v31  ;;  %312 = vst.msk [vmem:[%s170_s6 + $0x18] sm:$0xff] %vm308_vm3, %v394_v32 }
  0xf1 PF: > { %s13_s12 = sadd.s32 1, %s419_s12  }
  0xf2   : > { %p10_p4 = scmp.ge.s32.totalorder %s13_s12, 4  }
  0xf4   :  { %12 = sbr.rel (!%p10_p4) target bundleno = 1 (0x1), region = 62 }

// kernel: decoder_forward.8
= control target key start
LH: loop header
LB: loop body
LE: loop exit
PB: predicated region body
PF: predicated region fallthrough
CT: control target
= control target key end

     0   :  { %s602_s12 = smov 0   ;;  %s672_s0 = inlined_call_operand.vmem [shape: bf16[2,16,224], index: 0, kind: input, shape index: {}]   ;;  %s673_s1 = inlined_call_operand.vmem [shape: bf16[16,144], index: 1, kind: input, shape index: {}]   ;;  %s674_s2 = inlined_call_operand.vmem [shape: f32[16,1], index: 2, kind: input, shape index: {}]   ;;  %s675_s3 = inlined_call_operand.vmem [shape: bf16[2,16,144], index: 3, kind: output, shape index: {}]  }
   0x1 LB: > { %s496_s13 = sadd.s32 4294967295, %s562_s12   ;;  %p500_p0 = scmp.ge.s32.totalorder %s562_s12, 1  ;;  %s562_s12 = sphi %s602_s12, %s13_s12  }
   0x2   : > { %p137_p1 = scmp.lt.s32.totalorder %s562_s12, 3 }
   0x4   : > { %p138_p2 = pnand %p500_p0, %p137_p1 }
   0x5   : > { %p161_p3 = scmp.lt.s32.totalorder (!%p138_p2), %s496_s13, 1  ;;  %s564_s18 = smov (!%p138_p2), 126   ;;  %v555_v2 = vld [vmem:[%s673_s1 + $0x4] ss:$8 sps:$4 sm:$0xff] (!%p138_p2)   ;;  %vm271_vm0 = vcmask (!%p138_p2), 130048   ;;  %v571_v3 = vmov (!%p138_p2), 0  }
   0x6   : > { %141 = sbr.rel (%p138_p2) target bundleno = 542 (0x21e), region = 32  ;;  %s565_s19 = smov (!%p138_p2), 127   ;;  %509 = vmatprep.mubr.msk.bf16.mxu0 (!%p138_p2), %vm271_vm0, %v555_v2  ;;  %548 = vset.pattern.permute.xlu0 (!%p138_p2), %v571_v3  ;;  %v250_v4 = vld [vmem:[%s674_s2] sm:$0xff] (!%p138_p2)  ;;  %v251_v5 = vld [vmem:[%s674_s2 + $0x8] sm:$0xff] (!%p138_p2)  ;;  %vm188_vm1 = vcmask (!%p138_p2), 1039360   ;;  %vm196_vm2 = vcmask (!%p138_p2), 1031168  }
   0x7   : > { %s566_s20 = smov (!%p138_p2), 112   ;;  %s567_s21 = smov (!%p138_p2), 111   ;;  %549 = vset.pattern.permute.xlu1 (!%p138_p2), %v571_v3  ;;  %vm204_vm3 = vcmask (!%p138_p2), 916480   ;;  %vm212_vm4 = vcmask (!%p138_p2), 908288   ;;  %vm220_vm5 = vcmask (!%p138_p2), 900096   ;;  %vm228_vm6 = vcmask (!%p138_p2), 785408  }
   0x8   : > { %s568_s22 = smov (!%p138_p2), 110   ;;  %s569_s23 = smov (!%p138_p2), 96   ;;  %vm236_vm7 = vcmask (!%p138_p2), 777216   ;;  %vm244_vm8 = vcmask (!%p138_p2), 769024   ;;  %v553_v30 = vld [vmem:[%s673_s1] ss:$8 sps:$4 sm:$0xff] (!%p138_p2)  }
   0x9   : > { %s570_s26 = smov (!%p138_p2), 95   ;;  %s572_s27 = smov (!%p138_p2), 94   ;;  %vm326_vm9 = vcmask (!%p138_p2), 93184   ;;  %vm335_vm10 = vcmask (!%p138_p2), 191584   ;;  %vm344_vm11 = vcmask (!%p138_p2), 289984   ;;  %vm353_vm12 = vcmask (!%p138_p2), 388384  }
   0xa   : > { %s573_s10 = smov (!%p138_p2), 124   ;;  %s574_s11 = smov (!%p138_p2), 120   ;;  %vm362_vm13 = vcmask (!%p138_p2), 486784   ;;  %vm371_vm14 = vcmask (!%p138_p2), 585184   ;;  %vm380_vm15 = vcmask (!%p138_p2), 683584   ;;  %vm389_vm0 = vcmask (!%p138_p2), 781984  }
   0xb   : > { %s577_s15 = smov (!%p138_p2), 104   ;;  %s578_s16 = smov (!%p138_p2), 100  }
   0xd   : > { %s677_s13 = smov (!%p161_p3, %s496_s13), 1 }
   0xe   : > { %s516_s14 = sshll.u32 %s677_s13, 4  ;;  %s575_s13 = smov 116  }
   0xf   : > { %s165_s17 = scalar_lea.vmem %s672_s0, %s516_s14  ;;  %s639_s9 = scalar_lea.vmem %s675_s3, %s516_s14 }
  0x10   : > { %v550_v0 = vld [vmem:[%s165_s17] ss:$8 sps:$4 sm:$0xff]   ;;  %v552_v1 = vld [vmem:[%s165_s17 + $0x4] ss:$8 sps:$4 sm:$0xff]   ;;  %s576_s14 = smov 108   ;;  %s579_s17 = smov 88  }
  0x11   : > { %192 = vrot.lane.b32.xlu1 %v550_v0, %s564_s18  ;;  %184 = vrot.lane.b32.xlu0 %v550_v0, %s565_s19 }
  0x12   : > { %275 = vmatprep.subr.bf16.mxu0 %v552_v1 }
  0x13   : > { %276 = vmatpush1.bf16.msra.mxu0 %v550_v0 }
  0x15   : > { %194 = vrot.lane.b32.xlu1 %v552_v1, %s564_s18  ;;  %186 = vrot.lane.b32.xlu0 %v552_v1, %s565_s19  ;;  %s580_s18 = smov 92   ;;  %s581_s19 = smov 84  }
  0x19   : > { %202 = vrot.lane.b32.xlu1 %v552_v1, %s566_s20  ;;  %200 = vrot.lane.b32.xlu0 %v550_v0, %s566_s20 }
  0x1d   : > { %210 = vrot.lane.b32.xlu1 %v552_v1, %s567_s21  ;;  %208 = vrot.lane.b32.xlu0 %v550_v0, %s567_s21 }
  0x21   : > { %218 = vrot.lane.b32.xlu1 %v552_v1, %s568_s22  ;;  %216 = vrot.lane.b32.xlu0 %v550_v0, %s568_s22 }
  0x25   : > { %226 = vrot.lane.b32.xlu1 %v552_v1, %s569_s23  ;;  %224 = vrot.lane.b32.xlu0 %v550_v0, %s569_s23 }
  0x29   : > { %234 = vrot.lane.b32.xlu1 %v552_v1, %s570_s26  ;;  %232 = vrot.lane.b32.xlu0 %v550_v0, %s570_s26 }
  0x2d   : > { %242 = vrot.lane.b32.xlu1 %v552_v1, %s572_s27  ;;  %240 = vrot.lane.b32.xlu0 %v550_v0, %s572_s27 }
  0x31   : > { %254 = vperm.xlu0 %548, %v250_v4   ;;  %259 = vperm.xlu1 %549, %v251_v5  }
  0x83   : > { %v193_v6 = vpop.permute.xlu1 %192  ;;  %v185_v7 = vpop.permute.xlu0 %184 }
  0x87   : > { %v195_v8 = vpop.permute.xlu1 %194  ;;  %v187_v9 = vpop.permute.xlu0 %186 }
  0x88   : > { %277 = vmatprep.subr.bf16.mxu0 %v187_v9  ;;  %v189_v10 = vsel %vm188_vm1, %v185_v7, %v187_v9  ;;  %v197_v13 = vsel %vm196_vm2, %v193_v6, %v195_v8  ;;  %vm404_vm1 = vcmask 880384   ;;  %vm427_vm2 = vcmask 1044416  }
  0x89   : > { %278 = vmatpush1.bf16.msra.mxu0 %v189_v10 }
  0x8a   : > { %279 = vmatprep.subr.bf16.mxu0 %v195_v8 }
  0x8b   : > { %v203_v11 = vpop.permute.xlu1 %202  ;;  %v201_v12 = vpop.permute.xlu0 %200 }
  0x8c   : > { %v205_v14 = vsel %vm204_vm3, %v201_v12, %v203_v11  ;;  %vm428_vm3 = vcmask 31748  }
  0x8d   : > { %280 = vmatpush1.bf16.msra.mxu0 %v197_v13 }
  0x8e   : > { %281 = vmatprep.subr.bf16.mxu0 %v203_v11 }
  0x8f   : > { %v211_v15 = vpop.permute.xlu1 %210  ;;  %v209_v16 = vpop.permute.xlu0 %208 }
  0x90   : > { %v213_v17 = vsel %vm212_vm4, %v209_v16, %v211_v15  ;;  %vm422_vm4 = vcmask 719872  }
  0x91   : > { %282 = vmatpush1.bf16.msra.mxu0 %v205_v14 }
  0x92   : > { %283 = vmatprep.subr.bf16.mxu0 %v211_v15 }
  0x93   : > { %v219_v18 = vpop.permute.xlu1 %218  ;;  %v217_v19 = vpop.permute.xlu0 %216 }
  0x94   : > { %v221_v20 = vsel %vm220_vm5, %v217_v19, %v219_v18  ;;  %vm413_vm5 = vcmask 978784  }
  0x95   : > { %284 = vmatpush1.bf16.msra.mxu0 %v213_v17 }
  0x96   : > { %285 = vmatprep.subr.bf16.mxu0 %v219_v18 }
  0x97   : > { %v227_v21 = vpop.permute.xlu1 %226  ;;  %v225_v22 = vpop.permute.xlu0 %224 }
  0x98   : > { %v229_v23 = vsel %vm228_vm6, %v225_v22, %v227_v21  ;;  %vm429_vm6 = vmor %vm428_vm3, %vm427_vm2 }
  0x99   : > { %286 = vmatpush1.bf16.msra.mxu0 %v221_v20 }
  0x9a   : > { %287 = vmatprep.subr.bf16.mxu0 %v227_v21 }
  0x9b   : > { %v235_v24 = vpop.permute.xlu1 %234  ;;  %v233_v25 = vpop.permute.xlu0 %232 }
  0x9c   : > { %v237_v26 = vsel %vm236_vm7, %v233_v25, %v235_v24  ;;  %vm438_vm7 = vcmask 125984  }
  0x9d   : > { %288 = vmatpush1.bf16.msra.mxu0 %v229_v23 }
  0x9e   : > { %289 = vmatprep.subr.bf16.mxu0 %v235_v24 }
  0x9f   : > { %v243_v27 = vpop.permute.xlu1 %242  ;;  %v241_v28 = vpop.permute.xlu0 %240 }
  0xa0   : > { %v245_v29 = vsel %vm244_vm8, %v241_v28, %v243_v27 }
  0xa1   : > { %290 = vmatpush1.bf16.msra.mxu0 %v237_v26 }
  0xa2   : > { %291 = vmatprep.subr.bf16.mxu0 %v243_v27 }
  0xa5   : > { %292 = vmatpush1.bf16.msra.mxu0 %v245_v29 }
  0xa8   : > { %308 = vmatmul.mubr.bf16.vlgmr.msra.gmra.mrb[0].mxu0 %v553_v30 }
  0xb0   : > { %v255_v31 = vpop.permute.xlu0 %254  ;;  %v260_v33 = vpop.permute.xlu1 %259 }
 0x17b   : > { %v309_v32 = vpop.f32.mrb[0].mxu0 }
 0x17c   : > { %v310_v34 = vadd.f32 %v309_v32, %v255_v31  ;;  %v311_v35 = vpop.f32.mrb[1].mxu0 }
 0x17d   : > { %v313_v36 = vpop.f32.mrb[2].mxu0  ;;  %v312_v41 = vadd.f32 %v311_v35, %v255_v31 }
 0x17e   : > { %v518_v37 = vpack.c.bf16 %v310_v34, %v310_v34  ;;  %v314_v38 = vadd.f32 %v313_v36, %v260_v33  ;;  %v315_v39 = vpop.f32.mrb[3].mxu0 }
 0x17f   : > { %v316_v42 = vadd.f32 %v315_v39, %v260_v33  ;;  %v520_v43 = vpack.c.bf16 %v312_v41, %v312_v41 }
 0x180   : > { %v519_v40 = vpack.c.bf16 %v314_v38, %v314_v38  ;;  %329 = vrot.lane.b32.xlu1 %v518_v37, %s573_s10  ;;  %327 = vst.msk [vmem:[%s639_s9] sm:$0xf] %vm326_vm9, %v518_v37 }
 0x181   : > { %v521_v44 = vpack.c.bf16 %v316_v42, %v316_v42 }
 0x182   : > { %331 = vrot.lane.b32.xlu0 %v519_v40, %s573_s10  ;;  %328 = vst.msk [vmem:[%s639_s9 + $0x8] sm:$0xf] %vm326_vm9, %v519_v40 }
 0x184   : > { %338 = vrot.lane.b32.xlu1 %v518_v37, %s574_s11 }
 0x186   : > { %340 = vrot.lane.b32.xlu0 %v519_v40, %s574_s11 }
 0x188   : > { %347 = vrot.lane.b32.xlu1 %v518_v37, %s575_s13 }
 0x18a   : > { %349 = vrot.lane.b32.xlu0 %v519_v40, %s575_s13 }
 0x18c   : > { %356 = vrot.lane.b32.xlu1 %v518_v37, %s566_s20 }
 0x18e   : > { %358 = vrot.lane.b32.xlu0 %v519_v40, %s566_s20 }
 0x190   : > { %365 = vrot.lane.b32.xlu1 %v518_v37, %s576_s14 }
 0x192   : > { %367 = vrot.lane.b32.xlu0 %v519_v40, %s576_s14 }
 0x194   : > { %374 = vrot.lane.b32.xlu1 %v518_v37, %s577_s15 }
 0x196   : > { %376 = vrot.lane.b32.xlu0 %v519_v40, %s577_s15 }
 0x198   : > { %383 = vrot.lane.b32.xlu1 %v518_v37, %s578_s16 }
 0x19a   : > { %385 = vrot.lane.b32.xlu0 %v519_v40, %s578_s16 }
 0x19c   : > { %416 = vrot.lane.b32.xlu1 %v520_v43, %s579_s17 }
 0x19e   : > { %418 = vrot.lane.b32.xlu0 %v521_v44, %s579_s17 }
 0x1a0   : > { %398 = vrot.lane.b32.xlu1 %v520_v43, %s569_s23 }
 0x1a2   : > { %400 = vrot.lane.b32.xlu0 %v521_v44, %s569_s23 }
 0x1a4   : > { %407 = vrot.lane.b32.xlu1 %v520_v43, %s580_s18 }
 0x1a6   : > { %409 = vrot.lane.b32.xlu0 %v521_v44, %s580_s18 }
 0x1a8   : > { %432 = vrot.lane.b32.xlu1 %v520_v43, %s581_s19 }
 0x1aa   : > { %434 = vrot.lane.b32.xlu0 %v521_v44, %s581_s19 }
 0x1f2   : > { %v330_v45 = vpop.permute.xlu1 %329 }
 0x1f3   : > { %336 = vst.msk [vmem:[%s639_s9] sm:$0xf] %vm335_vm10, %v330_v45 }
 0x1f4   : > { %v332_v46 = vpop.permute.xlu0 %331 }
 0x1f5   : > { %337 = vst.msk [vmem:[%s639_s9 + $0x8] sm:$0xf] %vm335_vm10, %v332_v46 }
 0x1f6   : > { %v339_v47 = vpop.permute.xlu1 %338 }
 0x1f7   : > { %345 = vst.msk [vmem:[%s639_s9] sm:$0xf] %vm344_vm11, %v339_v47 }
 0x1f8   : > { %v341_v48 = vpop.permute.xlu0 %340 }
 0x1f9   : > { %346 = vst.msk [vmem:[%s639_s9 + $0x8] sm:$0xf] %vm344_vm11, %v341_v48 }
 0x1fa   : > { %v348_v49 = vpop.permute.xlu1 %347 }
 0x1fb   : > { %354 = vst.msk [vmem:[%s639_s9] sm:$0xf] %vm353_vm12, %v348_v49 }
 0x1fc   : > { %v350_v50 = vpop.permute.xlu0 %349 }
 0x1fd   : > { %355 = vst.msk [vmem:[%s639_s9 + $0x8] sm:$0xf] %vm353_vm12, %v350_v50 }
 0x1fe   : > { %v357_v51 = vpop.permute.xlu1 %356 }
 0x1ff   : > { %363 = vst.msk [vmem:[%s639_s9] sm:$0xf] %vm362_vm13, %v357_v51 }
 0x200   : > { %v359_v52 = vpop.permute.xlu0 %358 }
 0x201   : > { %364 = vst.msk [vmem:[%s639_s9 + $0x8] sm:$0xf] %vm362_vm13, %v359_v52 }
 0x202   : > { %v366_v53 = vpop.permute.xlu1 %365 }
 0x203   : > { %372 = vst.msk [vmem:[%s639_s9] sm:$0xf] %vm371_vm14, %v366_v53 }
 0x204   : > { %v368_v54 = vpop.permute.xlu0 %367 }
 0x205   : > { %373 = vst.msk [vmem:[%s639_s9 + $0x8] sm:$0xf] %vm371_vm14, %v368_v54 }
 0x206   : > { %v375_v55 = vpop.permute.xlu1 %374 }
 0x207   : > { %381 = vst.msk [vmem:[%s639_s9] sm:$0xf] %vm380_vm15, %v375_v55 }
 0x208   : > { %v377_v56 = vpop.permute.xlu0 %376 }
 0x209   : > { %382 = vst.msk [vmem:[%s639_s9 + $0x8] sm:$0xf] %vm380_vm15, %v377_v56 }
 0x20a   : > { %v384_v57 = vpop.permute.xlu1 %383 }
 0x20b   : > { %390 = vst.msk [vmem:[%s639_s9] sm:$0xf] %vm389_vm0, %v384_v57 }
 0x20c   : > { %v386_v58 = vpop.permute.xlu0 %385 }
 0x20d   : > { %391 = vst.msk [vmem:[%s639_s9 + $0x8] sm:$0xf] %vm389_vm0, %v386_v58 }
 0x20e   : > { %v417_v59 = vpop.permute.xlu1 %416 }
 0x20f   : > { %v420_v62 = vrot.slane %v417_v59, 4 }
 0x210   : > { %v419_v60 = vpop.permute.xlu0 %418 }
 0x211   : > { %v421_v0 = vrot.slane %v419_v60, 4  ;;  %v423_v2 = vsel %vm422_vm4, %v420_v62, %v417_v59 }
 0x212   : > { %v399_v61 = vpop.permute.xlu1 %398 }
 0x213   : > { %405 = vst.msk [vmem:[%s639_s9] sm:$0xf] %vm404_vm1, %v399_v61  ;;  %v424_v4 = vsel %vm422_vm4, %v421_v0, %v419_v60 }
 0x214   : > { %v401_v63 = vpop.permute.xlu0 %400 }
 0x215   : > { %406 = vst.msk [vmem:[%s639_s9 + $0x8] sm:$0xf] %vm404_vm1, %v401_v63 }
 0x216   : > { %v408_v1 = vpop.permute.xlu1 %407 }
 0x217   : > { %414 = vst.msk [vmem:[%s639_s9] sm:$0xf] %vm413_vm5, %v408_v1 }
 0x218   : > { %v410_v3 = vpop.permute.xlu0 %409  ;;  %430 = vst.msk [vmem:[%s639_s9] sm:$0xff] %vm429_vm6, %v423_v2 }
 0x219   : > { %415 = vst.msk [vmem:[%s639_s9 + $0x8] sm:$0xf] %vm413_vm5, %v410_v3 }
 0x21a   : > { %v433_v5 = vpop.permute.xlu1 %432  ;;  %431 = vst.msk [vmem:[%s639_s9 + $0x8] sm:$0xff] %vm429_vm6, %v424_v4 }
 0x21b   : > { %439 = vst.msk [vmem:[%s639_s9 + $0x4] sm:$0xf] %vm438_vm7, %v433_v5 }
 0x21c   : > { %v435_v6 = vpop.permute.xlu0 %434 }
 0x21d   : > { %440 = vst.msk [vmem:[%s639_s9 + $0xc] sm:$0xf] %vm438_vm7, %v435_v6 }
 0x21e PF: > { %s13_s12 = sadd.s32 1, %s562_s12  }
 0x21f   : > { %p10_p4 = scmp.ge.s32.totalorder %s13_s12, 4  }
 0x221   :  { %12 = sbr.rel (!%p10_p4) target bundleno = 1 (0x1), region = 62 }

// kernel: tile.38
= control target key start
LH: loop header
LB: loop body
LE: loop exit
PB: predicated region body
PF: predicated region fallthrough
CT: control target
= control target key end

     0   :  { %s28_s0 = inlined_call_operand.vmem [shape: f32[8], index: 0, kind: input, shape index: {}]   ;;  %s29_s1 = inlined_call_operand.vmem [shape: f32[9,8], index: 1, kind: output, shape index: {}]  }
   0x1   :  { %v4_v0 = vld [vmem:[%s28_s0] ss:$0 sm:$0xff] }
   0x2   :  { %5 = vst [vmem:[%s29_s1] sm:$0xff] %v4_v0  ;;  %8 = vst [vmem:[%s29_s1 + $0x8] sm:$0xff] %v4_v0 }

// kernel: mul.25
= control target key start
LH: loop header
LB: loop body
LE: loop exit
PB: predicated region body
PF: predicated region fallthrough
CT: control target
= control target key end

     0   :  { %s75_s10 = smov 64   ;;  %s76_s11 = smov 48   ;;  %vm3_vm0 = vcmask 64512   ;;  %vm9_vm1 = vcmask 589312   ;;  %vm15_vm2 = vcmask 523712   ;;  %vm21_vm3 = vcmask 458112   ;;  %s123_s0 = inlined_call_operand.vmem [shape: f32[9,8], index: 0, kind: input, shape index: {}]   ;;  %s124_s1 = inlined_call_operand.vmem [shape: f32[72], index: 1, kind: output, shape index: {}]  }
   0x1   :  { %v59_v0 = vld [vmem:[%s123_s0 + $0x8] sm:$0x1]   ;;  %v61_v1 = vld [vmem:[%s123_s0 + $0x6] sm:$0x1]   ;;  %v60_v2 = vld [vmem:[%s123_s0 + $0x7] sm:$0x1]  }
   0x2   :  { %7 = vrot.lane.b32.xlu0 %v59_v0, %s75_s10  ;;  %19 = vrot.lane.b32.xlu1 %v61_v1, %s76_s11  ;;  %v62_v3 = vld [vmem:[%s123_s0 + $0x5] sm:$0x1]   ;;  %v2_v4 = vld [vmem:[%s123_s0] sm:$0x1]   ;;  %s77_s18 = smov 56   ;;  %s78_s19 = smov 40  }
   0x3   :  { %4 = vst.msk [vmem:[#allocation0] sm:$0x1] %vm3_vm0, %v2_v4   ;;  %v63_v5 = vld [vmem:[%s123_s0 + $0x4] sm:$0x1]   ;;  %v64_v6 = vld [vmem:[%s123_s0 + $0x3] sm:$0x1]  }
   0x4   :  { %s79_s24 = smov 32   ;;  %s80_s25 = smov 24   ;;  %v65_v7 = vld [vmem:[%s123_s0 + $0x2] sm:$0x1]   ;;  %v66_v8 = vld [vmem:[%s123_s0 + $0x1] sm:$0x1]  }
   0x5   :  { %s81_s0 = smov 16   ;;  %s82_s30 = smov 8   ;;  %vm27_vm4 = vcmask 392512   ;;  %vm33_vm5 = vcmask 326912   ;;  %vm39_vm6 = vcmask 261312   ;;  %vm45_vm7 = vcmask 195712  }
   0x6   :  { %13 = vrot.lane.b32.xlu0 %v60_v2, %s77_s18  ;;  %25 = vrot.lane.b32.xlu1 %v62_v3, %s78_s19  ;;  %vm51_vm8 = vcmask 130112  }
   0xa   :  { %31 = vrot.lane.b32.xlu0 %v63_v5, %s79_s24  ;;  %37 = vrot.lane.b32.xlu1 %v64_v6, %s80_s25 }
   0xe   :  { %43 = vrot.lane.b32.xlu0 %v65_v7, %s81_s0  ;;  %49 = vrot.lane.b32.xlu1 %v66_v8, %s82_s30 }
  0x74   :  { %v8_v9 = vpop.permute.xlu0 %7   ;;  %v20_v10 = vpop.permute.xlu1 %19  }
  0x75   :  { %10 = vst.msk [vmem:[#allocation0] sm:$0x1] %vm9_vm1, %v8_v9  }
  0x78   :  { %v14_v11 = vpop.permute.xlu0 %13   ;;  %v26_v12 = vpop.permute.xlu1 %25  }
  0x79   :  { %16 = vst.msk [vmem:[#allocation0] sm:$0x1] %vm15_vm2, %v14_v11  }
  0x7a   :  { %22 = vst.msk [vmem:[#allocation0] sm:$0x1] %vm21_vm3, %v20_v10  }
  0x7b   :  { %28 = vst.msk [vmem:[#allocation0] sm:$0x1] %vm27_vm4, %v26_v12  }
  0x7c   :  { %v32_v13 = vpop.permute.xlu0 %31   ;;  %v38_v14 = vpop.permute.xlu1 %37  }
  0x7d   :  { %34 = vst.msk [vmem:[#allocation0] sm:$0x1] %vm33_vm5, %v32_v13  }
  0x7e   :  { %40 = vst.msk [vmem:[#allocation0] sm:$0x1] %vm39_vm6, %v38_v14  }
  0x80   :  { %v44_v15 = vpop.permute.xlu0 %43   ;;  %v50_v16 = vpop.permute.xlu1 %49  }
  0x81   :  { %46 = vst.msk [vmem:[#allocation0] sm:$0x1] %vm45_vm7, %v44_v15  }
  0x82   :  { %52 = vst.msk [vmem:[#allocation0] sm:$0x1] %vm51_vm8, %v50_v16  }
  0x89   :  { %v56_v17 = vld [vmem:[#allocation0] sm:$0x1] }
  0x8a   :  { %58 = vst [vmem:[%s124_s1] sm:$0x1] %v56_v17 }

// kernel: decoder_forward.10
= control target key start
LH: loop header
LB: loop body
LE: loop exit
PB: predicated region body
PF: predicated region fallthrough
CT: control target
= control target key end

     0   :  { %s1356_s24 = smov 0   ;;  %s1792_s0 = inlined_call_operand.vmem [shape: bf16[2,8,576], index: 0, kind: input, shape index: {}]   ;;  %s1793_s1 = inlined_call_operand.vmem [shape: bf16[2,8,576], index: 1, kind: input, shape index: {}]   ;;  %s1794_s2 = inlined_call_operand.vmem [shape: bf16[8,144], index: 2, kind: input, shape index: {}]   ;;  %s1795_s3 = inlined_call_operand.vmem [shape: f32[8,1], index: 3, kind: input, shape index: {}]   ;;  %s1796_s4 = inlined_call_operand.vmem [shape: f32[1,526], index: 4, kind: input, shape index: {}]   ;;  %s1797_s5 = inlined_call_operand.vmem [shape: bf16[2,8,528], index: 5, kind: output, shape index: {0}]   ;;  %s1798_s6 = inlined_call_operand.vmem [shape: f32[2,8,1], index: 6, kind: output, shape index: {1}]   ;;  %s1799_s7 = inlined_call_operand.vmem [shape: f32[2,8,1], index: 7, kind: output, shape index: {2}]  }
   0x1 LB: > { %s1059_s25 = sadd.s32 4294967295, %s1305_s24   ;;  %p1063_p0 = scmp.ge.s32.totalorder %s1305_s24, 1  ;;  %s1305_s24 = sphi %s1356_s24, %s18_s24  }
   0x2   : > { %p252_p1 = scmp.lt.s32.totalorder %s1305_s24, 3 }
   0x4   : > { %p253_p2 = pnand %p1063_p0, %p252_p1 }
   0x5   : > { %p297_p3 = scmp.lt.s32.totalorder (!%p253_p2), %s1059_s25, 1  ;;  %s1307_s10 = smov (!%p253_p2), 127   ;;  %vm352_vm0 = vcmask (!%p253_p2), 1039360   ;;  %v1469_v38 = vld [vmem:[%s1794_s2] sm:$0xff] (!%p253_p2)  ;;  %vm717_vm1 = vcmask (!%p253_p2), 130048   ;;  %vm372_vm2 = vcmask (!%p253_p2), 1031168  }
   0x6   : > { %256 = sbr.rel (%p253_p2) target bundleno = 675 (0x2a3), region = 40  ;;  %s1308_s11 = smov (!%p253_p2), 126   ;;  %v1478_v40 = vcombine.high (!%p253_p2), %v1469_v38, %v1469_v38  ;;  %vm392_vm3 = vcmask (!%p253_p2), 850944   ;;  %v1315_v52 = vmov (!%p253_p2), 0   ;;  %vm412_vm4 = vcmask (!%p253_p2), 842752  }
   0x7   : > { %s1309_s12 = smov (!%p253_p2), 104   ;;  %s1310_s13 = smov (!%p253_p2), 103   ;;  %1295 = vset.pattern.permute.xlu1 (!%p253_p2), %v1315_v52  ;;  %1296 = vset.pattern.permute.xlu0 (!%p253_p2), %v1315_v52  ;;  %vm432_vm5 = vcmask (!%p253_p2), 834560   ;;  %vm452_vm6 = vcmask (!%p253_p2), 654336   ;;  %vm472_vm7 = vcmask (!%p253_p2), 646144   ;;  %vm492_vm8 = vcmask (!%p253_p2), 637952  }
   0x8   : > { %s1311_s14 = smov (!%p253_p2), 102   ;;  %s1312_s15 = smov (!%p253_p2), 80   ;;  %1071 = vmatprep.mubr.msk.bf16.mxu0 (!%p253_p2), %vm717_vm1, %v1478_v40  ;;  %1072 = vmatprep.mubr.msk.bf16.mxu1 (!%p253_p2), %vm717_vm1, %v1478_v40  ;;  %vm926_vm9 = vcmask (!%p253_p2), 109568   ;;  %vm928_vm10 = vcmask (!%p253_p2), 126064   ;;  %vm883_vm11 = vcmask (!%p253_p2), 113664   ;;  %vm888_vm12 = vcmask (!%p253_p2), 7168  }
   0x9   : > { %s1313_s16 = smov (!%p253_p2), 79   ;;  %s1314_s17 = smov (!%p253_p2), 78  }
   0xd   : > { %s1801_s25 = smov (!%p297_p3, %s1059_s25), 1 }
   0xe   : > { %s1367_s26 = smul.u32 20, %s1801_s25 }
  0x10   : > { %s306_s29 = scalar_lea.vmem %s1793_s1, %s1367_s26  ;;  %s1377_s9 = scalar_lea.vmem %s1792_s0, %s1367_s26 }
  0x11   : > { %v329_v0 = vld [vmem:[%s306_s29] sm:$0xff]  ;;  %v330_v1 = vld [vmem:[%s306_s29 + $0x8] sm:$0xff]  ;;  %v331_v8 = vld [vmem:[%s306_s29 + $0x10] sm:$0xf]  ;;  %s1775_s29 = scalar_lea.vmem %s1797_s5, %s1367_s26  ;;  %s1067_s26 = sshll.u32 %s1801_s25, 3 }
  0x12   : > { %v1380_v2 = vld [vmem:[%s1377_s9] sm:$0xff]  ;;  %v1382_v3 = vunpack.c.h.bf16 %v329_v0  ;;  %v1384_v4 = vunpack.c.l.bf16 %v330_v1  ;;  %v1386_v5 = vunpack.c.h.bf16 %v330_v1  ;;  %v1388_v6 = vunpack.c.l.bf16 %v329_v0  ;;  %v1391_v7 = vld [vmem:[%s1377_s9 + $0x8] sm:$0xff]  ;;  %v323_v19 = vld [vmem:[%s1377_s9 + $0x10] sm:$0xf]  ;;  %s315_s9 = scalar_lea.vmem %s1798_s6, %s1067_s26 }
  0x13   : > { %v325_v9 = vunpack.c.h.bf16 %v1380_v2  ;;  %v326_v10 = vunpack.c.l.bf16 %v1391_v7  ;;  %v1396_v11 = vunpack.c.l.bf16 %v1380_v2  ;;  %v1400_v13 = vunpack.c.l.bf16 %v331_v8 }
  0x14   : > { %v1100_v12 = vpack.i.bf16 %v1384_v4, %v1382_v3  ;;  %v1105_v15 = vpack.i.bf16 %v1388_v6, %v1386_v5  ;;  %v1185_v18 = vpack.i.bf16 %v1388_v6, %v1384_v4  ;;  %v1440_v24 = vunpack.c.h.bf16 %v1391_v7 }
  0x15   : > { %v1110_v14 = vpack.i.bf16 %v326_v10, %v325_v9  ;;  %v1115_v16 = vpack.i.bf16 %v1400_v13, %v1396_v11  ;;  %v1130_v17 = vpack.i.bf16 %v1382_v3, %v1396_v11  ;;  %v1444_v27 = vunpack.c.l.bf16 %v323_v19 }
  0x16   : > { %1101 = vrot.lane.b32.xlu0 %v1100_v12, %s1307_s10 }
  0x17   : > { %1111 = vrot.lane.b32.xlu1 %v1110_v14, %s1307_s10  ;;  %v1464_v37 = vpack.i.bf16 %v1444_v27, %v1440_v24 }
  0x1a   : > { %1106 = vrot.lane.b32.xlu0 %v1105_v15, %s1307_s10 }
  0x1b   : > { %1116 = vrot.lane.b32.xlu1 %v1115_v16, %s1307_s10 }
  0x1e   : > { %1121 = vrot.lane.b32.xlu0 %v1110_v14, %s1308_s11 }
  0x1f   : > { %1126 = vrot.lane.b32.xlu1 %v1110_v14, %s1309_s12 }
  0x22   : > { %1131 = vrot.lane.b32.xlu0 %v1130_v17, %s1308_s11 }
  0x23   : > { %1136 = vrot.lane.b32.xlu1 %v1130_v17, %s1309_s12 }
  0x26   : > { %1141 = vrot.lane.b32.xlu0 %v1110_v14, %s1310_s13 }
  0x27   : > { %1146 = vrot.lane.b32.xlu1 %v1110_v14, %s1311_s14 }
  0x2a   : > { %1151 = vrot.lane.b32.xlu0 %v1130_v17, %s1310_s13 }
  0x2b   : > { %1156 = vrot.lane.b32.xlu1 %v1130_v17, %s1311_s14 }
  0x2e   : > { %1161 = vrot.lane.b32.xlu0 %v1110_v14, %s1312_s15 }
  0x2f   : > { %1166 = vrot.lane.b32.xlu1 %v1110_v14, %s1313_s16 }
  0x32   : > { %1171 = vrot.lane.b32.xlu0 %v1130_v17, %s1312_s15 }
  0x33   : > { %1176 = vrot.lane.b32.xlu1 %v1130_v17, %s1313_s16 }
  0x36   : > { %1181 = vrot.lane.b32.xlu0 %v1110_v14, %s1314_s17 }
  0x37   : > { %482 = vrot.lane.b32.xlu1 %v1396_v11, %s1314_s17 }
  0x3a   : > { %1186 = vrot.lane.b32.xlu0 %v1185_v18, %s1308_s11 }
  0x3b   : > { %1191 = vrot.lane.b32.xlu1 %v1185_v18, %s1309_s12 }
  0x3e   : > { %1196 = vrot.lane.b32.xlu0 %v1185_v18, %s1310_s13 }
  0x3f   : > { %1201 = vrot.lane.b32.xlu1 %v1185_v18, %s1311_s14 }
  0x42   : > { %1206 = vrot.lane.b32.xlu0 %v1185_v18, %s1312_s15 }
  0x88   : > { %v1102_v20 = vpop.permute.xlu0 %1101 }
  0x89   : > { %v1104_v21 = vunpack.i.h.bf16 %v1102_v20  ;;  %v1103_v22 = vunpack.i.l.bf16 %v1102_v20  ;;  %v1437_v23 = vpop.permute.xlu1 %1111 }
  0x8a   : > { %v1114_v25 = vunpack.i.h.bf16 %v1437_v23  ;;  %v1113_v26 = vunpack.i.l.bf16 %v1437_v23 }
  0x8b   : > { %v1447_v28 = vsel %vm352_vm0, %v1103_v22, %v1104_v21 }
  0x8c   : > { %v1449_v29 = vpop.permute.xlu0 %1106  ;;  %v1210_v30 = vpack.i.bf16 %v1447_v28, %v1384_v4  ;;  %v354_v31 = vsel %vm352_vm0, %v1113_v26, %v1114_v25 }
  0x8d   : > { %v1109_v32 = vunpack.i.h.bf16 %v1449_v29  ;;  %v1108_v33 = vunpack.i.l.bf16 %v1449_v29  ;;  %v1458_v34 = vpop.permute.xlu1 %1116  ;;  %v660_v35 = vpack.c.bf16 %v354_v31, %v325_v9 }
  0x8e   : > { %v1118_v36 = vunpack.i.l.bf16 %v1458_v34  ;;  %1211 = vrot.lane.b32.xlu1 %v1210_v30, %s1313_s16 }
  0x8f   : > { %v1474_v39 = vsel %vm352_vm0, %v1104_v21, %v1108_v33  ;;  %721 = vmatprep.subr.bf16.mxu0 %v660_v35  ;;  %v1490_v47 = vsel %vm352_vm0, %v1109_v32, %v1103_v22 }
  0x90   : > { %v1480_v41 = vpop.permute.xlu0 %1121  ;;  %v1225_v42 = vpack.i.bf16 %v1388_v6, %v1474_v39  ;;  %v353_v43 = vsel %vm352_vm0, %v1118_v36, %v1113_v26  ;;  %v1230_v54 = vpack.i.bf16 %v1440_v24, %v1490_v47  ;;  %v1260_v36 = vpack.i.bf16 %v1400_v13, %v1386_v5 }
  0x91   : > { %v1124_v44 = vunpack.i.h.bf16 %v1480_v41  ;;  %v1123_v45 = vunpack.i.l.bf16 %v1480_v41  ;;  %v1487_v46 = vpop.permute.xlu1 %1126  ;;  %v659_v48 = vpack.c.bf16 %v353_v43, %v1396_v11 }
  0x92   : > { %v1129_v49 = vunpack.i.h.bf16 %v1487_v46  ;;  %v1128_v50 = vunpack.i.l.bf16 %v1487_v46  ;;  %1226 = vrot.lane.b32.xlu0 %v1225_v42, %s1313_s16  ;;  %1216 = vrot.lane.b32.xlu1 %v1464_v37, %s1307_s10 }
  0x93   : > { %722 = vmatpush1.bf16.msra.mxu0 %v659_v48  ;;  %v374_v51 = vsel %vm372_vm2, %v1123_v45, %v1124_v44 }
  0x94   : > { %v1506_v53 = vpop.permute.xlu0 %1131  ;;  %v394_v55 = vsel %vm392_vm3, %v1128_v50, %v1129_v49 }
  0x95   : > { %v1133_v56 = vunpack.i.l.bf16 %v1506_v53  ;;  %v1515_v57 = vpop.permute.xlu1 %1136  ;;  %v665_v58 = vpack.c.bf16 %v394_v55, %v374_v51 }
  0x96   : > { %v1138_v59 = vunpack.i.l.bf16 %v1515_v57  ;;  %1231 = vrot.lane.b32.xlu0 %v1230_v54, %s1313_s16  ;;  %1221 = vrot.lane.b32.xlu1 %v1464_v37, %s1308_s11 }
  0x97   : > { %723 = vmatprep.subr.bf16.mxu0 %v665_v58  ;;  %v373_v60 = vsel %vm372_vm2, %v1133_v56, %v1123_v45  ;;  %v1586_v58 = vunpack.i.h.bf16 %v1458_v34 }
  0x98   : > { %v1522_v61 = vpop.permute.xlu0 %1141  ;;  %v393_v62 = vsel %vm392_vm3, %v1138_v59, %v1128_v50 }
  0x99   : > { %v1144_v63 = vunpack.i.h.bf16 %v1522_v61  ;;  %v1143_v0 = vunpack.i.l.bf16 %v1522_v61  ;;  %v1527_v1 = vpop.permute.xlu1 %1146  ;;  %v664_v2 = vpack.c.bf16 %v393_v62, %v373_v60 }
  0x9a   : > { %v1149_v8 = vunpack.i.h.bf16 %v1527_v1  ;;  %v1148_v9 = vunpack.i.l.bf16 %v1527_v1  ;;  %1236 = vrot.lane.b32.xlu0 %v1464_v37, %s1309_s12  ;;  %1241 = vrot.lane.b32.xlu1 %v1464_v37, %s1310_s13 }
  0x9b   : > { %724 = vmatpush1.bf16.msra.mxu0 %v664_v2  ;;  %v414_v11 = vsel %vm412_vm4, %v1143_v0, %v1144_v63  ;;  %v1134_v2 = vunpack.i.h.bf16 %v1506_v53  ;;  %v1608_v53 = vsel %vm352_vm0, %v1108_v33, %v1586_v58 }
  0x9c   : > { %v1538_v12 = vpop.permute.xlu0 %1151  ;;  %v434_v14 = vsel %vm432_vm5, %v1148_v9, %v1149_v8 }
  0x9d   : > { %v1153_v15 = vunpack.i.l.bf16 %v1538_v12  ;;  %v1544_v16 = vpop.permute.xlu1 %1156  ;;  %v670_v17 = vpack.c.bf16 %v434_v14, %v414_v11 }
  0x9e   : > { %v1158_v18 = vunpack.i.l.bf16 %v1544_v16  ;;  %1246 = vrot.lane.b32.xlu0 %v1464_v37, %s1311_s14  ;;  %1251 = vrot.lane.b32.xlu1 %v1464_v37, %s1312_s15 }
  0x9f   : > { %725 = vmatprep.subr.bf16.mxu0 %v670_v17  ;;  %v413_v19 = vsel %vm412_vm4, %v1153_v15, %v1143_v0  ;;  %v1139_v17 = vunpack.i.h.bf16 %v1515_v57  ;;  %v1154_v57 = vunpack.i.h.bf16 %v1538_v12 }
  0xa0   : > { %v1552_v20 = vpop.permute.xlu0 %1161  ;;  %v433_v21 = vsel %vm432_vm5, %v1158_v18, %v1148_v9 }
  0xa1   : > { %v1164_v22 = vunpack.i.h.bf16 %v1552_v20  ;;  %v1163_v26 = vunpack.i.l.bf16 %v1552_v20  ;;  %v1557_v30 = vpop.permute.xlu1 %1166  ;;  %v669_v31 = vpack.c.bf16 %v433_v21, %v413_v19 }
  0xa2   : > { %v1169_v32 = vunpack.i.h.bf16 %v1557_v30  ;;  %v1168_v35 = vunpack.i.l.bf16 %v1557_v30  ;;  %470 = vrot.lane.b32.xlu0 %v1444_v27, %s1313_s16  ;;  %1256 = vrot.lane.b32.xlu1 %v1464_v37, %s1314_s17 }
  0xa3   : > { %726 = vmatpush1.bf16.msra.mxu0 %v669_v31  ;;  %v454_v42 = vsel %vm452_vm6, %v1163_v26, %v1164_v22  ;;  %v1290_v31 = vpack.i.bf16 %v1586_v58, %v1608_v53 }
  0xa4   : > { %v1570_v43 = vpop.permute.xlu0 %1171  ;;  %v474_v45 = vsel %vm472_vm7, %v1168_v35, %v1169_v32 }
  0xa5   : > { %v1173_v48 = vunpack.i.l.bf16 %v1570_v43  ;;  %v1576_v50 = vpop.permute.xlu1 %1176  ;;  %v675_v51 = vpack.c.bf16 %v474_v45, %v454_v42 }
  0xa6   : > { %v1178_v37 = vunpack.i.l.bf16 %v1576_v50  ;;  %1261 = vrot.lane.b32.xlu0 %v1260_v36, %s1308_s11  ;;  %1266 = vrot.lane.b32.xlu1 %v1260_v36, %s1309_s12  ;;  %s319_s12 = scalar_lea.vmem %s1799_s7, %s1067_s26 }
  0xa7   : > { %727 = vmatprep.subr.bf16.mxu0 %v675_v51  ;;  %v453_v54 = vsel %vm452_vm6, %v1173_v48, %v1163_v26  ;;  %v1159_v26 = vunpack.i.h.bf16 %v1544_v16 }
  0xa8   : > { %v1582_v55 = vpop.permute.xlu0 %1181  ;;  %v473_v56 = vsel %vm472_vm7, %v1178_v37, %v1168_v35  ;;  %v1174_v37 = vunpack.i.h.bf16 %v1570_v43 }
  0xa9   : > { %v1184_v59 = vunpack.i.h.bf16 %v1582_v55  ;;  %v1183_v60 = vunpack.i.l.bf16 %v1582_v55  ;;  %v483_v62 = vpop.permute.xlu1 %482  ;;  %v674_v0 = vpack.c.bf16 %v473_v56, %v453_v54 }
  0xaa   : > { %1271 = vrot.lane.b32.xlu0 %v1260_v36, %s1310_s13  ;;  %1276 = vrot.lane.b32.xlu1 %v1260_v36, %s1311_s14 }
  0xab   : > { %v493_v9 = vsel %vm492_vm8, %v483_v62, %v1183_v60  ;;  %728 = vmatpush1.bf16.msra.mxu0 %v674_v0  ;;  %v494_v34 = vsel %vm492_vm8, %v1183_v60, %v1184_v59 }
  0xac   : > { %v679_v11 = vpack.c.bf16 %v1388_v6, %v493_v9  ;;  %v1598_v14 = vpop.permute.xlu0 %1186  ;;  %v680_v15 = vpack.c.bf16 %v1382_v3, %v494_v34 }
  0xad   : > { %v1189_v18 = vunpack.i.h.bf16 %v1598_v14  ;;  %v1188_v19 = vunpack.i.l.bf16 %v1598_v14  ;;  %v1610_v21 = vpop.permute.xlu1 %1191 }
  0xae   : > { %1281 = vrot.lane.b32.xlu0 %v1260_v36, %s1312_s15  ;;  %1286 = vrot.lane.b32.xlu1 %v1260_v36, %s1313_s16  ;;  %v1194_v3 = vunpack.i.h.bf16 %v1610_v21  ;;  %v1193_v6 = vunpack.i.l.bf16 %v1610_v21 }
  0xaf   : > { %729 = vmatprep.subr.bf16.mxu0 %v680_v15  ;;  %v537_v29 = vsel %vm372_vm2, %v1134_v2, %v1188_v19  ;;  %v536_v33 = vsel %vm372_vm2, %v1189_v18, %v1134_v2 }
  0xb0   : > { %730 = vmatpush1.bf16.msra.mxu0 %v679_v11  ;;  %v685_v35 = vpack.c.bf16 %v537_v29, %v1447_v28  ;;  %v684_v36 = vpack.c.bf16 %v536_v33, %v1490_v47  ;;  %v1626_v42 = vpop.permute.xlu0 %1196  ;;  %v556_v48 = vsel %vm392_vm3, %v1139_v17, %v1193_v6  ;;  %v555_v16 = vsel %vm392_vm3, %v1194_v3, %v1139_v17  ;;  %v705_v11 = vld [vmem:[%s1795_s3] sm:$0xff] }
  0xb1   : > { %v1199_v12 = vunpack.i.h.bf16 %v1626_v42  ;;  %v1198_v45 = vunpack.i.l.bf16 %v1626_v42  ;;  %v1634_v51 = vpop.permute.xlu1 %1201  ;;  %v1179_v33 = vunpack.i.h.bf16 %v1576_v50 }
  0xb2   : > { %1291 = vrot.lane.b32.xlu0 %v1290_v31, %s1313_s16  ;;  %731 = vmatprep.subr.bf16.mxu0 %v685_v35  ;;  %v1204_v28 = vunpack.i.h.bf16 %v1634_v51  ;;  %v1203_v47 = vunpack.i.l.bf16 %v1634_v51 }
  0xb3   : > { %v575_v54 = vsel %vm412_vm4, %v1154_v57, %v1198_v45  ;;  %v574_v56 = vsel %vm412_vm4, %v1199_v12, %v1154_v57  ;;  %708 = vperm.xlu1 %1295, %v705_v11  }
  0xb4   : > { %732 = vmatpush1.bf16.msra.mxu0 %v684_v36  ;;  %v690_v60 = vpack.c.bf16 %v575_v54, %v556_v48  ;;  %v689_v62 = vpack.c.bf16 %v574_v56, %v555_v16  ;;  %v1644_v0 = vpop.permute.xlu0 %1206  ;;  %v594_v34 = vsel %vm432_vm5, %v1159_v26, %v1203_v47  ;;  %v593_v43 = vsel %vm432_vm5, %v1204_v28, %v1159_v26 }
  0xb5   : > { %v1209_v2 = vunpack.i.h.bf16 %v1644_v0  ;;  %v1208_v9 = vunpack.i.l.bf16 %v1644_v0 }
  0xb6   : > { %733 = vmatprep.subr.bf16.mxu0 %v690_v60 }
  0xb7   : > { %v613_v15 = vsel %vm452_vm6, %v1174_v37, %v1208_v9  ;;  %v612_v17 = vsel %vm452_vm6, %v1209_v2, %v1174_v37 }
  0xb8   : > { %734 = vmatpush1.bf16.msra.mxu0 %v689_v62  ;;  %v695_v18 = vpack.c.bf16 %v613_v15, %v594_v34  ;;  %v694_v3 = vpack.c.bf16 %v612_v17, %v593_v43 }
  0xba   : > { %735 = vmatprep.subr.bf16.mxu0 %v695_v18 }
  0xbc   : > { %736 = vmatpush1.bf16.msra.mxu0 %v694_v3 }
 0x100   : > { %v1659_v57 = vpop.permute.xlu1 %1211 }
 0x101   : > { %v1213_v29 = vunpack.i.l.bf16 %v1659_v57  ;;  %v1214_v35 = vunpack.i.h.bf16 %v1659_v57  ;;  %v848_v57 = vld [vmem:[%s1796_s4] sm:$0x1f] }
 0x103   : > { %v642_v16 = vsel %vm472_vm7, %v1179_v33, %v1213_v29 }
 0x104   : > { %v1663_v26 = vpop.permute.xlu0 %1226  ;;  %v1217_v31 = vpop.permute.xlu1 %1216 }
 0x105   : > { %v1228_v36 = vunpack.i.l.bf16 %v1663_v26  ;;  %v1219_v12 = vunpack.i.h.bf16 %v1217_v31  ;;  %v1218_v48 = vunpack.i.l.bf16 %v1217_v31  ;;  %v1229_v28 = vunpack.i.h.bf16 %v1663_v26 }
 0x106   : > { %v850_v26 = vlaneseq }
 0x107   : > { %v646_v37 = vsel %vm472_vm7, %v1214_v35, %v1228_v36  ;;  %v356_v50 = vsel %vm352_vm0, %v1218_v48, %v1219_v12  ;;  %v355_v54 = vsel %vm352_vm0, %v1114_v25, %v1218_v48  ;;  %v641_v23 = vsel %vm472_vm7, %v1229_v28, %v1179_v33 }
 0x108   : > { %v1678_v56 = vpop.permute.xlu0 %1231  ;;  %v1222_v60 = vpop.permute.xlu1 %1221  ;;  %v700_v62 = vpack.c.bf16 %v646_v37, %v642_v16  ;;  %v662_v2 = vpack.c.bf16 %v356_v50, %v1440_v24  ;;  %v661_v34 = vpack.c.bf16 %v355_v54, %v326_v10  ;;  %v1688_v24 = vcombine.low %v1469_v38, %v1469_v38 }
 0x109   : > { %v1233_v43 = vunpack.i.l.bf16 %v1678_v56  ;;  %v1224_v11 = vunpack.i.h.bf16 %v1222_v60  ;;  %v1223_v15 = vunpack.i.l.bf16 %v1222_v60  ;;  %v663_v28 = vpack.c.bf16 %v1219_v12, %v1444_v27 }
 0x10a   : > { %737 = vmatprep.subr.bf16.mxu0 %v700_v62  ;;  %762 = vmatprep.subr.bf16.mxu1 %v662_v2  ;;  %v1234_v41 = vunpack.i.h.bf16 %v1678_v56 }
 0x10b   : > { %763 = vmatpush1.bf16.msra.mxu1 %v661_v34  ;;  %v645_v25 = vsel %vm472_vm7, %v1233_v43, %v1214_v35  ;;  %v376_v48 = vsel %vm372_vm2, %v1223_v15, %v1224_v11  ;;  %v375_v35 = vsel %vm372_vm2, %v1124_v44, %v1223_v15 }
 0x10c   : > { %v1237_v17 = vpop.permute.xlu0 %1236  ;;  %v1242_v18 = vpop.permute.xlu1 %1241  ;;  %v699_v3 = vpack.c.bf16 %v645_v25, %v641_v23 }
 0x10d   : > { %v1239_v7 = vunpack.i.h.bf16 %v1237_v17  ;;  %v1238_v10 = vunpack.i.l.bf16 %v1237_v17  ;;  %v1244_v31 = vunpack.i.h.bf16 %v1242_v18  ;;  %v1243_v16 = vunpack.i.l.bf16 %v1242_v18 }
 0x10e   : > { %738 = vmatpush1.bf16.msra.mxu0 %v699_v3 }
 0x10f   : > { %803 = vmatprep.subr.bf16.mxu0 %v1315_v52  ;;  %v396_v33 = vsel %vm392_vm3, %v1238_v10, %v1239_v7  ;;  %v395_v38 = vsel %vm392_vm3, %v1129_v49, %v1238_v10  ;;  %v416_v62 = vsel %vm412_vm4, %v1243_v16, %v1244_v31  ;;  %v668_v46 = vpack.c.bf16 %v1239_v7, %v1224_v11 }
 0x110   : > { %v1247_v37 = vpop.permute.xlu0 %1246  ;;  %v1252_v50 = vpop.permute.xlu1 %1251  ;;  %v667_v54 = vpack.c.bf16 %v396_v33, %v376_v48  ;;  %v666_v60 = vpack.c.bf16 %v395_v38, %v375_v35  ;;  %v415_v3 = vsel %vm412_vm4, %v1144_v63, %v1243_v16  ;;  %v475_v63 = vsel %vm472_vm7, %v1169_v32, %v1234_v41 }
 0x111   : > { %v1249_v2 = vunpack.i.h.bf16 %v1247_v37  ;;  %v1248_v34 = vunpack.i.l.bf16 %v1247_v37  ;;  %v1254_v43 = vunpack.i.h.bf16 %v1252_v50  ;;  %v1253_v23 = vunpack.i.l.bf16 %v1252_v50  ;;  %754 = vmatmul.mubr.bf16.vlgmr.msra.gmra.mrb[0].mxu0 %v1688_v24 }
 0x112   : > { %764 = vmatprep.subr.bf16.mxu1 %v667_v54  ;;  %804 = vmatpush1.bf16.msra.mxu0 %v663_v28 }
 0x113   : > { %765 = vmatpush1.bf16.msra.mxu1 %v666_v60  ;;  %v456_v44 = vsel %vm452_vm6, %v1253_v23, %v1254_v43  ;;  %805 = vmatprep.subr.bf16.mxu0 %v1315_v52  ;;  %v436_v27 = vsel %vm432_vm5, %v1248_v34, %v1249_v2  ;;  %v435_v25 = vsel %vm432_vm5, %v1149_v8, %v1248_v34 }
 0x114   : > { %v471_v49 = vpop.permute.xlu0 %470  ;;  %v1257_v12 = vpop.permute.xlu1 %1256  ;;  %v672_v15 = vpack.c.bf16 %v436_v27, %v416_v62  ;;  %1073 = vmatprep.mubr.msk.bf16.mxu0 %vm717_vm1, %v1478_v40  ;;  %v671_v11 = vpack.c.bf16 %v435_v25, %v415_v3  ;;  %v455_v1 = vsel %vm452_vm6, %v1164_v22, %v1253_v23  ;;  %v673_v8 = vpack.c.bf16 %v1249_v2, %v1244_v31 }
 0x115   : > { %v476_v56 = vsel %vm472_vm7, %v1234_v41, %v471_v49  ;;  %v1259_v17 = vunpack.i.h.bf16 %v1257_v12  ;;  %v1258_v18 = vunpack.i.l.bf16 %v1257_v12  ;;  %v676_v20 = vpack.c.bf16 %v475_v63, %v455_v1 }
 0x116   : > { %v677_v10 = vpack.c.bf16 %v476_v56, %v456_v44  ;;  %766 = vmatprep.subr.bf16.mxu1 %v672_v15  ;;  %806 = vmatpush1.bf16.msra.mxu0 %v668_v46  ;;  %v678_v31 = vpack.c.bf16 %v471_v49, %v1254_v43 }
 0x117   : > { %807 = vmatprep.subr.bf16.mxu0 %v1315_v52  ;;  %v496_v40 = vsel %vm492_vm8, %v1258_v18, %v1259_v17  ;;  %767 = vmatpush1.bf16.msra.mxu1 %v671_v11  ;;  %v495_v22 = vsel %vm492_vm8, %v1184_v59, %v1258_v18  ;;  %v683_v2 = vpack.c.bf16 %v1400_v13, %v1259_v17 }
 0x118   : > { %v1262_v7 = vpop.permute.xlu0 %1261  ;;  %v1267_v48 = vpop.permute.xlu1 %1266  ;;  %768 = vmatprep.subr.bf16.mxu1 %v677_v10  ;;  %v682_v16 = vpack.c.bf16 %v1386_v5, %v496_v40  ;;  %v681_v54 = vpack.c.bf16 %v1384_v4, %v495_v22 }
 0x119   : > { %v1264_v33 = vunpack.i.h.bf16 %v1262_v7  ;;  %v1263_v61 = vunpack.i.l.bf16 %v1262_v7  ;;  %v1269_v35 = vunpack.i.h.bf16 %v1267_v48  ;;  %v1268_v38 = vunpack.i.l.bf16 %v1267_v48 }
 0x11a   : > { %808 = vmatpush1.bf16.msra.mxu0 %v673_v8 }
 0x11b   : > { %809 = vmatprep.subr.bf16.mxu0 %v1315_v52  ;;  %769 = vmatpush1.bf16.msra.mxu1 %v676_v20  ;;  %v539_v37 = vsel %vm372_vm2, %v1263_v61, %v1264_v33  ;;  %v558_v60 = vsel %vm392_vm3, %v1268_v38, %v1269_v35  ;;  %v538_v59 = vsel %vm372_vm2, %v1188_v19, %v1263_v61 }
 0x11c   : > { %v1272_v28 = vpop.permute.xlu0 %1271  ;;  %v1277_v32 = vpop.permute.xlu1 %1276  ;;  %770 = vmatprep.subr.bf16.mxu1 %v682_v16  ;;  %v687_v55 = vpack.c.bf16 %v539_v37, %v1608_v53  ;;  %v686_v53 = vpack.c.bf16 %v538_v59, %v1474_v39  ;;  %v688_v19 = vpack.c.bf16 %v1264_v33, %v1586_v58  ;;  %v557_v39 = vsel %vm392_vm3, %v1193_v6, %v1268_v38 }
 0x11d   : > { %v1274_v30 = vunpack.i.h.bf16 %v1272_v28  ;;  %v1273_v50 = vunpack.i.l.bf16 %v1272_v28  ;;  %v1279_v5 = vunpack.i.h.bf16 %v1277_v32  ;;  %v1278_v34 = vunpack.i.l.bf16 %v1277_v32 }
 0x11e   : > { %810 = vmatpush1.bf16.msra.mxu0 %v678_v31 }
 0x11f   : > { %811 = vmatprep.subr.bf16.mxu0 %v1315_v52  ;;  %v577_v62 = vsel %vm412_vm4, %v1273_v50, %v1274_v30  ;;  %771 = vmatpush1.bf16.msra.mxu1 %v681_v54  ;;  %v596_v44 = vsel %vm432_vm5, %v1278_v34, %v1279_v5  ;;  %v576_v14 = vsel %vm412_vm4, %v1198_v45, %v1273_v50 }
 0x120   : > { %v1282_v43 = vpop.permute.xlu0 %1281  ;;  %772 = vmatprep.subr.bf16.mxu1 %v687_v55  ;;  %v692_v4 = vpack.c.bf16 %v577_v62, %v558_v60  ;;  %v1287_v27 = vpop.permute.xlu1 %1286  ;;  %v691_v42 = vpack.c.bf16 %v576_v14, %v557_v39  ;;  %v693_v45 = vpack.c.bf16 %v1274_v30, %v1269_v35  ;;  %v595_v21 = vsel %vm432_vm5, %v1203_v47, %v1278_v34 }
 0x121   : > { %v1284_v23 = vunpack.i.h.bf16 %v1282_v43  ;;  %v1283_v41 = vunpack.i.l.bf16 %v1282_v43  ;;  %v1289_v46 = vunpack.i.h.bf16 %v1287_v27  ;;  %v1288_v56 = vunpack.i.l.bf16 %v1287_v27 }
 0x122   : > { %812 = vmatpush1.bf16.msra.mxu0 %v683_v2 }
 0x123   : > { %813 = vmatprep.subr.bf16.mxu0 %v1315_v52  ;;  %v615_v13 = vsel %vm452_vm6, %v1283_v41, %v1284_v23  ;;  %773 = vmatpush1.bf16.msra.mxu1 %v686_v53  ;;  %v614_v58 = vsel %vm452_vm6, %v1208_v9, %v1283_v41  ;;  %v644_v17 = vsel %vm472_vm7, %v1288_v56, %v1289_v46 }
 0x124   : > { %v1292_v49 = vpop.permute.xlu0 %1291  ;;  %774 = vmatprep.subr.bf16.mxu1 %v692_v4  ;;  %v697_v25 = vpack.c.bf16 %v615_v13, %v596_v44  ;;  %v696_v6 = vpack.c.bf16 %v614_v58, %v595_v21  ;;  %v698_v9 = vpack.c.bf16 %v1284_v23, %v1279_v5  ;;  %v643_v10 = vsel %vm472_vm7, %v1213_v29, %v1288_v56 }
 0x125   : > { %v1294_v12 = vunpack.i.h.bf16 %v1292_v49  ;;  %v1293_v15 = vunpack.i.l.bf16 %v1292_v49 }
 0x126   : > { %814 = vmatpush1.bf16.msra.mxu0 %v688_v19 }
 0x127   : > { %815 = vmatprep.subr.bf16.mxu0 %v1315_v52  ;;  %775 = vmatpush1.bf16.msra.mxu1 %v691_v42  ;;  %v648_v18 = vsel %vm472_vm7, %v1293_v15, %v1294_v12  ;;  %v647_v0 = vsel %vm472_vm7, %v1228_v36, %v1293_v15  ;;  %v703_v47 = vpack.c.bf16 %v1294_v12, %v1289_v46  ;;  %v851_v36 = vshrl.u32 %v850_v26, 7 }
 0x128   : > { %776 = vmatprep.subr.bf16.mxu1 %v697_v25  ;;  %v702_v3 = vpack.c.bf16 %v648_v18, %v644_v17  ;;  %v701_v51 = vpack.c.bf16 %v647_v0, %v643_v10 }
 0x129   : > { %v852_v11 = vsub.s32 0, %v851_v36  ;;  %v856_v29 = vsub.s32 1, %v851_v36  ;;  %v860_v50 = vsub.s32 2, %v851_v36  ;;  %v864_v32 = vsub.s32 3, %v851_v36 }
 0x12a   : > { %816 = vmatpush1.bf16.msra.mxu0 %v693_v45  ;;  %v868_v5 = vsub.s32 4, %v851_v36 }
 0x12b   : > { %817 = vmatprep.subr.bf16.mxu0 %v1315_v52  ;;  %777 = vmatpush1.bf16.msra.mxu1 %v696_v6  ;;  %v853_v7 = vrot.slane %v848_v57, %v852_v11  ;;  %v857_v61 = vrot.slane %v848_v57, %v856_v29  ;;  %v861_v55 = vrot.slane %v848_v57, %v860_v50 }
 0x12c   : > { %778 = vmatprep.subr.bf16.mxu1 %v702_v3  ;;  %v865_v43 = vrot.slane %v848_v57, %v864_v32  ;;  %v869_v44 = vrot.slane %v848_v57, %v868_v5 }
 0x12e   : > { %818 = vmatpush1.bf16.msra.mxu0 %v698_v9 }
 0x12f   : > { %819 = vmatprep.subr.bf16.mxu0 %v1315_v52  ;;  %779 = vmatpush1.bf16.msra.mxu1 %v701_v51 }
 0x132   : > { %820 = vmatpush1.bf16.msra.mxu0 %v703_v47  ;;  %795 = vmatmul.mubr.bf16.vlgmr.msra.gmra.mrb[0].mxu1 %v1688_v24  ;;  %v709_v1 = vpop.permute.xlu1 %708 }
 0x135   : > { %836 = vmatmul.mubr.bf16.vlgmr.msra.gmra.mrb[4].mxu0 %v1688_v24 }
 0x1e4   : > { %v755_v40 = vpop.f32.mrb[0].mxu0 }
 0x1e5   : > { %v756_v8 = vadd.f32 %v755_v40, %v709_v1  ;;  %v757_v48 = vpop.f32.mrb[1].mxu0 }
 0x1e6   : > { %v758_v33 = vadd.f32 %v757_v48, %v709_v1  ;;  %v759_v63 = vpop.f32.mrb[2].mxu0 }
 0x1e7   : > { %v843_v16 = vmax.f32 %v756_v8, 0.0  ;;  %v760_v35 = vpop.f32.mrb[3].mxu0 }
 0x1e8   : > { %v844_v24 = vmax.f32 %v758_v33, 0.0 }
 0x1e9   : > { %v875_v20 = vmul.f32 %v853_v7, %v843_v16 }
 0x1ea   : > { %v876_v22 = vmul.f32 %v857_v61, %v844_v24  ;;  %v1079_v31 = vpack.c.bf16 %v844_v24, %v843_v16 }
 0x1eb   : > { %v890_v38 = vmul.f32 %v875_v20, %v843_v16 }
 0x1ec   : > { %v891_v28 = vmul.f32 %v876_v22, %v844_v24  ;;  %924 = vst [vmem:[%s1775_s29] sm:$0xff] %v1079_v31  ;;  %v880_v37 = vadd.f32 %v876_v22, %v875_v20 }
 0x1ee   : > { %v895_v30 = vadd.f32 %v891_v28, %v890_v38 }
 0x205   : > { %v796_v54 = vpop.f32.mrb[0].mxu1 }
 0x206   : > { %v797_v60 = vadd.f32 %v796_v54, %v709_v1  ;;  %v798_v59 = vpop.f32.mrb[1].mxu1 }
 0x207   : > { %v799_v62 = vadd.f32 %v798_v59, %v709_v1  ;;  %v800_v2 = vpop.f32.mrb[2].mxu1 }
 0x208   : > { %v837_v34 = vpop.f32.mrb[4].mxu0  ;;  %v845_v23 = vmax.f32 %v797_v60, 0.0  ;;  %v801_v41 = vpop.f32.mrb[3].mxu1 }
 0x209   : > { %v838_v4 = vadd.f32 %v837_v34, %v709_v1  ;;  %v839_v53 = vpop.f32.mrb[5].mxu0  ;;  %v846_v27 = vmax.f32 %v799_v62, 0.0 }
 0x20a   : > { %v840_v14 = vpop.f32.mrb[6].mxu0  ;;  %v877_v13 = vmul.f32 %v861_v55, %v845_v23 }
 0x20b   : > { %v847_v19 = vmax.f32 %v838_v4, 0.0  ;;  %v841_v46 = vpop.f32.mrb[7].mxu0  ;;  %v1080_v49 = vpack.c.bf16 %v846_v27, %v845_v23  ;;  %v878_v12 = vmul.f32 %v865_v43, %v846_v27 }
 0x20c   : > { %v892_v15 = vmul.f32 %v877_v13, %v845_v23  ;;  %v881_v56 = vadd.f32 %v880_v37, %v877_v13 }
 0x20d   : > { %v1081_v39 = vpack.c.bf16 %v847_v19, %v847_v19  ;;  %v879_v25 = vmul.f32 %v869_v44, %v847_v19  ;;  %925 = vst [vmem:[%s1775_s29 + $0x8] sm:$0xff] %v1080_v49  ;;  %v893_v42 = vmul.f32 %v878_v12, %v846_v27 }
 0x20e   : > { %v882_v58 = vadd.f32 %v881_v56, %v878_v12  ;;  %v896_v18 = vadd.f32 %v895_v30, %v892_v15 }
 0x20f   : > { %927 = vst.msk [vmem:[%s1775_s29 + $0x10] sm:$0xf] %vm926_vm9, %v1081_v39  ;;  %v884_v45 = vsel %vm883_vm11, %v879_v25, 0.0  ;;  %v894_v17 = vmul.f32 %v879_v25, %v847_v19 }
 0x210   : > { %929 = vst.msk [vmem:[%s1775_s29 + $0x10] sm:$0xf] %vm928_vm10, %v1315_v52  ;;  %v885_v21 = vadd.f32 %v884_v45, %v882_v58  ;;  %v897_v6 = vadd.f32 %v896_v18, %v893_v42 }
 0x211   : > { %v898_v3 = vsel %vm883_vm11, %v894_v17, 0.0 }
 0x212   : > { %886 = vadd.xlane.f32.xlu0 %v885_v21  ;;  %v899_v0 = vadd.f32 %v898_v3, %v897_v6 }
 0x214   : > { %900 = vadd.xlane.f32.xlu1 %v899_v0 }
 0x29f   : > { %v887_v9 = vpop.xlane.xlu0 %886 }
 0x2a0   : > { %889 = vst.msk [vmem:[%s315_s9] sm:$0xff] %vm888_vm12, %v887_v9 }
 0x2a1   : > { %v901_v10 = vpop.xlane.xlu1 %900 }
 0x2a2   : > { %902 = vst.msk [vmem:[%s319_s12] sm:$0xff] %vm888_vm12, %v901_v10 }
 0x2a3 PF: > { %s18_s24 = sadd.s32 1, %s1305_s24  }
 0x2a4   : > { %p15_p4 = scmp.ge.s32.totalorder %s18_s24, 4  }
 0x2a6   :  { %17 = sbr.rel (!%p15_p4) target bundleno = 1 (0x1), region = 97 }

// kernel: decoder_forward.11
= control target key start
LH: loop header
LB: loop body
LE: loop exit
PB: predicated region body
PF: predicated region fallthrough
CT: control target
= control target key end

     0   :  { %s837_s12 = smov 0   ;;  %s939_s0 = inlined_call_operand.vmem [shape: bf16[2,8,528], index: 0, kind: input, shape index: {}]   ;;  %s940_s1 = inlined_call_operand.vmem [shape: bf16[8,72], index: 1, kind: input, shape index: {}]   ;;  %s941_s2 = inlined_call_operand.vmem [shape: f32[8,1], index: 2, kind: input, shape index: {}]   ;;  %s942_s3 = inlined_call_operand.vmem [shape: bf16[2,8,400], index: 3, kind: output, shape index: {}]  }
   0x1 LB: > { %s639_s13 = sadd.s32 4294967295, %s789_s12   ;;  %p643_p0 = scmp.ge.s32.totalorder %s789_s12, 1  ;;  %s789_s12 = sphi %s837_s12, %s13_s12  }
   0x2   : > { %p137_p1 = scmp.lt.s32.totalorder %s789_s12, 3 }
   0x4   : > { %p138_p2 = pnand %p643_p0, %p137_p1 }
   0x5   : > { %p161_p3 = scmp.lt.s32.totalorder (!%p138_p2), %s639_s13, 1  ;;  %s791_s18 = smov (!%p138_p2), 126   ;;  %v799_v12 = vmov (!%p138_p2), 0   ;;  %v343_v13 = vld [vmem:[%s941_s2] sm:$0xff] (!%p138_p2)  ;;  %vm192_vm0 = vcmask (!%p138_p2), 1039360   ;;  %vm208_vm1 = vcmask (!%p138_p2), 1031168  }
   0x6   : > { %141 = sbr.rel (%p138_p2) target bundleno = 551 (0x227), region = 32  ;;  %s792_s19 = smov (!%p138_p2), 127   ;;  %398 = vmatprep.mubr.bf16.mxu0 (!%p138_p2), %v799_v12  ;;  %439 = vmatprep.mubr.bf16.mxu1 (!%p138_p2), %v799_v12  ;;  %vm224_vm2 = vcmask (!%p138_p2), 850944   ;;  %vm240_vm3 = vcmask (!%p138_p2), 842752   ;;  %vm256_vm4 = vcmask (!%p138_p2), 834560   ;;  %vm294_vm5 = vcmask (!%p138_p2), 646144  }
   0x7   : > { %s793_s20 = smov (!%p138_p2), 104   ;;  %s794_s21 = smov (!%p138_p2), 102   ;;  %781 = vset.pattern.permute.xlu1 (!%p138_p2), %v799_v12  ;;  %782 = vset.pattern.permute.xlu0 (!%p138_p2), %v799_v12  ;;  %vm275_vm6 = vcmask (!%p138_p2), 654336   ;;  %vm313_vm7 = vcmask (!%p138_p2), 637952   ;;  %vm353_vm8 = vcmask (!%p138_p2), 1043456   ;;  %vm349_vm9 = vcmask (!%p138_p2), 588800  }
   0x8   : > { %s795_s22 = smov (!%p138_p2), 103   ;;  %s796_s23 = smov (!%p138_p2), 79   ;;  %vm449_vm10 = vcmask (!%p138_p2), 158720   ;;  %vm457_vm11 = vcmask (!%p138_p2), 322720   ;;  %vm462_vm12 = vcmask (!%p138_p2), 486720   ;;  %vm467_vm13 = vcmask (!%p138_p2), 650720  }
   0x9   : > { %s797_s24 = smov (!%p138_p2), 80   ;;  %s798_s25 = smov (!%p138_p2), 78   ;;  %vm481_vm14 = vcmask (!%p138_p2), 883712   ;;  %vm472_vm15 = vcmask (!%p138_p2), 814720  }
   0xa   : > { %s800_s7 = smov (!%p138_p2), 84   ;;  %s801_s8 = smov (!%p138_p2), 72  }
   0xb   : > { %s802_s9 = smov (!%p138_p2), 76   ;;  %s803_s10 = smov (!%p138_p2), 120  }
   0xc   : > { %s804_s11 = smov (!%p138_p2), 124   ;;  %s807_s15 = smov (!%p138_p2), 112  }
   0xd   : > { %s944_s13 = smov (!%p161_p3, %s639_s13), 1  ;;  %s808_s16 = smov 88  }
   0xe   : > { %s666_s14 = smul.u32 20, %s944_s13  ;;  %s659_s30 = sshll.u32 %s944_s13, 4 }
   0xf   : > { %s910_s6 = scalar_lea.vmem %s942_s3, %s659_s30  ;;  %s805_s13 = smov 116  }
  0x10   : > { %s165_s17 = scalar_lea.vmem %s939_s0, %s666_s14  ;;  %s806_s14 = smov 108  }
  0x11   : > { %v172_v0 = vld [vmem:[%s165_s17] sm:$0xff]  ;;  %v173_v1 = vld [vmem:[%s165_s17 + $0x8] sm:$0xff]  ;;  %v178_v8 = vld [vmem:[%s165_s17 + $0x10] sm:$0xf]  ;;  %s809_s17 = smov 100  }
  0x12   : > { %v175_v2 = vunpack.c.h.bf16 %v172_v0  ;;  %v851_v3 = vunpack.c.l.bf16 %v173_v1  ;;  %v177_v4 = vunpack.c.h.bf16 %v173_v1  ;;  %v853_v5 = vunpack.c.l.bf16 %v172_v0 }
  0x13   : > { %v179_v10 = vunpack.c.l.bf16 %v178_v8 }
  0x14   : > { %v711_v6 = vpack.i.bf16 %v851_v3, %v175_v2  ;;  %v706_v7 = vpack.i.bf16 %v177_v4, %v853_v5  ;;  %v766_v9 = vpack.i.bf16 %v175_v2, %v853_v5 }
  0x15   : > { %v771_v11 = vpack.i.bf16 %v179_v10, %v177_v4 }
  0x16   : > { %712 = vrot.lane.b32.xlu1 %v711_v6, %s791_s18  ;;  %702 = vrot.lane.b32.xlu0 %v711_v6, %s792_s19 }
  0x1a   : > { %717 = vrot.lane.b32.xlu1 %v711_v6, %s793_s20  ;;  %707 = vrot.lane.b32.xlu0 %v706_v7, %s792_s19  ;;  %s811_s19 = smov 96  }
  0x1e   : > { %727 = vrot.lane.b32.xlu1 %v706_v7, %s793_s20  ;;  %722 = vrot.lane.b32.xlu0 %v706_v7, %s791_s18  ;;  %s810_s18 = smov 92  }
  0x22   : > { %737 = vrot.lane.b32.xlu1 %v711_v6, %s794_s21  ;;  %732 = vrot.lane.b32.xlu0 %v711_v6, %s795_s22 }
  0x26   : > { %747 = vrot.lane.b32.xlu1 %v706_v7, %s794_s21  ;;  %742 = vrot.lane.b32.xlu0 %v706_v7, %s795_s22  ;;  %s812_s21 = smov 64   ;;  %s813_s22 = smov 68  }
  0x2a   : > { %757 = vrot.lane.b32.xlu1 %v711_v6, %s796_s23  ;;  %752 = vrot.lane.b32.xlu0 %v711_v6, %s797_s24 }
  0x2e   : > { %284 = vrot.lane.b32.xlu1 %v853_v5, %s796_s23  ;;  %762 = vrot.lane.b32.xlu0 %v706_v7, %s797_s24 }
  0x32   : > { %307 = vrot.lane.b32.xlu1 %v851_v3, %s798_s25  ;;  %767 = vrot.lane.b32.xlu0 %v766_v9, %s798_s25 }
  0x36   : > { %772 = vrot.lane.b32.xlu1 %v771_v11, %s796_s23  ;;  %273 = vrot.lane.b32.xlu0 %v179_v10, %s797_s24  ;;  %s814_s23 = smov 60  }
  0x3a   : > { %777 = vrot.lane.b32.xlu0 %v771_v11, %s798_s25  ;;  %346 = vperm.xlu1 %781, %v343_v13  }
  0x88   : > { %v713_v14 = vpop.permute.xlu1 %712  ;;  %v703_v15 = vpop.permute.xlu0 %702 }
  0x89   : > { %v705_v16 = vunpack.i.h.bf16 %v703_v15  ;;  %v704_v17 = vunpack.i.l.bf16 %v703_v15  ;;  %v715_v18 = vunpack.i.h.bf16 %v713_v14  ;;  %v714_v19 = vunpack.i.l.bf16 %v713_v14 }
  0x8b   : > { %v194_v20 = vsel %vm192_vm0, %v704_v17, %v705_v16  ;;  %v210_v28 = vsel %vm208_vm1, %v714_v19, %v715_v18 }
  0x8c   : > { %v718_v21 = vpop.permute.xlu1 %717  ;;  %v708_v22 = vpop.permute.xlu0 %707  ;;  %v323_v23 = vpack.c.bf16 %v194_v20, %v175_v2 }
  0x8d   : > { %v720_v24 = vunpack.i.h.bf16 %v718_v21  ;;  %v719_v25 = vunpack.i.l.bf16 %v718_v21  ;;  %v710_v26 = vunpack.i.h.bf16 %v708_v22  ;;  %v709_v27 = vunpack.i.l.bf16 %v708_v22 }
  0x8e   : > { %366 = vmatprep.subr.bf16.mxu0 %v323_v23 }
  0x8f   : > { %v325_v29 = vpack.c.bf16 %v710_v26, %v177_v4  ;;  %v193_v30 = vsel %vm192_vm0, %v709_v27, %v704_v17  ;;  %v195_v31 = vsel %vm192_vm0, %v705_v16, %v710_v26  ;;  %v226_v32 = vsel %vm224_vm2, %v719_v25, %v720_v24 }
  0x90   : > { %v728_v33 = vpop.permute.xlu1 %727  ;;  %v723_v34 = vpop.permute.xlu0 %722  ;;  %v322_v35 = vpack.c.bf16 %v193_v30, %v853_v5  ;;  %v324_v36 = vpack.c.bf16 %v195_v31, %v851_v3  ;;  %v327_v37 = vpack.c.bf16 %v226_v32, %v210_v28  ;;  %vm493_vm0 = vcmask 1044416  }
  0x91   : > { %v730_v38 = vunpack.i.h.bf16 %v728_v33  ;;  %v729_v39 = vunpack.i.l.bf16 %v728_v33  ;;  %v725_v40 = vunpack.i.h.bf16 %v723_v34  ;;  %v724_v41 = vunpack.i.l.bf16 %v723_v34  ;;  %407 = vmatprep.subr.bf16.mxu1 %v325_v29 }
  0x92   : > { %367 = vmatpush1.bf16.msra.mxu0 %v322_v35  ;;  %408 = vmatpush1.bf16.msra.mxu1 %v324_v36 }
  0x93   : > { %v329_v42 = vpack.c.bf16 %v730_v38, %v725_v40  ;;  %368 = vmatprep.subr.bf16.mxu0 %v327_v37  ;;  %v209_v43 = vsel %vm208_vm1, %v724_v41, %v714_v19  ;;  %v225_v44 = vsel %vm224_vm2, %v729_v39, %v719_v25  ;;  %v211_v45 = vsel %vm208_vm1, %v715_v18, %v725_v40  ;;  %v342_v40 = vld [vmem:[%s940_s1] sm:$0xf] }
  0x94   : > { %v738_v46 = vpop.permute.xlu1 %737  ;;  %v733_v47 = vpop.permute.xlu0 %732  ;;  %v326_v48 = vpack.c.bf16 %v225_v44, %v209_v43  ;;  %v227_v49 = vsel %vm224_vm2, %v720_v24, %v730_v38  ;;  %vm494_vm1 = vcmask 97284  }
  0x95   : > { %v740_v50 = vunpack.i.h.bf16 %v738_v46  ;;  %v739_v51 = vunpack.i.l.bf16 %v738_v46  ;;  %v735_v52 = vunpack.i.h.bf16 %v733_v47  ;;  %v734_v53 = vunpack.i.l.bf16 %v733_v47  ;;  %409 = vmatprep.subr.bf16.mxu1 %v329_v42 }
  0x96   : > { %369 = vmatpush1.bf16.msra.mxu0 %v326_v48  ;;  %v328_v54 = vpack.c.bf16 %v227_v49, %v211_v45 }
  0x97   : > { %v242_v55 = vsel %vm240_vm3, %v734_v53, %v735_v52  ;;  %v258_v56 = vsel %vm256_vm4, %v739_v51, %v740_v50 }
  0x98   : > { %410 = vmatpush1.bf16.msra.mxu1 %v328_v54  ;;  %v748_v57 = vpop.permute.xlu1 %747  ;;  %v743_v58 = vpop.permute.xlu0 %742  ;;  %v331_v59 = vpack.c.bf16 %v258_v56, %v242_v55 }
  0x99   : > { %v750_v60 = vunpack.i.h.bf16 %v748_v57  ;;  %v749_v61 = vunpack.i.l.bf16 %v748_v57  ;;  %v745_v62 = vunpack.i.h.bf16 %v743_v58  ;;  %v744_v63 = vunpack.i.l.bf16 %v743_v58 }
  0x9a   : > { %370 = vmatprep.subr.bf16.mxu0 %v331_v59 }
  0x9b   : > { %v333_v0 = vpack.c.bf16 %v750_v60, %v745_v62  ;;  %v241_v1 = vsel %vm240_vm3, %v744_v63, %v734_v53  ;;  %v257_v2 = vsel %vm256_vm4, %v749_v61, %v739_v51  ;;  %v243_v3 = vsel %vm240_vm3, %v735_v52, %v745_v62 }
  0x9c   : > { %v758_v4 = vpop.permute.xlu1 %757  ;;  %v753_v5 = vpop.permute.xlu0 %752  ;;  %v330_v6 = vpack.c.bf16 %v257_v2, %v241_v1  ;;  %v259_v7 = vsel %vm256_vm4, %v740_v50, %v750_v60  ;;  %vm484_vm3 = vcmask 978720   ;;  %vm495_vm4 = vmor %vm494_vm1, %vm493_vm0  ;;  %vm553_vm0 = vcmask 519520  }
  0x9d   : > { %v760_v8 = vunpack.i.h.bf16 %v758_v4  ;;  %v759_v9 = vunpack.i.l.bf16 %v758_v4  ;;  %v755_v10 = vunpack.i.h.bf16 %v753_v5  ;;  %v754_v11 = vunpack.i.l.bf16 %v753_v5  ;;  %411 = vmatprep.subr.bf16.mxu1 %v333_v0 }
  0x9e   : > { %371 = vmatpush1.bf16.msra.mxu0 %v330_v6  ;;  %v332_v12 = vpack.c.bf16 %v259_v7, %v243_v3  ;;  %vm562_vm1 = vcmask 683520  }
  0x9f   : > { %v277_v13 = vsel %vm275_vm6, %v754_v11, %v755_v10  ;;  %v296_v14 = vsel %vm294_vm5, %v759_v9, %v760_v8 }
  0xa0   : > { %412 = vmatpush1.bf16.msra.mxu1 %v332_v12  ;;  %v285_v15 = vpop.permute.xlu1 %284  ;;  %v763_v16 = vpop.permute.xlu0 %762  ;;  %v335_v17 = vpack.c.bf16 %v296_v14, %v277_v13 }
  0xa1   : > { %v764_v18 = vunpack.i.l.bf16 %v763_v16  ;;  %v295_v19 = vsel %vm294_vm5, %v285_v15, %v759_v9  ;;  %v765_v26 = vunpack.i.h.bf16 %v763_v16 }
  0xa2   : > { %372 = vmatprep.subr.bf16.mxu0 %v335_v17 }
  0xa3   : > { %v276_v20 = vsel %vm275_vm6, %v764_v18, %v754_v11  ;;  %v278_v38 = vsel %vm275_vm6, %v755_v10, %v765_v26 }
  0xa4   : > { %v308_v21 = vpop.permute.xlu1 %307  ;;  %v768_v22 = vpop.permute.xlu0 %767  ;;  %v334_v23 = vpack.c.bf16 %v295_v19, %v276_v20 }
  0xa5   : > { %v770_v24 = vunpack.i.h.bf16 %v768_v22  ;;  %v769_v25 = vunpack.i.l.bf16 %v768_v22 }
  0xa6   : > { %373 = vmatpush1.bf16.msra.mxu0 %v334_v23 }
  0xa7   : > { %v315_v27 = vsel %vm313_vm7, %v770_v24, %v308_v21  ;;  %v314_v28 = vsel %vm313_vm7, %v769_v25, %v770_v24 }
  0xa8   : > { %v339_v29 = vpack.c.bf16 %v315_v27, %v315_v27  ;;  %v773_v30 = vpop.permute.xlu1 %772  ;;  %v274_v31 = vpop.permute.xlu0 %273  ;;  %v338_v32 = vpack.c.bf16 %v314_v28, %v314_v28 }
  0xa9   : > { %v775_v33 = vunpack.i.h.bf16 %v773_v30  ;;  %v774_v34 = vunpack.i.l.bf16 %v773_v30  ;;  %v279_v37 = vsel %vm275_vm6, %v765_v26, %v274_v31 }
  0xaa   : > { %647 = vmatprep.subr.msk.bf16.mxu0 %vm353_vm8, %v339_v29  ;;  %v355_v35 = vsel %vm353_vm8, %v338_v32, 0 }
  0xab   : > { %v298_v36 = vsel %vm294_vm5, %v774_v34, %v775_v33  ;;  %375 = vmatpush1.bf16.msra.mxu0 %v355_v35  ;;  %v297_v39 = vsel %vm294_vm5, %v760_v8, %v774_v34  ;;  %vm500_vm5 = vcmask 257120  }
  0xac   : > { %v337_v41 = vpack.c.bf16 %v298_v36, %v279_v37  ;;  %v778_v42 = vpop.permute.xlu0 %777  ;;  %v336_v43 = vpack.c.bf16 %v297_v39, %v278_v38 }
  0xad   : > { %v780_v44 = vunpack.i.h.bf16 %v778_v42  ;;  %v779_v45 = vunpack.i.l.bf16 %v778_v42 }
  0xae   : > { %413 = vmatprep.subr.bf16.mxu1 %v337_v41  ;;  %648 = vmatmul.mubr.msk.bf16.vlgmr.msra.gmra.mrb[0].mxu0 %vm349_vm9, %v342_v40 }
  0xaf   : > { %v317_v46 = vsel %vm313_vm7, %v779_v45, %v780_v44  ;;  %414 = vmatpush1.bf16.msra.mxu1 %v336_v43  ;;  %v316_v47 = vsel %vm313_vm7, %v308_v21, %v779_v45  ;;  %vm505_vm7 = vcmask 421120  }
  0xb0   : > { %v341_v48 = vpack.c.bf16 %v317_v46, %v317_v46  ;;  %v340_v49 = vpack.c.bf16 %v316_v47, %v316_v47 }
  0xb2   : > { %649 = vmatprep.subr.msk.bf16.mxu1 %vm353_vm8, %v341_v48  ;;  %v361_v50 = vsel %vm353_vm8, %v340_v49, 0  ;;  %vm519_vm8 = vcmask 719872  }
  0xb3   : > { %416 = vmatpush1.bf16.msra.mxu1 %v361_v50 }
  0xb6   : > { %650 = vmatmul.mubr.msk.bf16.vlgmr.msra.gmra.mrb[0].mxu1 %vm349_vm9, %v342_v40  ;;  %vm510_vm9 = vcmask 585120  }
  0xb9   : > { %v347_v51 = vpop.permute.xlu1 %346 }
 0x181   : > { %v400_v52 = vpop.f32.mrb[0].mxu0 }
 0x182   : > { %v401_v53 = vadd.f32 %v400_v52, %v347_v51  ;;  %v402_v54 = vpop.f32.mrb[1].mxu0 }
 0x183   : > { %v403_v55 = vadd.f32 %v402_v54, %v347_v51  ;;  %v404_v56 = vpop.f32.mrb[2].mxu0 }
 0x184   : > { %v448_v57 = vpack.c.bf16 %v401_v53, %v401_v53  ;;  %v405_v58 = vpop.f32.mrb[3].mxu0 }
 0x185   : > { %v661_v59 = vpack.c.bf16 %v403_v55, %v401_v53  ;;  %v662_v3 = vpack.c.bf16 %v403_v55, %v403_v55 }
 0x186   : > { %450 = vst.msk [vmem:[%s910_s6] sm:$0xf] %vm449_vm10, %v448_v57  ;;  %vm536_vm10 = vcmask 1044352  }
 0x189   : > { %v441_v60 = vpop.f32.mrb[0].mxu1 }
 0x18a   : > { %v442_v61 = vadd.f32 %v441_v60, %v347_v51  ;;  %v443_v62 = vpop.f32.mrb[1].mxu1 }
 0x18b   : > { %v445_v63 = vpop.f32.mrb[2].mxu1  ;;  %v444_v4 = vadd.f32 %v443_v62, %v347_v51 }
 0x18c   : > { %v663_v0 = vpack.c.bf16 %v442_v61, %v403_v55  ;;  %v664_v1 = vpack.c.bf16 %v442_v61, %v442_v61  ;;  %v446_v2 = vpop.f32.mrb[3].mxu1 }
 0x18d   : > { %v665_v5 = vpack.c.bf16 %v444_v4, %v444_v4 }
 0x18e   : > { %525 = vrot.lane.b32.xlu1 %v664_v1, %s800_s7  ;;  %530 = vrot.lane.b32.xlu0 %v664_v1, %s797_s24  ;;  %s815_s24 = smov 52  }
 0x192   : > { %545 = vrot.lane.b32.xlu1 %v664_v1, %s801_s8  ;;  %540 = vrot.lane.b32.xlu0 %v664_v1, %s802_s9 }
 0x196   : > { %459 = vrot.lane.b32.xlu1 %v448_v57, %s803_s10  ;;  %454 = vrot.lane.b32.xlu0 %v448_v57, %s804_s11 }
 0x19a   : > { %464 = vrot.lane.b32.xlu1 %v448_v57, %s805_s13  ;;  %478 = vrot.lane.b32.xlu0 %v661_v59, %s806_s14 }
 0x19e   : > { %469 = vrot.lane.b32.xlu1 %v448_v57, %s807_s15  ;;  %487 = vrot.lane.b32.xlu0 %v662_v3, %s793_s20  ;;  %s816_s20 = smov 56  }
 0x1a2   : > { %516 = vrot.lane.b32.xlu1 %v663_v0, %s808_s16  ;;  %497 = vrot.lane.b32.xlu0 %v662_v3, %s809_s17 }
 0x1a6   : > { %507 = vrot.lane.b32.xlu1 %v662_v3, %s810_s18  ;;  %502 = vrot.lane.b32.xlu0 %v662_v3, %s811_s19 }
 0x1aa   : > { %559 = vrot.lane.b32.xlu1 %v665_v5, %s812_s21  ;;  %550 = vrot.lane.b32.xlu0 %v664_v1, %s813_s22 }
 0x1ae   : > { %564 = vrot.lane.b32.xlu1 %v665_v5, %s814_s23  ;;  %574 = vrot.lane.b32.xlu0 %v665_v5, %s815_s24 }
 0x1b2   : > { %569 = vrot.lane.b32.xlu0 %v665_v5, %s816_s20 }
 0x200   : > { %v526_v6 = vpop.permute.xlu1 %525  ;;  %v531_v7 = vpop.permute.xlu0 %530 }
 0x201   : > { %v532_v23 = vrot.slane %v531_v7, 4 }
 0x203   : > { %v534_v27 = vsel %vm275_vm6, %v532_v23, %v531_v7  ;;  %vm577_vm6 = vcmask 424960  }
 0x204   : > { %v546_v8 = vpop.permute.xlu1 %545  ;;  %v541_v9 = vpop.permute.xlu0 %540 }
 0x208   : > { %v460_v10 = vpop.permute.xlu1 %459  ;;  %v455_v11 = vpop.permute.xlu0 %454 }
 0x209   : > { %458 = vst.msk [vmem:[%s910_s6] sm:$0xf] %vm457_vm11, %v455_v11  ;;  %vm537_vm11 = vcmask 31748  }
 0x20a   : > { %463 = vst.msk [vmem:[%s910_s6] sm:$0xf] %vm462_vm12, %v460_v10  ;;  %vm522_vm12 = vcmask 749120  }
 0x20c   : > { %v465_v12 = vpop.permute.xlu1 %464  ;;  %v479_v13 = vpop.permute.xlu0 %478 }
 0x20d   : > { %468 = vst.msk [vmem:[%s910_s6] sm:$0xf] %vm467_vm13, %v465_v12  ;;  %v480_v14 = vrot.slane %v479_v13, 4  ;;  %vm538_vm13 = vmor %vm537_vm11, %vm536_vm10 }
 0x20f   : > { %v482_v17 = vsel %vm481_vm14, %v479_v13, %v480_v14  ;;  %vm543_vm14 = vcmask 191520  }
 0x210   : > { %v470_v15 = vpop.permute.xlu1 %469  ;;  %v488_v16 = vpop.permute.xlu0 %487 }
 0x211   : > { %473 = vst.msk [vmem:[%s910_s6] sm:$0xf] %vm472_vm15, %v470_v15  ;;  %v489_v18 = vrot.slane %v488_v16, 4  ;;  %vm548_vm15 = vcmask 355520  }
 0x212   : > { %485 = vst.msk [vmem:[%s910_s6] sm:$0xf] %vm484_vm3, %v482_v17  ;;  %vm567_vm3 = vcmask 847520  }
 0x213   : > { %v491_v19 = vsel %vm224_vm2, %v489_v18, %v488_v16  ;;  %vm528_vm2 = vcmask 913120  }
 0x214   : > { %496 = vst.msk [vmem:[%s910_s6] sm:$0xff] %vm495_vm4, %v491_v19  ;;  %v517_v20 = vpop.permute.xlu1 %516  ;;  %v498_v21 = vpop.permute.xlu0 %497  ;;  %vm580_vm4 = vcmask 1044448  }
 0x215   : > { %501 = vst.msk [vmem:[%s910_s6 + $0x4] sm:$0xf] %vm500_vm5, %v498_v21  ;;  %v518_v22 = vrot.slane %v517_v20, 4  ;;  %vm581_vm5 = vcmask 130052  }
 0x217   : > { %v520_v26 = vsel %vm519_vm8, %v517_v20, %v518_v22  ;;  %vm582_vm8 = vmor %vm581_vm5, %vm580_vm4 }
 0x218   : > { %v508_v24 = vpop.permute.xlu1 %507  ;;  %v503_v25 = vpop.permute.xlu0 %502 }
 0x219   : > { %506 = vst.msk [vmem:[%s910_s6 + $0x4] sm:$0xf] %vm505_vm7, %v503_v25  ;;  %vm572_vm7 = vcmask 1011520  }
 0x21a   : > { %511 = vst.msk [vmem:[%s910_s6 + $0x4] sm:$0xf] %vm510_vm9, %v508_v24 }
 0x21b   : > { %523 = vst.msk [vmem:[%s910_s6 + $0x4] sm:$0xf] %vm522_vm12, %v520_v26 }
 0x21c   : > { %529 = vst.msk [vmem:[%s910_s6 + $0x4] sm:$0xf] %vm528_vm2, %v526_v6  ;;  %v560_v28 = vpop.permute.xlu1 %559  ;;  %v551_v29 = vpop.permute.xlu0 %550 }
 0x21d   : > { %539 = vst.msk [vmem:[%s910_s6 + $0x4] sm:$0xff] %vm538_vm13, %v534_v27 }
 0x21e   : > { %544 = vst.msk [vmem:[%s910_s6 + $0x8] sm:$0xf] %vm543_vm14, %v541_v9 }
 0x21f   : > { %549 = vst.msk [vmem:[%s910_s6 + $0x8] sm:$0xf] %vm548_vm15, %v546_v8 }
 0x220   : > { %554 = vst.msk [vmem:[%s910_s6 + $0x8] sm:$0xf] %vm553_vm0, %v551_v29  ;;  %v565_v30 = vpop.permute.xlu1 %564  ;;  %v575_v31 = vpop.permute.xlu0 %574 }
 0x221   : > { %563 = vst.msk [vmem:[%s910_s6 + $0x8] sm:$0xf] %vm562_vm1, %v560_v28  ;;  %v576_v32 = vrot.slane %v575_v31, 4 }
 0x222   : > { %568 = vst.msk [vmem:[%s910_s6 + $0x8] sm:$0xf] %vm567_vm3, %v565_v30 }
 0x223   : > { %v578_v34 = vsel %vm577_vm6, %v576_v32, %v575_v31 }
 0x224   : > { %v570_v33 = vpop.permute.xlu0 %569 }
 0x225   : > { %573 = vst.msk [vmem:[%s910_s6 + $0x8] sm:$0xf] %vm572_vm7, %v570_v33 }
 0x226   : > { %583 = vst.msk [vmem:[%s910_s6 + $0x8] sm:$0xff] %vm582_vm8, %v578_v34 }
 0x227 PF: > { %s13_s12 = sadd.s32 1, %s789_s12  }
 0x228   : > { %p10_p4 = scmp.ge.s32.totalorder %s13_s12, 4  }
 0x22a   :  { %12 = sbr.rel (!%p10_p4) target bundleno = 1 (0x1), region = 62 }

</bundles_post_ra>
